<compile_context>
chip_gen: v7x
topology: tpu7x:2x2x1
jax: 0.10.0
libtpu: 0.0.40
codegen_flags: <defaults>
</compile_context>

<pallas_src>
import functools
import math

import jax
import jax.numpy as jnp
from jax.experimental import pallas as pl
from jax.experimental.pallas import tpu as pltpu


PARAM_DTYPE = jnp.bfloat16     # bf16 weights/activations, f32 accumulation
LN_EPS = 1e-5


# ----------------------------------------------------------------------------
# Tiled linear kernel (patch embed / prompt projections)
# ----------------------------------------------------------------------------

def _matmul_kernel(x_ref, w_ref, b_ref, o_ref, acc_ref, *, activation):
    @pl.when(pl.program_id(2) == 0)
    def _init():
        acc_ref[...] = jnp.zeros_like(acc_ref)

    acc_ref[...] += jnp.dot(x_ref[...], w_ref[...],
                            preferred_element_type=jnp.float32)

    @pl.when(pl.program_id(2) == pl.num_programs(2) - 1)
    def _finalize():
        y = acc_ref[...] + b_ref[...].astype(jnp.float32)
        if activation == "quick_gelu":        # CLIP QuickGELU: x * sigmoid(1.702 x)
            y = y * jax.nn.sigmoid(1.702 * y)
        o_ref[...] = y.astype(o_ref.dtype)


def _pick_tile(dim, target):
    return target if (dim >= target and dim % target == 0) else dim


def pallas_linear(x, w, b=None, activation=None, tm=256, tn=256, tk=512):
    """x: (M, K), w: (K, N), b: (N,) or None -> (M, N)."""
    M, K = x.shape
    K2, N = w.shape
    assert K == K2
    if b is None:
        b = jnp.zeros((N,), w.dtype)
    b2 = b.reshape(1, N)
    tm, tn, tk = _pick_tile(M, tm), _pick_tile(N, tn), _pick_tile(K, tk)
    grid = (M // tm, N // tn, K // tk)
    return pl.pallas_call(
        functools.partial(_matmul_kernel, activation=activation),
        out_shape=jax.ShapeDtypeStruct((M, N), x.dtype),
        grid=grid,
        in_specs=[
            pl.BlockSpec((tm, tk), lambda i, j, k: (i, k)),
            pl.BlockSpec((tk, tn), lambda i, j, k: (k, j)),
            pl.BlockSpec((1, tn), lambda i, j, k: (0, j)),
        ],
        out_specs=pl.BlockSpec((tm, tn), lambda i, j, k: (i, j)),
        scratch_shapes=[pltpu.VMEM((tm, tn), jnp.float32)],
        compiler_params=pltpu.CompilerParams(
            dimension_semantics=("parallel", "parallel", "arbitrary")),
    )(x, w, b2)


# ----------------------------------------------------------------------------
# Standalone LayerNorm (only used for the vision ln_pre)
# ----------------------------------------------------------------------------

def _ln_kernel(x_ref, g_ref, b_ref, o_ref, *, eps):
    x = x_ref[...].astype(jnp.float32)
    mu = jnp.mean(x, axis=-1, keepdims=True)
    xc = x - mu
    var = jnp.mean(xc * xc, axis=-1, keepdims=True)
    y = xc * jax.lax.rsqrt(var + eps)
    o_ref[...] = (y * g_ref[...].astype(jnp.float32)
                  + b_ref[...].astype(jnp.float32)).astype(o_ref.dtype)


def pallas_layernorm(x, gamma, beta, eps=LN_EPS):
    M, D = x.shape
    return pl.pallas_call(
        functools.partial(_ln_kernel, eps=eps),
        out_shape=jax.ShapeDtypeStruct((M, D), x.dtype),
        grid=(1,),
        in_specs=[
            pl.BlockSpec((M, D), lambda i: (0, 0)),
            pl.BlockSpec((1, D), lambda i: (0, 0)),
            pl.BlockSpec((1, D), lambda i: (0, 0)),
        ],
        out_specs=pl.BlockSpec((M, D), lambda i: (0, 0)),
    )(x, gamma.reshape(1, D), beta.reshape(1, D))


# ----------------------------------------------------------------------------
# Fused LayerNorm + projection (ln_final @ text_projection, ln_post @ proj)
# ----------------------------------------------------------------------------

def _ln_proj_kernel(x_ref, g_ref, b_ref, w_ref, o_ref, *, eps):
    x = x_ref[...].astype(jnp.float32)
    mu = jnp.mean(x, axis=-1, keepdims=True)
    xc = x - mu
    var = jnp.mean(xc * xc, axis=-1, keepdims=True)
    y = (xc * jax.lax.rsqrt(var + eps) * g_ref[...].astype(jnp.float32)
         + b_ref[...].astype(jnp.float32))
    o_ref[...] = jnp.dot(y.astype(w_ref.dtype), w_ref[...],
                         preferred_element_type=jnp.float32).astype(o_ref.dtype)


def pallas_ln_proj(x, gamma, beta, w, eps=LN_EPS):
    """LayerNorm(x) @ w   —   x: (M, D), w: (D, E) -> (M, E) f32."""
    M, D = x.shape
    _, E = w.shape
    return pl.pallas_call(
        functools.partial(_ln_proj_kernel, eps=eps),
        out_shape=jax.ShapeDtypeStruct((M, E), jnp.float32),
        grid=(1,),
        in_specs=[
            pl.BlockSpec((M, D), lambda i: (0, 0)),
            pl.BlockSpec((1, D), lambda i: (0, 0)),
            pl.BlockSpec((1, D), lambda i: (0, 0)),
            pl.BlockSpec((D, E), lambda i: (0, 0)),
        ],
        out_specs=pl.BlockSpec((M, E), lambda i: (0, 0)),
    )(x, gamma.reshape(1, D), beta.reshape(1, D), w)


# ----------------------------------------------------------------------------
# Fused residual attention block (one Pallas call per transformer layer)
# ----------------------------------------------------------------------------

def _block_kernel(x_ref, ln1g_ref, ln1b_ref, wqkv_ref, bqkv_ref, wo_ref, bo_ref,
                  ln2g_ref, ln2b_ref, wfc_ref, bfc_ref, wpr_ref, bpr_ref,
                  *rest, n_heads, scale, eps, has_mask):
    if has_mask:
        mask_ref, o_ref = rest
    else:
        mask_ref = None
        (o_ref,) = rest

    cdt = wqkv_ref.dtype                       # bf16 compute dtype for the MXU
    x = x_ref[0].astype(jnp.float32)           # (L, D)
    L, D = x.shape
    Dh = D // n_heads

    def layernorm(v, g_ref, b_ref):
        mu = jnp.mean(v, axis=-1, keepdims=True)
        vc = v - mu
        var = jnp.mean(vc * vc, axis=-1, keepdims=True)
        return (vc * jax.lax.rsqrt(var + eps) * g_ref[...].astype(jnp.float32)
                + b_ref[...].astype(jnp.float32))

    # ---- LN1 + packed QKV projection ----
    y = layernorm(x, ln1g_ref, ln1b_ref)
    qkv = (jnp.dot(y.astype(cdt), wqkv_ref[...],
                   preferred_element_type=jnp.float32)
           + bqkv_ref[...].astype(jnp.float32))                 # (L, 3D)

    # ---- multi-head attention with fused output projection ----
    wo = wo_ref[...]                                            # (D, D) bf16
    attn = bo_ref[...].astype(jnp.float32)                      # (1, D) -> bcast
    for h in range(n_heads):                                    # static unroll
        qh = (qkv[:, h * Dh:(h + 1) * Dh] * scale).astype(cdt)          # (L, Dh)
        kh = qkv[:, D + h * Dh:D + (h + 1) * Dh].astype(cdt)            # (L, Dh)
        vh = qkv[:, 2 * D + h * Dh:2 * D + (h + 1) * Dh].astype(cdt)    # (L, Dh)
        s = jnp.dot(qh, kh.T, preferred_element_type=jnp.float32)       # (L, L)
        if has_mask:
            s = s + mask_ref[...].astype(jnp.float32)
        s = s - jnp.max(s, axis=-1, keepdims=True)
        p = jnp.exp(s)
        p = p * pl.reciprocal(jnp.sum(p, axis=-1, keepdims=True), approx=True)
        oh = jnp.dot(p.astype(cdt), vh, preferred_element_type=jnp.float32)
        # out-proj fused per head: concat(heads) @ Wo == sum_h oh @ Wo[h-rows]
        attn = attn + jnp.dot(oh.astype(cdt), wo[h * Dh:(h + 1) * Dh, :],
                              preferred_element_type=jnp.float32)
    x = x + attn

    # ---- LN2 + MLP (fc -> QuickGELU -> proj) ----
    y = layernorm(x, ln2g_ref, ln2b_ref)
    h1 = (jnp.dot(y.astype(cdt), wfc_ref[...],
                  preferred_element_type=jnp.float32)
          + bfc_ref[...].astype(jnp.float32))
    h1 = h1 * jax.nn.sigmoid(1.702 * h1)                        # QuickGELU
    h2 = (jnp.dot(h1.astype(cdt), wpr_ref[...],
                  preferred_element_type=jnp.float32)
          + bpr_ref[...].astype(jnp.float32))

    o_ref[0] = (x + h2).astype(o_ref.dtype)


def pallas_residual_block(x, p, n_heads, mask=None, eps=LN_EPS):
    """One CLIP ResidualAttentionBlock. x: (B, L, D)."""
    B, L, D = x.shape
    Dh = D // n_heads
    scale = 1.0 / math.sqrt(Dh)
    has_mask = mask is not None

    w_args = [
        p["ln1_g"].reshape(1, D), p["ln1_b"].reshape(1, D),
        p["in_proj_w"], p["in_proj_b"].reshape(1, 3 * D),
        p["out_w"], p["out_b"].reshape(1, D),
        p["ln2_g"].reshape(1, D), p["ln2_b"].reshape(1, D),
        p["fc_w"], p["fc_b"].reshape(1, 4 * D),
        p["proj_w"], p["proj_b"].reshape(1, D),
    ]

    def full2d(a):
        return pl.BlockSpec(a.shape, lambda b: (0, 0))

    in_specs = [pl.BlockSpec((1, L, D), lambda b: (b, 0, 0))]
    in_specs += [full2d(a) for a in w_args]
    args = [x] + w_args
    if has_mask:
        in_specs.append(pl.BlockSpec((L, L), lambda b: (0, 0)))
        args.append(mask)

    return pl.pallas_call(
        functools.partial(_block_kernel, n_heads=n_heads, scale=scale,
                          eps=eps, has_mask=has_mask),
        out_shape=jax.ShapeDtypeStruct((B, L, D), x.dtype),
        grid=(B,),
        in_specs=in_specs,
        out_specs=pl.BlockSpec((1, L, D), lambda b: (b, 0, 0)),
        compiler_params=pltpu.CompilerParams(
            dimension_semantics=("parallel",),
            vmem_limit_bytes=32 * 1024 * 1024),
    )(*args)


# ----------------------------------------------------------------------------
# Final logits kernel (normalize both feature sets + scaled matmul)
# ----------------------------------------------------------------------------

def _logits_kernel(img_ref, txt_ref, ls_ref, o_ref):
    img = img_ref[...].astype(jnp.float32)
    txt = txt_ref[...].astype(jnp.float32)
    img = img * jax.lax.rsqrt(jnp.sum(img * img, axis=-1, keepdims=True))
    txt = txt * jax.lax.rsqrt(jnp.sum(txt * txt, axis=-1, keepdims=True))
    scale = jnp.exp(ls_ref[0, 0])                     # logit_scale.exp()
    o_ref[...] = (scale * jnp.dot(img, txt.T,
                                  preferred_element_type=jnp.float32)
                  ).astype(o_ref.dtype)


def pallas_logits(image_features, text_features, logit_scale):
    B, E = image_features.shape
    C, _ = text_features.shape
    ls = jnp.reshape(logit_scale.astype(jnp.float32), (1, 1))
    return pl.pallas_call(
        _logits_kernel,
        out_shape=jax.ShapeDtypeStruct((B, C), jnp.float32),
        grid=(1,),
        in_specs=[
            pl.BlockSpec((B, E), lambda i: (0, 0)),
            pl.BlockSpec((C, E), lambda i: (0, 0)),
            pl.BlockSpec((1, 1), lambda i: (0, 0)),
        ],
        out_specs=pl.BlockSpec((B, C), lambda i: (0, 0)),
    )(image_features, text_features, ls)


# ----------------------------------------------------------------------------
# Transformer glue built on the fused block kernel
# ----------------------------------------------------------------------------

def text_transformer(x, layers, mask, n_heads, deep_prompts, n_ctx):
    """MaPLe text transformer: layers > 0 replace tokens [1 : 1+n_ctx]."""
    counter = 0
    for idx, p in enumerate(layers):
        if idx > 0 and counter < len(deep_prompts):
            dp = jnp.broadcast_to(deep_prompts[counter][None],
                                  (x.shape[0], n_ctx, x.shape[2])).astype(x.dtype)
            x = jnp.concatenate([x[:, :1], dp, x[:, 1 + n_ctx:]], axis=1)
            counter += 1
        x = pallas_residual_block(x, p, n_heads, mask=mask)
    return x


def vision_transformer_blocks(x, layers, n_heads, deep_prompts, n_ctx):
    """MaPLe vision transformer: layers > 0 replace the trailing n_ctx tokens."""
    counter = 0
    L = x.shape[1]
    for idx, p in enumerate(layers):
        if idx > 0 and counter < len(deep_prompts):
            dp = jnp.broadcast_to(deep_prompts[counter][None],
                                  (x.shape[0], n_ctx, x.shape[2])).astype(x.dtype)
            x = jnp.concatenate([x[:, :L - n_ctx], dp], axis=1)
            counter += 1
        x = pallas_residual_block(x, p, n_heads, mask=None)   # no mask on vision
    return x


# ----------------------------------------------------------------------------
# MaPLe modules
# ----------------------------------------------------------------------------

def prompt_learner_forward(params, n_cls):
    ctx = params["ctx"]                                   # (n_ctx, ctx_dim)
    ctx_e = jnp.broadcast_to(ctx[None], (n_cls,) + ctx.shape)
    prompts = jnp.concatenate(
        [params["token_prefix"], ctx_e, params["token_suffix"]], axis=1)
    shared_ctx = pallas_linear(ctx, params["proj_w"], params["proj_b"])  # (n_ctx, vis_dim)
    deep_text = params["compound_prompts_text"]
    deep_vision = [
        pallas_linear(deep_text[i], params["compound_proj_w"][i],
                      params["compound_proj_b"][i])
        for i in range(len(deep_text))
    ]
    return prompts, shared_ctx, deep_text, deep_vision


def text_encoder_forward(prompts, tokenized_prompts, deep_text, tp, n_heads, n_ctx):
    x = prompts + tp["pos_emb"][None]
    # PyTorch permutes to (L, N, D); we keep (N, L, D) — semantically identical.
    x = text_transformer(x, tp["layers"], tp["mask"], n_heads, deep_text, n_ctx)
    n_cls = x.shape[0]
    eot = jnp.argmax(tokenized_prompts, axis=-1)          # EOT-token position
    x_eot = x[jnp.arange(n_cls), eot]                     # (n_cls, D); LN is per-row
    # fused ln_final + text_projection
    return pallas_ln_proj(x_eot, tp["ln_final_g"], tp["ln_final_b"],
                          tp["text_projection"])          # (n_cls, embed_dim) f32


def image_encoder_forward(image, shared_ctx, deep_vision, vp, n_heads, n_ctx, patch):
    # layout: image is NCHW (B, 3, H, W)
    image = image.astype(PARAM_DTYPE)                     # image.type(self.dtype)
    B, C, H, W = image.shape
    Gh, Gw = H // patch, W // patch
    patches = (image.reshape(B, C, Gh, patch, Gw, patch)
               .transpose(0, 2, 4, 1, 3, 5)
               .reshape(B, Gh * Gw, C * patch * patch))
    x = pallas_linear(patches.reshape(B * Gh * Gw, -1), vp["conv_w"])  # patch-embed conv
    D = x.shape[-1]
    x = x.reshape(B, Gh * Gw, D)
    cls_tok = jnp.broadcast_to(vp["class_embedding"].reshape(1, 1, D), (B, 1, D))
    x = jnp.concatenate([cls_tok, x], axis=1)
    x = x + vp["pos_emb"][None]
    vctx = jnp.broadcast_to(shared_ctx[None], (B,) + shared_ctx.shape).astype(x.dtype)
    x = jnp.concatenate([x, vctx], axis=1)                # append shared visual ctx
    L = x.shape[1]
    x = pallas_layernorm(x.reshape(B * L, D),
                         vp["ln_pre_g"], vp["ln_pre_b"]).reshape(B, L, D)
    x = vision_transformer_blocks(x, vp["layers"], n_heads, deep_vision, n_ctx)
    # fused ln_post + output projection on the CLS token
    return pallas_ln_proj(x[:, 0, :], vp["ln_post_g"], vp["ln_post_b"],
                          vp["proj"])                     # (B, embed_dim) f32


def custom_clip_forward(params, image, tokenized_prompts, cfg):
    """CustomCLIP.forward in eval mode (returns logits)."""
    # TODO(synk): training branch (F.cross_entropy(logits, label)) not implemented;
    #             the eval path (return logits) is what is reproduced here.
    n_cls, n_ctx = cfg["n_cls"], cfg["n_ctx"]
    prompts, shared_ctx, deep_text, deep_vision = prompt_learner_forward(params, n_cls)
    text_features = text_encoder_forward(
        prompts, tokenized_prompts, deep_text, params["text"], cfg["text_heads"], n_ctx)
    image_features = image_encoder_forward(
        image, shared_ctx, deep_vision, params["vision"], cfg["vis_heads"], n_ctx,
        cfg["patch"])
    return pallas_logits(image_features, text_features, params["logit_scale"])


# ----------------------------------------------------------------------------
# Deterministic synthetic parameter construction
# ----------------------------------------------------------------------------

CFG = dict(
    n_cls=4, n_ctx=2, ctx_dim=128, vis_dim=128, embed_dim=128,
    text_len=16, text_layers=2, text_heads=2,
    image_size=32, patch=8, vis_layers=2, vis_heads=2,
    prompt_depth=2, batch=2, channels=3,
)


def init_params(key, cfg):
    ks = iter(jax.random.split(key, 512))

    def nrm(shape, std=0.02):
        return (std * jax.random.normal(next(ks), shape, dtype=jnp.float32)
                ).astype(PARAM_DTYPE)

    def ones(shape):
        return jnp.ones(shape, PARAM_DTYPE)

    def zeros(shape):
        return jnp.zeros(shape, PARAM_DTYPE)

    def block(D):
        return dict(
            ln1_g=ones((D,)), ln1_b=zeros((D,)),
            in_proj_w=nrm((D, 3 * D)), in_proj_b=zeros((3 * D,)),
            out_w=nrm((D, D)), out_b=zeros((D,)),
            ln2_g=ones((D,)), ln2_b=zeros((D,)),
            fc_w=nrm((D, 4 * D)), fc_b=zeros((4 * D,)),
            proj_w=nrm((4 * D, D)), proj_b=zeros((D,)),
        )

    n_cls, n_ctx = cfg["n_cls"], cfg["n_ctx"]
    cd, vd, ed, L = cfg["ctx_dim"], cfg["vis_dim"], cfg["embed_dim"], cfg["text_len"]
    num_patches = (cfg["image_size"] // cfg["patch"]) ** 2
    n_deep = cfg["prompt_depth"] - 1

    # CLIP causal attention mask for the text transformer (kept in f32).
    causal = jnp.where(jnp.tril(jnp.ones((L, L), bool)), 0.0, -jnp.inf
                       ).astype(jnp.float32)

    return dict(
        # MultiModalPromptLearner
        ctx=nrm((n_ctx, cd)),
        token_prefix=nrm((n_cls, 1, cd)),
        token_suffix=nrm((n_cls, L - 1 - n_ctx, cd)),
        proj_w=nrm((cd, vd)), proj_b=zeros((vd,)),
        compound_prompts_text=[nrm((n_ctx, cd)) for _ in range(n_deep)],
        compound_proj_w=[nrm((cd, vd)) for _ in range(n_deep)],
        compound_proj_b=[zeros((vd,)) for _ in range(n_deep)],
        # TextEncoder
        text=dict(
            pos_emb=nrm((L, cd)),
            layers=[block(cd) for _ in range(cfg["text_layers"])],
            ln_final_g=ones((cd,)), ln_final_b=zeros((cd,)),
            text_projection=nrm((cd, ed)),
            mask=causal,
        ),
        # Vision encoder (CLIP ViT with MaPLe prompts)
        vision=dict(
            conv_w=nrm((cfg["channels"] * cfg["patch"] ** 2, vd)),
            class_embedding=nrm((vd,)),
            pos_emb=nrm((num_patches + 1, vd)),
            ln_pre_g=ones((vd,)), ln_pre_b=zeros((vd,)),
            layers=[block(vd) for _ in range(cfg["vis_layers"])],
            ln_post_g=ones((vd,)), ln_post_b=zeros((vd,)),
            proj=nrm((vd, ed)),
        ),
        logit_scale=jnp.asarray(math.log(1.0 / 0.07), jnp.float32),
    )


if __name__ == "__main__":
    key = jax.random.PRNGKey(0)
    kp, ki, kt = jax.random.split(key, 3)
    params = init_params(kp, CFG)

    image = jax.random.normal(
        ki, (CFG["batch"], CFG["channels"], CFG["image_size"], CFG["image_size"]),
        dtype=jnp.float32)

    # Synthetic tokenized prompts: EOT token (largest id) at per-class positions
    # so argmax(dim=-1) picks the EOT position, as in CLIP.
    n_cls, L = CFG["n_cls"], CFG["text_len"]
    base = jax.random.randint(kt, (n_cls, L), 1, 100, dtype=jnp.int32)
    eot_pos = jnp.arange(4, 4 + n_cls, dtype=jnp.int32)
    tokenized = base.at[jnp.arange(n_cls), eot_pos].set(49407)

    fwd = jax.jit(lambda p, im, tok: custom_clip_forward(p, im, tok, CFG))
    logits = fwd(params, image, tokenized)
    logits = jax.block_until_ready(logits)
    assert logits.shape == (CFG["batch"], CFG["n_cls"])
    assert bool(jnp.all(jnp.isfinite(logits)))
    print("KERNEL_OK")
</pallas_src>

<mosaic_0001>
module attributes {stable_mosaic.version = 11 : i64} {
  func.func @_block_kernel(%arg0: i32, %arg1: memref<1x16x128xbf16, #tpu.memory_space<vmem>>, %arg2: memref<1x128xbf16, #tpu.memory_space<vmem>>, %arg3: memref<1x128xbf16, #tpu.memory_space<vmem>>, %arg4: memref<128x384xbf16, #tpu.memory_space<vmem>>, %arg5: memref<1x384xbf16, #tpu.memory_space<vmem>>, %arg6: memref<128x128xbf16, #tpu.memory_space<vmem>>, %arg7: memref<1x128xbf16, #tpu.memory_space<vmem>>, %arg8: memref<1x128xbf16, #tpu.memory_space<vmem>>, %arg9: memref<1x128xbf16, #tpu.memory_space<vmem>>, %arg10: memref<128x512xbf16, #tpu.memory_space<vmem>>, %arg11: memref<1x512xbf16, #tpu.memory_space<vmem>>, %arg12: memref<512x128xbf16, #tpu.memory_space<vmem>>, %arg13: memref<1x128xbf16, #tpu.memory_space<vmem>>, %arg14: memref<16x16xf32, #tpu.memory_space<vmem>>, %arg15: memref<1x16x128xbf16, #tpu.memory_space<vmem>>) attributes {dimension_semantics = [#tpu.dimension_semantics<parallel>], iteration_bounds = array<i64: 4>, scalar_prefetch = 0 : i64, scratch_operands = 0 : i64, tpu.core_type = #tpu.core_type<tc>, window_params = [{transform_indices = @transform_0, window_bounds = array<i64: 1, 16, 128>}, {pipeline_mode = #tpu.pipeline_mode<synchronous>, transform_indices = @transform_1, window_bounds = array<i64: 1, 128>}, {pipeline_mode = #tpu.pipeline_mode<synchronous>, transform_indices = @transform_2, window_bounds = array<i64: 1, 128>}, {pipeline_mode = #tpu.pipeline_mode<synchronous>, transform_indices = @transform_3, window_bounds = array<i64: 128, 384>}, {pipeline_mode = #tpu.pipeline_mode<synchronous>, transform_indices = @transform_4, window_bounds = array<i64: 1, 384>}, {pipeline_mode = #tpu.pipeline_mode<synchronous>, transform_indices = @transform_5, window_bounds = array<i64: 128, 128>}, {pipeline_mode = #tpu.pipeline_mode<synchronous>, transform_indices = @transform_6, window_bounds = array<i64: 1, 128>}, {pipeline_mode = #tpu.pipeline_mode<synchronous>, transform_indices = @transform_7, window_bounds = array<i64: 1, 128>}, {pipeline_mode = #tpu.pipeline_mode<synchronous>, transform_indices = @transform_8, window_bounds = array<i64: 1, 128>}, {pipeline_mode = #tpu.pipeline_mode<synchronous>, transform_indices = @transform_9, window_bounds = array<i64: 128, 512>}, {pipeline_mode = #tpu.pipeline_mode<synchronous>, transform_indices = @transform_10, window_bounds = array<i64: 1, 512>}, {pipeline_mode = #tpu.pipeline_mode<synchronous>, transform_indices = @transform_11, window_bounds = array<i64: 512, 128>}, {pipeline_mode = #tpu.pipeline_mode<synchronous>, transform_indices = @transform_12, window_bounds = array<i64: 1, 128>}, {pipeline_mode = #tpu.pipeline_mode<synchronous>, transform_indices = @transform_13, window_bounds = array<i64: 16, 16>}, {transform_indices = @transform_14, window_bounds = array<i64: 1, 16, 128>}]} {
    %c0 = arith.constant 0 : index
    %c0_0 = arith.constant 0 : index
    %c0_1 = arith.constant 0 : index
    %0 = vector.load %arg1[%c0, %c0_0, %c0_1] : memref<1x16x128xbf16, #tpu.memory_space<vmem>>, vector<1x16x128xbf16>
    %1 = vector.shape_cast %0 : vector<1x16x128xbf16> to vector<16x128xbf16>
    %2 = arith.extf %1 : vector<16x128xbf16> to vector<16x128xf32>
    %cst = arith.constant dense<0.000000e+00> : vector<16xf32>
    %3 = vector.multi_reduction <add>, %2, %cst [1] : vector<16x128xf32> to vector<16xf32>
    %4 = vector.shape_cast %3 : vector<16xf32> to vector<16x1xf32>
    %cst_2 = arith.constant 1.280000e+02 : f32
    %5 = vector.broadcast %cst_2 : f32 to vector<16x1xf32>
    %6 = arith.divf %4, %5 : vector<16x1xf32>
    %7 = vector.broadcast %6 : vector<16x1xf32> to vector<16x128xf32>
    %8 = arith.subf %2, %7 : vector<16x128xf32>
    %9 = arith.mulf %8, %8 : vector<16x128xf32>
    %cst_3 = arith.constant dense<0.000000e+00> : vector<16xf32>
    %10 = vector.multi_reduction <add>, %9, %cst_3 [1] : vector<16x128xf32> to vector<16xf32>
    %11 = vector.shape_cast %10 : vector<16xf32> to vector<16x1xf32>
    %cst_4 = arith.constant 1.280000e+02 : f32
    %12 = vector.broadcast %cst_4 : f32 to vector<16x1xf32>
    %13 = arith.divf %11, %12 : vector<16x1xf32>
    %cst_5 = arith.constant 9.99999974E-6 : f32
    %14 = vector.broadcast %cst_5 : f32 to vector<16x1xf32>
    %15 = arith.addf %13, %14 : vector<16x1xf32>
    %16 = math.rsqrt %15 : vector<16x1xf32>
    %17 = vector.broadcast %16 : vector<16x1xf32> to vector<16x128xf32>
    %18 = arith.mulf %8, %17 : vector<16x128xf32>
    %c0_6 = arith.constant 0 : index
    %c0_7 = arith.constant 0 : index
    %19 = vector.load %arg2[%c0_6, %c0_7] : memref<1x128xbf16, #tpu.memory_space<vmem>>, vector<1x128xbf16>
    %20 = arith.extf %19 : vector<1x128xbf16> to vector<1x128xf32>
    %21 = vector.broadcast %20 : vector<1x128xf32> to vector<16x128xf32>
    %22 = arith.mulf %18, %21 : vector<16x128xf32>
    %c0_8 = arith.constant 0 : index
    %c0_9 = arith.constant 0 : index
    %23 = vector.load %arg3[%c0_8, %c0_9] : memref<1x128xbf16, #tpu.memory_space<vmem>>, vector<1x128xbf16>
    %24 = arith.extf %23 : vector<1x128xbf16> to vector<1x128xf32>
    %25 = vector.broadcast %24 : vector<1x128xf32> to vector<16x128xf32>
    %26 = arith.addf %22, %25 : vector<16x128xf32>
    %27 = arith.truncf %26 : vector<16x128xf32> to vector<16x128xbf16>
    %c0_10 = arith.constant 0 : index
    %c0_11 = arith.constant 0 : index
    %28 = vector.load %arg4[%c0_10, %c0_11] : memref<128x384xbf16, #tpu.memory_space<vmem>>, vector<128x384xbf16>
    %cst_12 = arith.constant dense<0.000000e+00> : vector<16x384xf32>
    %29 = tpu.matmul %27, %28, %cst_12 {dimension_numbers = #tpu.dot_dimension_numbers<[1], [0], [0], [1], [0, 0, 1, 1], [], []>} : vector<16x128xbf16>, vector<128x384xbf16>, vector<16x384xf32> -> vector<16x384xf32>
    %c0_13 = arith.constant 0 : index
    %c0_14 = arith.constant 0 : index
    %30 = vector.load %arg5[%c0_13, %c0_14] : memref<1x384xbf16, #tpu.memory_space<vmem>>, vector<1x384xbf16>
    %31 = arith.extf %30 : vector<1x384xbf16> to vector<1x384xf32>
    %32 = vector.broadcast %31 : vector<1x384xf32> to vector<16x384xf32>
    %33 = arith.addf %29, %32 : vector<16x384xf32>
    %c0_15 = arith.constant 0 : index
    %c0_16 = arith.constant 0 : index
    %34 = vector.load %arg6[%c0_15, %c0_16] : memref<128x128xbf16, #tpu.memory_space<vmem>>, vector<128x128xbf16>
    %c0_17 = arith.constant 0 : index
    %c0_18 = arith.constant 0 : index
    %35 = vector.load %arg7[%c0_17, %c0_18] : memref<1x128xbf16, #tpu.memory_space<vmem>>, vector<1x128xbf16>
    %36 = arith.extf %35 : vector<1x128xbf16> to vector<1x128xf32>
    %37 = vector.extract_strided_slice %33 {offsets = [0, 0], sizes = [16, 64], strides = [1, 1]} : vector<16x384xf32> to vector<16x64xf32>
    %cst_19 = arith.constant 1.250000e-01 : f32
    %38 = vector.broadcast %cst_19 : f32 to vector<16x64xf32>
    %39 = arith.mulf %37, %38 : vector<16x64xf32>
    %40 = arith.truncf %39 : vector<16x64xf32> to vector<16x64xbf16>
    %41 = vector.extract_strided_slice %33 {offsets = [0, 128], sizes = [16, 64], strides = [1, 1]} : vector<16x384xf32> to vector<16x64xf32>
    %42 = arith.truncf %41 : vector<16x64xf32> to vector<16x64xbf16>
    %43 = vector.extract_strided_slice %33 {offsets = [0, 256], sizes = [16, 64], strides = [1, 1]} : vector<16x384xf32> to vector<16x64xf32>
    %44 = arith.truncf %43 : vector<16x64xf32> to vector<16x64xbf16>
    %45 = tpu.transpose %42, [1, 0] : vector<16x64xbf16> -> vector<64x16xbf16>
    %cst_20 = arith.constant dense<0.000000e+00> : vector<16x16xf32>
    %46 = tpu.matmul %40, %45, %cst_20 {dimension_numbers = #tpu.dot_dimension_numbers<[1], [0], [0], [1], [0, 0, 1, 1], [], []>} : vector<16x64xbf16>, vector<64x16xbf16>, vector<16x16xf32> -> vector<16x16xf32>
    %c0_21 = arith.constant 0 : index
    %c0_22 = arith.constant 0 : index
    %47 = vector.load %arg14[%c0_21, %c0_22] : memref<16x16xf32, #tpu.memory_space<vmem>>, vector<16x16xf32>
    %48 = arith.addf %46, %47 : vector<16x16xf32>
    %cst_23 = arith.constant dense<0xFF800000> : vector<16xf32>
    %49 = vector.multi_reduction <maximumf>, %48, %cst_23 [1] : vector<16x16xf32> to vector<16xf32>
    %50 = vector.shape_cast %49 : vector<16xf32> to vector<16x1xf32>
    %51 = vector.broadcast %50 : vector<16x1xf32> to vector<16x16xf32>
    %52 = arith.subf %48, %51 : vector<16x16xf32>
    %53 = math.exp %52 : vector<16x16xf32>
    %cst_24 = arith.constant dense<0.000000e+00> : vector<16xf32>
    %54 = vector.multi_reduction <add>, %53, %cst_24 [1] : vector<16x16xf32> to vector<16xf32>
    %55 = vector.shape_cast %54 : vector<16xf32> to vector<16x1xf32>
    %56 = tpu.reciprocal %55 {approx = true} : vector<16x1xf32> -> vector<16x1xf32>
    %57 = vector.broadcast %56 : vector<16x1xf32> to vector<16x16xf32>
    %58 = arith.mulf %53, %57 : vector<16x16xf32>
    %59 = arith.truncf %58 : vector<16x16xf32> to vector<16x16xbf16>
    %cst_25 = arith.constant dense<0.000000e+00> : vector<16x64xf32>
    %60 = tpu.matmul %59, %44, %cst_25 {dimension_numbers = #tpu.dot_dimension_numbers<[1], [0], [0], [1], [0, 0, 1, 1], [], []>} : vector<16x16xbf16>, vector<16x64xbf16>, vector<16x64xf32> -> vector<16x64xf32>
    %61 = arith.truncf %60 : vector<16x64xf32> to vector<16x64xbf16>
    %62 = vector.extract_strided_slice %34 {offsets = [0, 0], sizes = [64, 128], strides = [1, 1]} : vector<128x128xbf16> to vector<64x128xbf16>
    %cst_26 = arith.constant dense<0.000000e+00> : vector<16x128xf32>
    %63 = tpu.matmul %61, %62, %cst_26 {dimension_numbers = #tpu.dot_dimension_numbers<[1], [0], [0], [1], [0, 0, 1, 1], [], []>} : vector<16x64xbf16>, vector<64x128xbf16>, vector<16x128xf32> -> vector<16x128xf32>
    %64 = vector.broadcast %36 : vector<1x128xf32> to vector<16x128xf32>
    %65 = arith.addf %64, %63 : vector<16x128xf32>
    %66 = vector.extract_strided_slice %33 {offsets = [0, 64], sizes = [16, 64], strides = [1, 1]} : vector<16x384xf32> to vector<16x64xf32>
    %cst_27 = arith.constant 1.250000e-01 : f32
    %67 = vector.broadcast %cst_27 : f32 to vector<16x64xf32>
    %68 = arith.mulf %66, %67 : vector<16x64xf32>
    %69 = arith.truncf %68 : vector<16x64xf32> to vector<16x64xbf16>
    %70 = vector.extract_strided_slice %33 {offsets = [0, 192], sizes = [16, 64], strides = [1, 1]} : vector<16x384xf32> to vector<16x64xf32>
    %71 = arith.truncf %70 : vector<16x64xf32> to vector<16x64xbf16>
    %72 = vector.extract_strided_slice %33 {offsets = [0, 320], sizes = [16, 64], strides = [1, 1]} : vector<16x384xf32> to vector<16x64xf32>
    %73 = arith.truncf %72 : vector<16x64xf32> to vector<16x64xbf16>
    %74 = tpu.transpose %71, [1, 0] : vector<16x64xbf16> -> vector<64x16xbf16>
    %cst_28 = arith.constant dense<0.000000e+00> : vector<16x16xf32>
    %75 = tpu.matmul %69, %74, %cst_28 {dimension_numbers = #tpu.dot_dimension_numbers<[1], [0], [0], [1], [0, 0, 1, 1], [], []>} : vector<16x64xbf16>, vector<64x16xbf16>, vector<16x16xf32> -> vector<16x16xf32>
    %c0_29 = arith.constant 0 : index
    %c0_30 = arith.constant 0 : index
    %76 = vector.load %arg14[%c0_29, %c0_30] : memref<16x16xf32, #tpu.memory_space<vmem>>, vector<16x16xf32>
    %77 = arith.addf %75, %76 : vector<16x16xf32>
    %cst_31 = arith.constant dense<0xFF800000> : vector<16xf32>
    %78 = vector.multi_reduction <maximumf>, %77, %cst_31 [1] : vector<16x16xf32> to vector<16xf32>
    %79 = vector.shape_cast %78 : vector<16xf32> to vector<16x1xf32>
    %80 = vector.broadcast %79 : vector<16x1xf32> to vector<16x16xf32>
    %81 = arith.subf %77, %80 : vector<16x16xf32>
    %82 = math.exp %81 : vector<16x16xf32>
    %cst_32 = arith.constant dense<0.000000e+00> : vector<16xf32>
    %83 = vector.multi_reduction <add>, %82, %cst_32 [1] : vector<16x16xf32> to vector<16xf32>
    %84 = vector.shape_cast %83 : vector<16xf32> to vector<16x1xf32>
    %85 = tpu.reciprocal %84 {approx = true} : vector<16x1xf32> -> vector<16x1xf32>
    %86 = vector.broadcast %85 : vector<16x1xf32> to vector<16x16xf32>
    %87 = arith.mulf %82, %86 : vector<16x16xf32>
    %88 = arith.truncf %87 : vector<16x16xf32> to vector<16x16xbf16>
    %cst_33 = arith.constant dense<0.000000e+00> : vector<16x64xf32>
    %89 = tpu.matmul %88, %73, %cst_33 {dimension_numbers = #tpu.dot_dimension_numbers<[1], [0], [0], [1], [0, 0, 1, 1], [], []>} : vector<16x16xbf16>, vector<16x64xbf16>, vector<16x64xf32> -> vector<16x64xf32>
    %90 = arith.truncf %89 : vector<16x64xf32> to vector<16x64xbf16>
    %91 = vector.extract_strided_slice %34 {offsets = [64, 0], sizes = [64, 128], strides = [1, 1]} : vector<128x128xbf16> to vector<64x128xbf16>
    %cst_34 = arith.constant dense<0.000000e+00> : vector<16x128xf32>
    %92 = tpu.matmul %90, %91, %cst_34 {dimension_numbers = #tpu.dot_dimension_numbers<[1], [0], [0], [1], [0, 0, 1, 1], [], []>} : vector<16x64xbf16>, vector<64x128xbf16>, vector<16x128xf32> -> vector<16x128xf32>
    %93 = arith.addf %65, %92 : vector<16x128xf32>
    %94 = arith.addf %2, %93 : vector<16x128xf32>
    %cst_35 = arith.constant dense<0.000000e+00> : vector<16xf32>
    %95 = vector.multi_reduction <add>, %94, %cst_35 [1] : vector<16x128xf32> to vector<16xf32>
    %96 = vector.shape_cast %95 : vector<16xf32> to vector<16x1xf32>
    %cst_36 = arith.constant 1.280000e+02 : f32
    %97 = vector.broadcast %cst_36 : f32 to vector<16x1xf32>
    %98 = arith.divf %96, %97 : vector<16x1xf32>
    %99 = vector.broadcast %98 : vector<16x1xf32> to vector<16x128xf32>
    %100 = arith.subf %94, %99 : vector<16x128xf32>
    %101 = arith.mulf %100, %100 : vector<16x128xf32>
    %cst_37 = arith.constant dense<0.000000e+00> : vector<16xf32>
    %102 = vector.multi_reduction <add>, %101, %cst_37 [1] : vector<16x128xf32> to vector<16xf32>
    %103 = vector.shape_cast %102 : vector<16xf32> to vector<16x1xf32>
    %cst_38 = arith.constant 1.280000e+02 : f32
    %104 = vector.broadcast %cst_38 : f32 to vector<16x1xf32>
    %105 = arith.divf %103, %104 : vector<16x1xf32>
    %cst_39 = arith.constant 9.99999974E-6 : f32
    %106 = vector.broadcast %cst_39 : f32 to vector<16x1xf32>
    %107 = arith.addf %105, %106 : vector<16x1xf32>
    %108 = math.rsqrt %107 : vector<16x1xf32>
    %109 = vector.broadcast %108 : vector<16x1xf32> to vector<16x128xf32>
    %110 = arith.mulf %100, %109 : vector<16x128xf32>
    %c0_40 = arith.constant 0 : index
    %c0_41 = arith.constant 0 : index
    %111 = vector.load %arg8[%c0_40, %c0_41] : memref<1x128xbf16, #tpu.memory_space<vmem>>, vector<1x128xbf16>
    %112 = arith.extf %111 : vector<1x128xbf16> to vector<1x128xf32>
    %113 = vector.broadcast %112 : vector<1x128xf32> to vector<16x128xf32>
    %114 = arith.mulf %110, %113 : vector<16x128xf32>
    %c0_42 = arith.constant 0 : index
    %c0_43 = arith.constant 0 : index
    %115 = vector.load %arg9[%c0_42, %c0_43] : memref<1x128xbf16, #tpu.memory_space<vmem>>, vector<1x128xbf16>
    %116 = arith.extf %115 : vector<1x128xbf16> to vector<1x128xf32>
    %117 = vector.broadcast %116 : vector<1x128xf32> to vector<16x128xf32>
    %118 = arith.addf %114, %117 : vector<16x128xf32>
    %119 = arith.truncf %118 : vector<16x128xf32> to vector<16x128xbf16>
    %c0_44 = arith.constant 0 : index
    %c0_45 = arith.constant 0 : index
    %120 = vector.load %arg10[%c0_44, %c0_45] : memref<128x512xbf16, #tpu.memory_space<vmem>>, vector<128x512xbf16>
    %cst_46 = arith.constant dense<0.000000e+00> : vector<16x512xf32>
    %121 = tpu.matmul %119, %120, %cst_46 {dimension_numbers = #tpu.dot_dimension_numbers<[1], [0], [0], [1], [0, 0, 1, 1], [], []>} : vector<16x128xbf16>, vector<128x512xbf16>, vector<16x512xf32> -> vector<16x512xf32>
    %c0_47 = arith.constant 0 : index
    %c0_48 = arith.constant 0 : index
    %122 = vector.load %arg11[%c0_47, %c0_48] : memref<1x512xbf16, #tpu.memory_space<vmem>>, vector<1x512xbf16>
    %123 = arith.extf %122 : vector<1x512xbf16> to vector<1x512xf32>
    %124 = vector.broadcast %123 : vector<1x512xf32> to vector<16x512xf32>
    %125 = arith.addf %121, %124 : vector<16x512xf32>
    %cst_49 = arith.constant 1.702000e+00 : f32
    %126 = vector.broadcast %cst_49 : f32 to vector<16x512xf32>
    %127 = arith.mulf %126, %125 : vector<16x512xf32>
    %128 = arith.negf %127 : vector<16x512xf32>
    %129 = math.exp %128 : vector<16x512xf32>
    %cst_50 = arith.constant 1.000000e+00 : f32
    %130 = vector.broadcast %cst_50 : f32 to vector<16x512xf32>
    %131 = arith.addf %130, %129 : vector<16x512xf32>
    %132 = arith.divf %130, %131 : vector<16x512xf32>
    %133 = arith.mulf %125, %132 : vector<16x512xf32>
    %134 = arith.truncf %133 : vector<16x512xf32> to vector<16x512xbf16>
    %c0_51 = arith.constant 0 : index
    %c0_52 = arith.constant 0 : index
    %135 = vector.load %arg12[%c0_51, %c0_52] : memref<512x128xbf16, #tpu.memory_space<vmem>>, vector<512x128xbf16>
    %cst_53 = arith.constant dense<0.000000e+00> : vector<16x128xf32>
    %136 = tpu.matmul %134, %135, %cst_53 {dimension_numbers = #tpu.dot_dimension_numbers<[1], [0], [0], [1], [0, 0, 1, 1], [], []>} : vector<16x512xbf16>, vector<512x128xbf16>, vector<16x128xf32> -> vector<16x128xf32>
    %c0_54 = arith.constant 0 : index
    %c0_55 = arith.constant 0 : index
    %137 = vector.load %arg13[%c0_54, %c0_55] : memref<1x128xbf16, #tpu.memory_space<vmem>>, vector<1x128xbf16>
    %138 = arith.extf %137 : vector<1x128xbf16> to vector<1x128xf32>
    %139 = vector.broadcast %138 : vector<1x128xf32> to vector<16x128xf32>
    %140 = arith.addf %136, %139 : vector<16x128xf32>
    %141 = arith.addf %94, %140 : vector<16x128xf32>
    %142 = arith.truncf %141 : vector<16x128xf32> to vector<16x128xbf16>
    %c0_56 = arith.constant 0 : index
    %c0_57 = arith.constant 0 : index
    %c0_58 = arith.constant 0 : index
    %143 = vector.load %arg15[%c0_56, %c0_57, %c0_58] : memref<1x16x128xbf16, #tpu.memory_space<vmem>>, vector<1x16x128xbf16>
    %144 = vector.shape_cast %143 : vector<1x16x128xbf16> to vector<16x128xbf16>
    %145 = vector.shape_cast %142 : vector<16x128xbf16> to vector<1x16x128xbf16>
    tpu.vector_store %arg15[%c0_56, %c0_57, %c0_58], %145 {strides = array<i32>} : memref<1x16x128xbf16, #tpu.memory_space<vmem>>, vector<1x16x128xbf16>,
    return
  }
  func.func @transform_0(%arg0: i32) -> (i32, i32, i32) {
    %c0_i32 = arith.constant 0 : i32
    %c0_i32_0 = arith.constant 0 : i32
    %c0_i32_1 = arith.constant 0 : i32
    return %arg0, %c0_i32, %c0_i32_0 : i32, i32, i32
  }
  func.func @transform_1(%arg0: i32) -> (i32, i32) {
    %c0_i32 = arith.constant 0 : i32
    %c0_i32_0 = arith.constant 0 : i32
    %c0_i32_1 = arith.constant 0 : i32
    return %c0_i32, %c0_i32_0 : i32, i32
  }
  func.func @transform_2(%arg0: i32) -> (i32, i32) {
    %c0_i32 = arith.constant 0 : i32
    %c0_i32_0 = arith.constant 0 : i32
    %c0_i32_1 = arith.constant 0 : i32
    return %c0_i32, %c0_i32_0 : i32, i32
  }
  func.func @transform_3(%arg0: i32) -> (i32, i32) {
    %c0_i32 = arith.constant 0 : i32
    %c0_i32_0 = arith.constant 0 : i32
    %c0_i32_1 = arith.constant 0 : i32
    return %c0_i32, %c0_i32_0 : i32, i32
  }
  func.func @transform_4(%arg0: i32) -> (i32, i32) {
    %c0_i32 = arith.constant 0 : i32
    %c0_i32_0 = arith.constant 0 : i32
    %c0_i32_1 = arith.constant 0 : i32
    return %c0_i32, %c0_i32_0 : i32, i32
  }
  func.func @transform_5(%arg0: i32) -> (i32, i32) {
    %c0_i32 = arith.constant 0 : i32
    %c0_i32_0 = arith.constant 0 : i32
    %c0_i32_1 = arith.constant 0 : i32
    return %c0_i32, %c0_i32_0 : i32, i32
  }
  func.func @transform_6(%arg0: i32) -> (i32, i32) {
    %c0_i32 = arith.constant 0 : i32
    %c0_i32_0 = arith.constant 0 : i32
    %c0_i32_1 = arith.constant 0 : i32
    return %c0_i32, %c0_i32_0 : i32, i32
  }
  func.func @transform_7(%arg0: i32) -> (i32, i32) {
    %c0_i32 = arith.constant 0 : i32
    %c0_i32_0 = arith.constant 0 : i32
    %c0_i32_1 = arith.constant 0 : i32
    return %c0_i32, %c0_i32_0 : i32, i32
  }
  func.func @transform_8(%arg0: i32) -> (i32, i32) {
    %c0_i32 = arith.constant 0 : i32
    %c0_i32_0 = arith.constant 0 : i32
    %c0_i32_1 = arith.constant 0 : i32
    return %c0_i32, %c0_i32_0 : i32, i32
  }
  func.func @transform_9(%arg0: i32) -> (i32, i32) {
    %c0_i32 = arith.constant 0 : i32
    %c0_i32_0 = arith.constant 0 : i32
    %c0_i32_1 = arith.constant 0 : i32
    return %c0_i32, %c0_i32_0 : i32, i32
  }
  func.func @transform_10(%arg0: i32) -> (i32, i32) {
    %c0_i32 = arith.constant 0 : i32
    %c0_i32_0 = arith.constant 0 : i32
    %c0_i32_1 = arith.constant 0 : i32
    return %c0_i32, %c0_i32_0 : i32, i32
  }
  func.func @transform_11(%arg0: i32) -> (i32, i32) {
    %c0_i32 = arith.constant 0 : i32
    %c0_i32_0 = arith.constant 0 : i32
    %c0_i32_1 = arith.constant 0 : i32
    return %c0_i32, %c0_i32_0 : i32, i32
  }
  func.func @transform_12(%arg0: i32) -> (i32, i32) {
    %c0_i32 = arith.constant 0 : i32
    %c0_i32_0 = arith.constant 0 : i32
    %c0_i32_1 = arith.constant 0 : i32
    return %c0_i32, %c0_i32_0 : i32, i32
  }
  func.func @transform_13(%arg0: i32) -> (i32, i32) {
    %c0_i32 = arith.constant 0 : i32
    %c0_i32_0 = arith.constant 0 : i32
    %c0_i32_1 = arith.constant 0 : i32
    return %c0_i32, %c0_i32_0 : i32, i32
  }
  func.func @transform_14(%arg0: i32) -> (i32, i32, i32) {
    %c0_i32 = arith.constant 0 : i32
    %c0_i32_0 = arith.constant 0 : i32
    %c0_i32_1 = arith.constant 0 : i32
    return %arg0, %c0_i32, %c0_i32_0 : i32, i32, i32
  }
}

module attributes {stable_mosaic.version = 11 : i64} {
  func.func @_block_kernel(%arg0: i32, %arg1: memref<1x16x128xbf16, #tpu.memory_space<vmem>>, %arg2: memref<1x128xbf16, #tpu.memory_space<vmem>>, %arg3: memref<1x128xbf16, #tpu.memory_space<vmem>>, %arg4: memref<128x384xbf16, #tpu.memory_space<vmem>>, %arg5: memref<1x384xbf16, #tpu.memory_space<vmem>>, %arg6: memref<128x128xbf16, #tpu.memory_space<vmem>>, %arg7: memref<1x128xbf16, #tpu.memory_space<vmem>>, %arg8: memref<1x128xbf16, #tpu.memory_space<vmem>>, %arg9: memref<1x128xbf16, #tpu.memory_space<vmem>>, %arg10: memref<128x512xbf16, #tpu.memory_space<vmem>>, %arg11: memref<1x512xbf16, #tpu.memory_space<vmem>>, %arg12: memref<512x128xbf16, #tpu.memory_space<vmem>>, %arg13: memref<1x128xbf16, #tpu.memory_space<vmem>>, %arg14: memref<16x16xf32, #tpu.memory_space<vmem>>, %arg15: memref<1x16x128xbf16, #tpu.memory_space<vmem>>) attributes {dimension_semantics = [#tpu.dimension_semantics<parallel>], iteration_bounds = array<i64: 4>, scalar_prefetch = 0 : i64, scratch_operands = 0 : i64, tpu.core_type = #tpu.core_type<tc>, window_params = [{transform_indices = @transform_0, window_bounds = array<i64: 1, 16, 128>}, {pipeline_mode = #tpu.pipeline_mode<synchronous>, transform_indices = @transform_1, window_bounds = array<i64: 1, 128>}, {pipeline_mode = #tpu.pipeline_mode<synchronous>, transform_indices = @transform_2, window_bounds = array<i64: 1, 128>}, {pipeline_mode = #tpu.pipeline_mode<synchronous>, transform_indices = @transform_3, window_bounds = array<i64: 128, 384>}, {pipeline_mode = #tpu.pipeline_mode<synchronous>, transform_indices = @transform_4, window_bounds = array<i64: 1, 384>}, {pipeline_mode = #tpu.pipeline_mode<synchronous>, transform_indices = @transform_5, window_bounds = array<i64: 128, 128>}, {pipeline_mode = #tpu.pipeline_mode<synchronous>, transform_indices = @transform_6, window_bounds = array<i64: 1, 128>}, {pipeline_mode = #tpu.pipeline_mode<synchronous>, transform_indices = @transform_7, window_bounds = array<i64: 1, 128>}, {pipeline_mode = #tpu.pipeline_mode<synchronous>, transform_indices = @transform_8, window_bounds = array<i64: 1, 128>}, {pipeline_mode = #tpu.pipeline_mode<synchronous>, transform_indices = @transform_9, window_bounds = array<i64: 128, 512>}, {pipeline_mode = #tpu.pipeline_mode<synchronous>, transform_indices = @transform_10, window_bounds = array<i64: 1, 512>}, {pipeline_mode = #tpu.pipeline_mode<synchronous>, transform_indices = @transform_11, window_bounds = array<i64: 512, 128>}, {pipeline_mode = #tpu.pipeline_mode<synchronous>, transform_indices = @transform_12, window_bounds = array<i64: 1, 128>}, {pipeline_mode = #tpu.pipeline_mode<synchronous>, transform_indices = @transform_13, window_bounds = array<i64: 16, 16>}, {transform_indices = @transform_14, window_bounds = array<i64: 1, 16, 128>}]} {
    %c0 = arith.constant 0 : index
    %c0_0 = arith.constant 0 : index
    %c0_1 = arith.constant 0 : index
    %0 = vector.load %arg1[%c0, %c0_0, %c0_1] : memref<1x16x128xbf16, #tpu.memory_space<vmem>>, vector<1x16x128xbf16>
    %1 = vector.shape_cast %0 : vector<1x16x128xbf16> to vector<16x128xbf16>
    %2 = arith.extf %1 : vector<16x128xbf16> to vector<16x128xf32>
    %cst = arith.constant dense<0.000000e+00> : vector<16xf32>
    %3 = vector.multi_reduction <add>, %2, %cst [1] : vector<16x128xf32> to vector<16xf32>
    %4 = vector.shape_cast %3 : vector<16xf32> to vector<16x1xf32>
    %cst_2 = arith.constant 1.280000e+02 : f32
    %5 = vector.broadcast %cst_2 : f32 to vector<16x1xf32>
    %6 = arith.divf %4, %5 : vector<16x1xf32>
    %7 = vector.broadcast %6 : vector<16x1xf32> to vector<16x128xf32>
    %8 = arith.subf %2, %7 : vector<16x128xf32>
    %9 = arith.mulf %8, %8 : vector<16x128xf32>
    %cst_3 = arith.constant dense<0.000000e+00> : vector<16xf32>
    %10 = vector.multi_reduction <add>, %9, %cst_3 [1] : vector<16x128xf32> to vector<16xf32>
    %11 = vector.shape_cast %10 : vector<16xf32> to vector<16x1xf32>
    %cst_4 = arith.constant 1.280000e+02 : f32
    %12 = vector.broadcast %cst_4 : f32 to vector<16x1xf32>
    %13 = arith.divf %11, %12 : vector<16x1xf32>
    %cst_5 = arith.constant 9.99999974E-6 : f32
    %14 = vector.broadcast %cst_5 : f32 to vector<16x1xf32>
    %15 = arith.addf %13, %14 : vector<16x1xf32>
    %16 = math.rsqrt %15 : vector<16x1xf32>
    %17 = vector.broadcast %16 : vector<16x1xf32> to vector<16x128xf32>
    %18 = arith.mulf %8, %17 : vector<16x128xf32>
    %c0_6 = arith.constant 0 : index
    %c0_7 = arith.constant 0 : index
    %19 = vector.load %arg2[%c0_6, %c0_7] : memref<1x128xbf16, #tpu.memory_space<vmem>>, vector<1x128xbf16>
    %20 = arith.extf %19 : vector<1x128xbf16> to vector<1x128xf32>
    %21 = vector.broadcast %20 : vector<1x128xf32> to vector<16x128xf32>
    %22 = arith.mulf %18, %21 : vector<16x128xf32>
    %c0_8 = arith.constant 0 : index
    %c0_9 = arith.constant 0 : index
    %23 = vector.load %arg3[%c0_8, %c0_9] : memref<1x128xbf16, #tpu.memory_space<vmem>>, vector<1x128xbf16>
    %24 = arith.extf %23 : vector<1x128xbf16> to vector<1x128xf32>
    %25 = vector.broadcast %24 : vector<1x128xf32> to vector<16x128xf32>
    %26 = arith.addf %22, %25 : vector<16x128xf32>
    %27 = arith.truncf %26 : vector<16x128xf32> to vector<16x128xbf16>
    %c0_10 = arith.constant 0 : index
    %c0_11 = arith.constant 0 : index
    %28 = vector.load %arg4[%c0_10, %c0_11] : memref<128x384xbf16, #tpu.memory_space<vmem>>, vector<128x384xbf16>
    %cst_12 = arith.constant dense<0.000000e+00> : vector<16x384xf32>
    %29 = tpu.matmul %27, %28, %cst_12 {dimension_numbers = #tpu.dot_dimension_numbers<[1], [0], [0], [1], [0, 0, 1, 1], [], []>} : vector<16x128xbf16>, vector<128x384xbf16>, vector<16x384xf32> -> vector<16x384xf32>
    %c0_13 = arith.constant 0 : index
    %c0_14 = arith.constant 0 : index
    %30 = vector.load %arg5[%c0_13, %c0_14] : memref<1x384xbf16, #tpu.memory_space<vmem>>, vector<1x384xbf16>
    %31 = arith.extf %30 : vector<1x384xbf16> to vector<1x384xf32>
    %32 = vector.broadcast %31 : vector<1x384xf32> to vector<16x384xf32>
    %33 = arith.addf %29, %32 : vector<16x384xf32>
    %c0_15 = arith.constant 0 : index
    %c0_16 = arith.constant 0 : index
    %34 = vector.load %arg6[%c0_15, %c0_16] : memref<128x128xbf16, #tpu.memory_space<vmem>>, vector<128x128xbf16>
    %c0_17 = arith.constant 0 : index
    %c0_18 = arith.constant 0 : index
    %35 = vector.load %arg7[%c0_17, %c0_18] : memref<1x128xbf16, #tpu.memory_space<vmem>>, vector<1x128xbf16>
    %36 = arith.extf %35 : vector<1x128xbf16> to vector<1x128xf32>
    %37 = vector.extract_strided_slice %33 {offsets = [0, 0], sizes = [16, 64], strides = [1, 1]} : vector<16x384xf32> to vector<16x64xf32>
    %cst_19 = arith.constant 1.250000e-01 : f32
    %38 = vector.broadcast %cst_19 : f32 to vector<16x64xf32>
    %39 = arith.mulf %37, %38 : vector<16x64xf32>
    %40 = arith.truncf %39 : vector<16x64xf32> to vector<16x64xbf16>
    %41 = vector.extract_strided_slice %33 {offsets = [0, 128], sizes = [16, 64], strides = [1, 1]} : vector<16x384xf32> to vector<16x64xf32>
    %42 = arith.truncf %41 : vector<16x64xf32> to vector<16x64xbf16>
    %43 = vector.extract_strided_slice %33 {offsets = [0, 256], sizes = [16, 64], strides = [1, 1]} : vector<16x384xf32> to vector<16x64xf32>
    %44 = arith.truncf %43 : vector<16x64xf32> to vector<16x64xbf16>
    %45 = tpu.transpose %42, [1, 0] : vector<16x64xbf16> -> vector<64x16xbf16>
    %cst_20 = arith.constant dense<0.000000e+00> : vector<16x16xf32>
    %46 = tpu.matmul %40, %45, %cst_20 {dimension_numbers = #tpu.dot_dimension_numbers<[1], [0], [0], [1], [0, 0, 1, 1], [], []>} : vector<16x64xbf16>, vector<64x16xbf16>, vector<16x16xf32> -> vector<16x16xf32>
    %c0_21 = arith.constant 0 : index
    %c0_22 = arith.constant 0 : index
    %47 = vector.load %arg14[%c0_21, %c0_22] : memref<16x16xf32, #tpu.memory_space<vmem>>, vector<16x16xf32>
    %48 = arith.addf %46, %47 : vector<16x16xf32>
    %cst_23 = arith.constant dense<0xFF800000> : vector<16xf32>
    %49 = vector.multi_reduction <maximumf>, %48, %cst_23 [1] : vector<16x16xf32> to vector<16xf32>
    %50 = vector.shape_cast %49 : vector<16xf32> to vector<16x1xf32>
    %51 = vector.broadcast %50 : vector<16x1xf32> to vector<16x16xf32>
    %52 = arith.subf %48, %51 : vector<16x16xf32>
    %53 = math.exp %52 : vector<16x16xf32>
    %cst_24 = arith.constant dense<0.000000e+00> : vector<16xf32>
    %54 = vector.multi_reduction <add>, %53, %cst_24 [1] : vector<16x16xf32> to vector<16xf32>
    %55 = vector.shape_cast %54 : vector<16xf32> to vector<16x1xf32>
    %56 = tpu.reciprocal %55 {approx = true} : vector<16x1xf32> -> vector<16x1xf32>
    %57 = vector.broadcast %56 : vector<16x1xf32> to vector<16x16xf32>
    %58 = arith.mulf %53, %57 : vector<16x16xf32>
    %59 = arith.truncf %58 : vector<16x16xf32> to vector<16x16xbf16>
    %cst_25 = arith.constant dense<0.000000e+00> : vector<16x64xf32>
    %60 = tpu.matmul %59, %44, %cst_25 {dimension_numbers = #tpu.dot_dimension_numbers<[1], [0], [0], [1], [0, 0, 1, 1], [], []>} : vector<16x16xbf16>, vector<16x64xbf16>, vector<16x64xf32> -> vector<16x64xf32>
    %61 = arith.truncf %60 : vector<16x64xf32> to vector<16x64xbf16>
    %62 = vector.extract_strided_slice %34 {offsets = [0, 0], sizes = [64, 128], strides = [1, 1]} : vector<128x128xbf16> to vector<64x128xbf16>
    %cst_26 = arith.constant dense<0.000000e+00> : vector<16x128xf32>
    %63 = tpu.matmul %61, %62, %cst_26 {dimension_numbers = #tpu.dot_dimension_numbers<[1], [0], [0], [1], [0, 0, 1, 1], [], []>} : vector<16x64xbf16>, vector<64x128xbf16>, vector<16x128xf32> -> vector<16x128xf32>
    %64 = vector.broadcast %36 : vector<1x128xf32> to vector<16x128xf32>
    %65 = arith.addf %64, %63 : vector<16x128xf32>
    %66 = vector.extract_strided_slice %33 {offsets = [0, 64], sizes = [16, 64], strides = [1, 1]} : vector<16x384xf32> to vector<16x64xf32>
    %cst_27 = arith.constant 1.250000e-01 : f32
    %67 = vector.broadcast %cst_27 : f32 to vector<16x64xf32>
    %68 = arith.mulf %66, %67 : vector<16x64xf32>
    %69 = arith.truncf %68 : vector<16x64xf32> to vector<16x64xbf16>
    %70 = vector.extract_strided_slice %33 {offsets = [0, 192], sizes = [16, 64], strides = [1, 1]} : vector<16x384xf32> to vector<16x64xf32>
    %71 = arith.truncf %70 : vector<16x64xf32> to vector<16x64xbf16>
    %72 = vector.extract_strided_slice %33 {offsets = [0, 320], sizes = [16, 64], strides = [1, 1]} : vector<16x384xf32> to vector<16x64xf32>
    %73 = arith.truncf %72 : vector<16x64xf32> to vector<16x64xbf16>
    %74 = tpu.transpose %71, [1, 0] : vector<16x64xbf16> -> vector<64x16xbf16>
    %cst_28 = arith.constant dense<0.000000e+00> : vector<16x16xf32>
    %75 = tpu.matmul %69, %74, %cst_28 {dimension_numbers = #tpu.dot_dimension_numbers<[1], [0], [0], [1], [0, 0, 1, 1], [], []>} : vector<16x64xbf16>, vector<64x16xbf16>, vector<16x16xf32> -> vector<16x16xf32>
    %c0_29 = arith.constant 0 : index
    %c0_30 = arith.constant 0 : index
    %76 = vector.load %arg14[%c0_29, %c0_30] : memref<16x16xf32, #tpu.memory_space<vmem>>, vector<16x16xf32>
    %77 = arith.addf %75, %76 : vector<16x16xf32>
    %cst_31 = arith.constant dense<0xFF800000> : vector<16xf32>
    %78 = vector.multi_reduction <maximumf>, %77, %cst_31 [1] : vector<16x16xf32> to vector<16xf32>
    %79 = vector.shape_cast %78 : vector<16xf32> to vector<16x1xf32>
    %80 = vector.broadcast %79 : vector<16x1xf32> to vector<16x16xf32>
    %81 = arith.subf %77, %80 : vector<16x16xf32>
    %82 = math.exp %81 : vector<16x16xf32>
    %cst_32 = arith.constant dense<0.000000e+00> : vector<16xf32>
    %83 = vector.multi_reduction <add>, %82, %cst_32 [1] : vector<16x16xf32> to vector<16xf32>
    %84 = vector.shape_cast %83 : vector<16xf32> to vector<16x1xf32>
    %85 = tpu.reciprocal %84 {approx = true} : vector<16x1xf32> -> vector<16x1xf32>
    %86 = vector.broadcast %85 : vector<16x1xf32> to vector<16x16xf32>
    %87 = arith.mulf %82, %86 : vector<16x16xf32>
    %88 = arith.truncf %87 : vector<16x16xf32> to vector<16x16xbf16>
    %cst_33 = arith.constant dense<0.000000e+00> : vector<16x64xf32>
    %89 = tpu.matmul %88, %73, %cst_33 {dimension_numbers = #tpu.dot_dimension_numbers<[1], [0], [0], [1], [0, 0, 1, 1], [], []>} : vector<16x16xbf16>, vector<16x64xbf16>, vector<16x64xf32> -> vector<16x64xf32>
    %90 = arith.truncf %89 : vector<16x64xf32> to vector<16x64xbf16>
    %91 = vector.extract_strided_slice %34 {offsets = [64, 0], sizes = [64, 128], strides = [1, 1]} : vector<128x128xbf16> to vector<64x128xbf16>
    %cst_34 = arith.constant dense<0.000000e+00> : vector<16x128xf32>
    %92 = tpu.matmul %90, %91, %cst_34 {dimension_numbers = #tpu.dot_dimension_numbers<[1], [0], [0], [1], [0, 0, 1, 1], [], []>} : vector<16x64xbf16>, vector<64x128xbf16>, vector<16x128xf32> -> vector<16x128xf32>
    %93 = arith.addf %65, %92 : vector<16x128xf32>
    %94 = arith.addf %2, %93 : vector<16x128xf32>
    %cst_35 = arith.constant dense<0.000000e+00> : vector<16xf32>
    %95 = vector.multi_reduction <add>, %94, %cst_35 [1] : vector<16x128xf32> to vector<16xf32>
    %96 = vector.shape_cast %95 : vector<16xf32> to vector<16x1xf32>
    %cst_36 = arith.constant 1.280000e+02 : f32
    %97 = vector.broadcast %cst_36 : f32 to vector<16x1xf32>
    %98 = arith.divf %96, %97 : vector<16x1xf32>
    %99 = vector.broadcast %98 : vector<16x1xf32> to vector<16x128xf32>
    %100 = arith.subf %94, %99 : vector<16x128xf32>
    %101 = arith.mulf %100, %100 : vector<16x128xf32>
    %cst_37 = arith.constant dense<0.000000e+00> : vector<16xf32>
    %102 = vector.multi_reduction <add>, %101, %cst_37 [1] : vector<16x128xf32> to vector<16xf32>
    %103 = vector.shape_cast %102 : vector<16xf32> to vector<16x1xf32>
    %cst_38 = arith.constant 1.280000e+02 : f32
    %104 = vector.broadcast %cst_38 : f32 to vector<16x1xf32>
    %105 = arith.divf %103, %104 : vector<16x1xf32>
    %cst_39 = arith.constant 9.99999974E-6 : f32
    %106 = vector.broadcast %cst_39 : f32 to vector<16x1xf32>
    %107 = arith.addf %105, %106 : vector<16x1xf32>
    %108 = math.rsqrt %107 : vector<16x1xf32>
    %109 = vector.broadcast %108 : vector<16x1xf32> to vector<16x128xf32>
    %110 = arith.mulf %100, %109 : vector<16x128xf32>
    %c0_40 = arith.constant 0 : index
    %c0_41 = arith.constant 0 : index
    %111 = vector.load %arg8[%c0_40, %c0_41] : memref<1x128xbf16, #tpu.memory_space<vmem>>, vector<1x128xbf16>
    %112 = arith.extf %111 : vector<1x128xbf16> to vector<1x128xf32>
    %113 = vector.broadcast %112 : vector<1x128xf32> to vector<16x128xf32>
    %114 = arith.mulf %110, %113 : vector<16x128xf32>
    %c0_42 = arith.constant 0 : index
    %c0_43 = arith.constant 0 : index
    %115 = vector.load %arg9[%c0_42, %c0_43] : memref<1x128xbf16, #tpu.memory_space<vmem>>, vector<1x128xbf16>
    %116 = arith.extf %115 : vector<1x128xbf16> to vector<1x128xf32>
    %117 = vector.broadcast %116 : vector<1x128xf32> to vector<16x128xf32>
    %118 = arith.addf %114, %117 : vector<16x128xf32>
    %119 = arith.truncf %118 : vector<16x128xf32> to vector<16x128xbf16>
    %c0_44 = arith.constant 0 : index
    %c0_45 = arith.constant 0 : index
    %120 = vector.load %arg10[%c0_44, %c0_45] : memref<128x512xbf16, #tpu.memory_space<vmem>>, vector<128x512xbf16>
    %cst_46 = arith.constant dense<0.000000e+00> : vector<16x512xf32>
    %121 = tpu.matmul %119, %120, %cst_46 {dimension_numbers = #tpu.dot_dimension_numbers<[1], [0], [0], [1], [0, 0, 1, 1], [], []>} : vector<16x128xbf16>, vector<128x512xbf16>, vector<16x512xf32> -> vector<16x512xf32>
    %c0_47 = arith.constant 0 : index
    %c0_48 = arith.constant 0 : index
    %122 = vector.load %arg11[%c0_47, %c0_48] : memref<1x512xbf16, #tpu.memory_space<vmem>>, vector<1x512xbf16>
    %123 = arith.extf %122 : vector<1x512xbf16> to vector<1x512xf32>
    %124 = vector.broadcast %123 : vector<1x512xf32> to vector<16x512xf32>
    %125 = arith.addf %121, %124 : vector<16x512xf32>
    %cst_49 = arith.constant 1.702000e+00 : f32
    %126 = vector.broadcast %cst_49 : f32 to vector<16x512xf32>
    %127 = arith.mulf %126, %125 : vector<16x512xf32>
    %128 = arith.negf %127 : vector<16x512xf32>
    %129 = math.exp %128 : vector<16x512xf32>
    %cst_50 = arith.constant 1.000000e+00 : f32
    %130 = vector.broadcast %cst_50 : f32 to vector<16x512xf32>
    %131 = arith.addf %130, %129 : vector<16x512xf32>
    %132 = arith.divf %130, %131 : vector<16x512xf32>
    %133 = arith.mulf %125, %132 : vector<16x512xf32>
    %134 = arith.truncf %133 : vector<16x512xf32> to vector<16x512xbf16>
    %c0_51 = arith.constant 0 : index
    %c0_52 = arith.constant 0 : index
    %135 = vector.load %arg12[%c0_51, %c0_52] : memref<512x128xbf16, #tpu.memory_space<vmem>>, vector<512x128xbf16>
    %cst_53 = arith.constant dense<0.000000e+00> : vector<16x128xf32>
    %136 = tpu.matmul %134, %135, %cst_53 {dimension_numbers = #tpu.dot_dimension_numbers<[1], [0], [0], [1], [0, 0, 1, 1], [], []>} : vector<16x512xbf16>, vector<512x128xbf16>, vector<16x128xf32> -> vector<16x128xf32>
    %c0_54 = arith.constant 0 : index
    %c0_55 = arith.constant 0 : index
    %137 = vector.load %arg13[%c0_54, %c0_55] : memref<1x128xbf16, #tpu.memory_space<vmem>>, vector<1x128xbf16>
    %138 = arith.extf %137 : vector<1x128xbf16> to vector<1x128xf32>
    %139 = vector.broadcast %138 : vector<1x128xf32> to vector<16x128xf32>
    %140 = arith.addf %136, %139 : vector<16x128xf32>
    %141 = arith.addf %94, %140 : vector<16x128xf32>
    %142 = arith.truncf %141 : vector<16x128xf32> to vector<16x128xbf16>
    %c0_56 = arith.constant 0 : index
    %c0_57 = arith.constant 0 : index
    %c0_58 = arith.constant 0 : index
    %143 = vector.load %arg15[%c0_56, %c0_57, %c0_58] : memref<1x16x128xbf16, #tpu.memory_space<vmem>>, vector<1x16x128xbf16>
    %144 = vector.shape_cast %143 : vector<1x16x128xbf16> to vector<16x128xbf16>
    %145 = vector.shape_cast %142 : vector<16x128xbf16> to vector<1x16x128xbf16>
    tpu.vector_store %arg15[%c0_56, %c0_57, %c0_58], %145 {strides = array<i32>} : memref<1x16x128xbf16, #tpu.memory_space<vmem>>, vector<1x16x128xbf16>,
    return
  }
  func.func @transform_0(%arg0: i32) -> (i32, i32, i32) {
    %c0_i32 = arith.constant 0 : i32
    %c0_i32_0 = arith.constant 0 : i32
    %c0_i32_1 = arith.constant 0 : i32
    return %arg0, %c0_i32, %c0_i32_0 : i32, i32, i32
  }
  func.func @transform_1(%arg0: i32) -> (i32, i32) {
    %c0_i32 = arith.constant 0 : i32
    %c0_i32_0 = arith.constant 0 : i32
    %c0_i32_1 = arith.constant 0 : i32
    return %c0_i32, %c0_i32_0 : i32, i32
  }
  func.func @transform_2(%arg0: i32) -> (i32, i32) {
    %c0_i32 = arith.constant 0 : i32
    %c0_i32_0 = arith.constant 0 : i32
    %c0_i32_1 = arith.constant 0 : i32
    return %c0_i32, %c0_i32_0 : i32, i32
  }
  func.func @transform_3(%arg0: i32) -> (i32, i32) {
    %c0_i32 = arith.constant 0 : i32
    %c0_i32_0 = arith.constant 0 : i32
    %c0_i32_1 = arith.constant 0 : i32
    return %c0_i32, %c0_i32_0 : i32, i32
  }
  func.func @transform_4(%arg0: i32) -> (i32, i32) {
    %c0_i32 = arith.constant 0 : i32
    %c0_i32_0 = arith.constant 0 : i32
    %c0_i32_1 = arith.constant 0 : i32
    return %c0_i32, %c0_i32_0 : i32, i32
  }
  func.func @transform_5(%arg0: i32) -> (i32, i32) {
    %c0_i32 = arith.constant 0 : i32
    %c0_i32_0 = arith.constant 0 : i32
    %c0_i32_1 = arith.constant 0 : i32
    return %c0_i32, %c0_i32_0 : i32, i32
  }
  func.func @transform_6(%arg0: i32) -> (i32, i32) {
    %c0_i32 = arith.constant 0 : i32
    %c0_i32_0 = arith.constant 0 : i32
    %c0_i32_1 = arith.constant 0 : i32
    return %c0_i32, %c0_i32_0 : i32, i32
  }
  func.func @transform_7(%arg0: i32) -> (i32, i32) {
    %c0_i32 = arith.constant 0 : i32
    %c0_i32_0 = arith.constant 0 : i32
    %c0_i32_1 = arith.constant 0 : i32
    return %c0_i32, %c0_i32_0 : i32, i32
  }
  func.func @transform_8(%arg0: i32) -> (i32, i32) {
    %c0_i32 = arith.constant 0 : i32
    %c0_i32_0 = arith.constant 0 : i32
    %c0_i32_1 = arith.constant 0 : i32
    return %c0_i32, %c0_i32_0 : i32, i32
  }
  func.func @transform_9(%arg0: i32) -> (i32, i32) {
    %c0_i32 = arith.constant 0 : i32
    %c0_i32_0 = arith.constant 0 : i32
    %c0_i32_1 = arith.constant 0 : i32
    return %c0_i32, %c0_i32_0 : i32, i32
  }
  func.func @transform_10(%arg0: i32) -> (i32, i32) {
    %c0_i32 = arith.constant 0 : i32
    %c0_i32_0 = arith.constant 0 : i32
    %c0_i32_1 = arith.constant 0 : i32
    return %c0_i32, %c0_i32_0 : i32, i32
  }
  func.func @transform_11(%arg0: i32) -> (i32, i32) {
    %c0_i32 = arith.constant 0 : i32
    %c0_i32_0 = arith.constant 0 : i32
    %c0_i32_1 = arith.constant 0 : i32
    return %c0_i32, %c0_i32_0 : i32, i32
  }
  func.func @transform_12(%arg0: i32) -> (i32, i32) {
    %c0_i32 = arith.constant 0 : i32
    %c0_i32_0 = arith.constant 0 : i32
    %c0_i32_1 = arith.constant 0 : i32
    return %c0_i32, %c0_i32_0 : i32, i32
  }
  func.func @transform_13(%arg0: i32) -> (i32, i32) {
    %c0_i32 = arith.constant 0 : i32
    %c0_i32_0 = arith.constant 0 : i32
    %c0_i32_1 = arith.constant 0 : i32
    return %c0_i32, %c0_i32_0 : i32, i32
  }
  func.func @transform_14(%arg0: i32) -> (i32, i32, i32) {
    %c0_i32 = arith.constant 0 : i32
    %c0_i32_0 = arith.constant 0 : i32
    %c0_i32_1 = arith.constant 0 : i32
    return %arg0, %c0_i32, %c0_i32_0 : i32, i32, i32
  }
}

module attributes {stable_mosaic.version = 11 : i64} {
  func.func @_ln_proj_kernel(%arg0: i32, %arg1: memref<4x128xbf16, #tpu.memory_space<vmem>>, %arg2: memref<1x128xbf16, #tpu.memory_space<vmem>>, %arg3: memref<1x128xbf16, #tpu.memory_space<vmem>>, %arg4: memref<128x128xbf16, #tpu.memory_space<vmem>>, %arg5: memref<4x128xf32, #tpu.memory_space<vmem>>) attributes {dimension_semantics = [#tpu.dimension_semantics<arbitrary>], iteration_bounds = array<i64: 1>, scalar_prefetch = 0 : i64, scratch_operands = 0 : i64, tpu.core_type = #tpu.core_type<tc>, window_params = [{pipeline_mode = #tpu.pipeline_mode<synchronous>, transform_indices = @transform_0, window_bounds = array<i64: 4, 128>}, {pipeline_mode = #tpu.pipeline_mode<synchronous>, transform_indices = @transform_1, window_bounds = array<i64: 1, 128>}, {pipeline_mode = #tpu.pipeline_mode<synchronous>, transform_indices = @transform_2, window_bounds = array<i64: 1, 128>}, {pipeline_mode = #tpu.pipeline_mode<synchronous>, transform_indices = @transform_3, window_bounds = array<i64: 128, 128>}, {pipeline_mode = #tpu.pipeline_mode<synchronous>, transform_indices = @transform_4, window_bounds = array<i64: 4, 128>}]} {
    %c0 = arith.constant 0 : index
    %c0_0 = arith.constant 0 : index
    %0 = vector.load %arg1[%c0, %c0_0] : memref<4x128xbf16, #tpu.memory_space<vmem>>, vector<4x128xbf16>
    %1 = arith.extf %0 : vector<4x128xbf16> to vector<4x128xf32>
    %cst = arith.constant dense<0.000000e+00> : vector<4xf32>
    %2 = vector.multi_reduction <add>, %1, %cst [1] : vector<4x128xf32> to vector<4xf32>
    %3 = vector.shape_cast %2 : vector<4xf32> to vector<4x1xf32>
    %cst_1 = arith.constant 1.280000e+02 : f32
    %4 = vector.broadcast %cst_1 : f32 to vector<4x1xf32>
    %5 = arith.divf %3, %4 : vector<4x1xf32>
    %6 = vector.broadcast %5 : vector<4x1xf32> to vector<4x128xf32>
    %7 = arith.subf %1, %6 : vector<4x128xf32>
    %8 = arith.mulf %7, %7 : vector<4x128xf32>
    %cst_2 = arith.constant dense<0.000000e+00> : vector<4xf32>
    %9 = vector.multi_reduction <add>, %8, %cst_2 [1] : vector<4x128xf32> to vector<4xf32>
    %10 = vector.shape_cast %9 : vector<4xf32> to vector<4x1xf32>
    %cst_3 = arith.constant 1.280000e+02 : f32
    %11 = vector.broadcast %cst_3 : f32 to vector<4x1xf32>
    %12 = arith.divf %10, %11 : vector<4x1xf32>
    %cst_4 = arith.constant 9.99999974E-6 : f32
    %13 = vector.broadcast %cst_4 : f32 to vector<4x1xf32>
    %14 = arith.addf %12, %13 : vector<4x1xf32>
    %15 = math.rsqrt %14 : vector<4x1xf32>
    %16 = vector.broadcast %15 : vector<4x1xf32> to vector<4x128xf32>
    %17 = arith.mulf %7, %16 : vector<4x128xf32>
    %c0_5 = arith.constant 0 : index
    %c0_6 = arith.constant 0 : index
    %18 = vector.load %arg2[%c0_5, %c0_6] : memref<1x128xbf16, #tpu.memory_space<vmem>>, vector<1x128xbf16>
    %19 = arith.extf %18 : vector<1x128xbf16> to vector<1x128xf32>
    %20 = vector.broadcast %19 : vector<1x128xf32> to vector<4x128xf32>
    %21 = arith.mulf %17, %20 : vector<4x128xf32>
    %c0_7 = arith.constant 0 : index
    %c0_8 = arith.constant 0 : index
    %22 = vector.load %arg3[%c0_7, %c0_8] : memref<1x128xbf16, #tpu.memory_space<vmem>>, vector<1x128xbf16>
    %23 = arith.extf %22 : vector<1x128xbf16> to vector<1x128xf32>
    %24 = vector.broadcast %23 : vector<1x128xf32> to vector<4x128xf32>
    %25 = arith.addf %21, %24 : vector<4x128xf32>
    %26 = arith.truncf %25 : vector<4x128xf32> to vector<4x128xbf16>
    %c0_9 = arith.constant 0 : index
    %c0_10 = arith.constant 0 : index
    %27 = vector.load %arg4[%c0_9, %c0_10] : memref<128x128xbf16, #tpu.memory_space<vmem>>, vector<128x128xbf16>
    %cst_11 = arith.constant dense<0.000000e+00> : vector<4x128xf32>
    %28 = tpu.matmul %26, %27, %cst_11 {dimension_numbers = #tpu.dot_dimension_numbers<[1], [0], [0], [1], [0, 0, 1, 1], [], []>} : vector<4x128xbf16>, vector<128x128xbf16>, vector<4x128xf32> -> vector<4x128xf32>
    %c0_12 = arith.constant 0 : index
    %c0_13 = arith.constant 0 : index
    %29 = vector.load %arg5[%c0_12, %c0_13] : memref<4x128xf32, #tpu.memory_space<vmem>>, vector<4x128xf32>
    tpu.vector_store %arg5[%c0_12, %c0_13], %28 {strides = array<i32>} : memref<4x128xf32, #tpu.memory_space<vmem>>, vector<4x128xf32>,
    return
  }
  func.func @transform_0(%arg0: i32) -> (i32, i32) {
    %c0_i32 = arith.constant 0 : i32
    %c0_i32_0 = arith.constant 0 : i32
    %c0_i32_1 = arith.constant 0 : i32
    return %c0_i32, %c0_i32_0 : i32, i32
  }
  func.func @transform_1(%arg0: i32) -> (i32, i32) {
    %c0_i32 = arith.constant 0 : i32
    %c0_i32_0 = arith.constant 0 : i32
    %c0_i32_1 = arith.constant 0 : i32
    return %c0_i32, %c0_i32_0 : i32, i32
  }
  func.func @transform_2(%arg0: i32) -> (i32, i32) {
    %c0_i32 = arith.constant 0 : i32
    %c0_i32_0 = arith.constant 0 : i32
    %c0_i32_1 = arith.constant 0 : i32
    return %c0_i32, %c0_i32_0 : i32, i32
  }
  func.func @transform_3(%arg0: i32) -> (i32, i32) {
    %c0_i32 = arith.constant 0 : i32
    %c0_i32_0 = arith.constant 0 : i32
    %c0_i32_1 = arith.constant 0 : i32
    return %c0_i32, %c0_i32_0 : i32, i32
  }
  func.func @transform_4(%arg0: i32) -> (i32, i32) {
    %c0_i32 = arith.constant 0 : i32
    %c0_i32_0 = arith.constant 0 : i32
    %c0_i32_1 = arith.constant 0 : i32
    return %c0_i32, %c0_i32_0 : i32, i32
  }
}

module attributes {stable_mosaic.version = 11 : i64} {
  func.func @_matmul_kernel(%arg0: i32, %arg1: i32, %arg2: i32, %arg3: memref<32x192xbf16, #tpu.memory_space<vmem>>, %arg4: memref<192x128xbf16, #tpu.memory_space<vmem>>, %arg5: memref<1x128xbf16, #tpu.memory_space<vmem>>, %arg6: memref<32x128xbf16, #tpu.memory_space<vmem>>, %arg7: memref<32x128xf32, #tpu.memory_space<vmem>>) attributes {dimension_semantics = [#tpu.dimension_semantics<parallel>, #tpu.dimension_semantics<parallel>, #tpu.dimension_semantics<arbitrary>], iteration_bounds = array<i64: 1, 1, 1>, scalar_prefetch = 0 : i64, scratch_operands = 1 : i64, tpu.core_type = #tpu.core_type<tc>, window_params = [{transform_indices = @transform_0, window_bounds = array<i64: 32, 192>}, {transform_indices = @transform_1, window_bounds = array<i64: 192, 128>}, {transform_indices = @transform_2, window_bounds = array<i64: 1, 128>}, {transform_indices = @transform_3, window_bounds = array<i64: 32, 128>}]} {
    %c0_i32 = arith.constant 0 : i32
    %0 = arith.cmpi eq, %arg2, %c0_i32 : i32
    %1 = arith.extui %0 : i1 to i32
    %c0_i32_0 = arith.constant 0 : i32
    %2 = arith.cmpi ne, %1, %c0_i32_0 : i32
    scf.if %2 {
      %cst_10 = arith.constant 0.000000e+00 : f32
      %12 = vector.broadcast %cst_10 : f32 to vector<32x128xf32>
      %c0_11 = arith.constant 0 : index
      %c0_12 = arith.constant 0 : index
      %13 = vector.load %arg7[%c0_11, %c0_12] : memref<32x128xf32, #tpu.memory_space<vmem>>, vector<32x128xf32>
      tpu.vector_store %arg7[%c0_11, %c0_12], %12 {strides = array<i32>} : memref<32x128xf32, #tpu.memory_space<vmem>>, vector<32x128xf32>,
    } else {
    }
    %c0 = arith.constant 0 : index
    %c0_1 = arith.constant 0 : index
    %3 = vector.load %arg7[%c0, %c0_1] : memref<32x128xf32, #tpu.memory_space<vmem>>, vector<32x128xf32>
    %c0_2 = arith.constant 0 : index
    %c0_3 = arith.constant 0 : index
    %4 = vector.load %arg3[%c0_2, %c0_3] : memref<32x192xbf16, #tpu.memory_space<vmem>>, vector<32x192xbf16>
    %c0_4 = arith.constant 0 : index
    %c0_5 = arith.constant 0 : index
    %5 = vector.load %arg4[%c0_4, %c0_5] : memref<192x128xbf16, #tpu.memory_space<vmem>>, vector<192x128xbf16>
    %cst = arith.constant dense<0.000000e+00> : vector<32x128xf32>
    %6 = tpu.matmul %4, %5, %cst {dimension_numbers = #tpu.dot_dimension_numbers<[1], [0], [0], [1], [0, 0, 1, 1], [], []>} : vector<32x192xbf16>, vector<192x128xbf16>, vector<32x128xf32> -> vector<32x128xf32>
    %7 = arith.addf %3, %6 : vector<32x128xf32>
    %c0_6 = arith.constant 0 : index
    %c0_7 = arith.constant 0 : index
    %8 = vector.load %arg7[%c0_6, %c0_7] : memref<32x128xf32, #tpu.memory_space<vmem>>, vector<32x128xf32>
    tpu.vector_store %arg7[%c0_6, %c0_7], %7 {strides = array<i32>} : memref<32x128xf32, #tpu.memory_space<vmem>>, vector<32x128xf32>,
    %c0_i32_8 = arith.constant 0 : i32
    %9 = arith.cmpi eq, %arg2, %c0_i32_8 : i32
    %10 = arith.extui %9 : i1 to i32
    %c0_i32_9 = arith.constant 0 : i32
    %11 = arith.cmpi ne, %10, %c0_i32_9 : i32
    scf.if %11 {
      %c0_10 = arith.constant 0 : index
      %c0_11 = arith.constant 0 : index
      %12 = vector.load %arg7[%c0_10, %c0_11] : memref<32x128xf32, #tpu.memory_space<vmem>>, vector<32x128xf32>
      %c0_12 = arith.constant 0 : index
      %c0_13 = arith.constant 0 : index
      %13 = vector.load %arg5[%c0_12, %c0_13] : memref<1x128xbf16, #tpu.memory_space<vmem>>, vector<1x128xbf16>
      %14 = arith.extf %13 : vector<1x128xbf16> to vector<1x128xf32>
      %15 = vector.broadcast %14 : vector<1x128xf32> to vector<32x128xf32>
      %16 = arith.addf %12, %15 : vector<32x128xf32>
      %17 = arith.truncf %16 : vector<32x128xf32> to vector<32x128xbf16>
      %c0_14 = arith.constant 0 : index
      %c0_15 = arith.constant 0 : index
      %18 = vector.load %arg6[%c0_14, %c0_15] : memref<32x128xbf16, #tpu.memory_space<vmem>>, vector<32x128xbf16>
      tpu.vector_store %arg6[%c0_14, %c0_15], %17 {strides = array<i32>} : memref<32x128xbf16, #tpu.memory_space<vmem>>, vector<32x128xbf16>,
    } else {
    }
    return
  }
  func.func @transform_0(%arg0: i32, %arg1: i32, %arg2: i32) -> (i32, i32) {
    %c0_i32 = arith.constant 0 : i32
    return %arg0, %arg2 : i32, i32
  }
  func.func @transform_1(%arg0: i32, %arg1: i32, %arg2: i32) -> (i32, i32) {
    %c0_i32 = arith.constant 0 : i32
    return %arg2, %arg1 : i32, i32
  }
  func.func @transform_2(%arg0: i32, %arg1: i32, %arg2: i32) -> (i32, i32) {
    %c0_i32 = arith.constant 0 : i32
    %c0_i32_0 = arith.constant 0 : i32
    return %c0_i32, %arg1 : i32, i32
  }
  func.func @transform_3(%arg0: i32, %arg1: i32, %arg2: i32) -> (i32, i32) {
    %c0_i32 = arith.constant 0 : i32
    return %arg0, %arg1 : i32, i32
  }
}

module attributes {stable_mosaic.version = 11 : i64} {
  func.func @_matmul_kernel(%arg0: i32, %arg1: i32, %arg2: i32, %arg3: memref<2x128xbf16, #tpu.memory_space<vmem>>, %arg4: memref<128x128xbf16, #tpu.memory_space<vmem>>, %arg5: memref<1x128xbf16, #tpu.memory_space<vmem>>, %arg6: memref<2x128xbf16, #tpu.memory_space<vmem>>, %arg7: memref<2x128xf32, #tpu.memory_space<vmem>>) attributes {dimension_semantics = [#tpu.dimension_semantics<parallel>, #tpu.dimension_semantics<parallel>, #tpu.dimension_semantics<arbitrary>], iteration_bounds = array<i64: 1, 1, 1>, scalar_prefetch = 0 : i64, scratch_operands = 1 : i64, tpu.core_type = #tpu.core_type<tc>, window_params = [{transform_indices = @transform_0, window_bounds = array<i64: 2, 128>}, {transform_indices = @transform_1, window_bounds = array<i64: 128, 128>}, {transform_indices = @transform_2, window_bounds = array<i64: 1, 128>}, {transform_indices = @transform_3, window_bounds = array<i64: 2, 128>}]} {
    %c0_i32 = arith.constant 0 : i32
    %0 = arith.cmpi eq, %arg2, %c0_i32 : i32
    %1 = arith.extui %0 : i1 to i32
    %c0_i32_0 = arith.constant 0 : i32
    %2 = arith.cmpi ne, %1, %c0_i32_0 : i32
    scf.if %2 {
      %cst_10 = arith.constant 0.000000e+00 : f32
      %12 = vector.broadcast %cst_10 : f32 to vector<2x128xf32>
      %c0_11 = arith.constant 0 : index
      %c0_12 = arith.constant 0 : index
      %13 = vector.load %arg7[%c0_11, %c0_12] : memref<2x128xf32, #tpu.memory_space<vmem>>, vector<2x128xf32>
      tpu.vector_store %arg7[%c0_11, %c0_12], %12 {strides = array<i32>} : memref<2x128xf32, #tpu.memory_space<vmem>>, vector<2x128xf32>,
    } else {
    }
    %c0 = arith.constant 0 : index
    %c0_1 = arith.constant 0 : index
    %3 = vector.load %arg7[%c0, %c0_1] : memref<2x128xf32, #tpu.memory_space<vmem>>, vector<2x128xf32>
    %c0_2 = arith.constant 0 : index
    %c0_3 = arith.constant 0 : index
    %4 = vector.load %arg3[%c0_2, %c0_3] : memref<2x128xbf16, #tpu.memory_space<vmem>>, vector<2x128xbf16>
    %c0_4 = arith.constant 0 : index
    %c0_5 = arith.constant 0 : index
    %5 = vector.load %arg4[%c0_4, %c0_5] : memref<128x128xbf16, #tpu.memory_space<vmem>>, vector<128x128xbf16>
    %cst = arith.constant dense<0.000000e+00> : vector<2x128xf32>
    %6 = tpu.matmul %4, %5, %cst {dimension_numbers = #tpu.dot_dimension_numbers<[1], [0], [0], [1], [0, 0, 1, 1], [], []>} : vector<2x128xbf16>, vector<128x128xbf16>, vector<2x128xf32> -> vector<2x128xf32>
    %7 = arith.addf %3, %6 : vector<2x128xf32>
    %c0_6 = arith.constant 0 : index
    %c0_7 = arith.constant 0 : index
    %8 = vector.load %arg7[%c0_6, %c0_7] : memref<2x128xf32, #tpu.memory_space<vmem>>, vector<2x128xf32>
    tpu.vector_store %arg7[%c0_6, %c0_7], %7 {strides = array<i32>} : memref<2x128xf32, #tpu.memory_space<vmem>>, vector<2x128xf32>,
    %c0_i32_8 = arith.constant 0 : i32
    %9 = arith.cmpi eq, %arg2, %c0_i32_8 : i32
    %10 = arith.extui %9 : i1 to i32
    %c0_i32_9 = arith.constant 0 : i32
    %11 = arith.cmpi ne, %10, %c0_i32_9 : i32
    scf.if %11 {
      %c0_10 = arith.constant 0 : index
      %c0_11 = arith.constant 0 : index
      %12 = vector.load %arg7[%c0_10, %c0_11] : memref<2x128xf32, #tpu.memory_space<vmem>>, vector<2x128xf32>
      %c0_12 = arith.constant 0 : index
      %c0_13 = arith.constant 0 : index
      %13 = vector.load %arg5[%c0_12, %c0_13] : memref<1x128xbf16, #tpu.memory_space<vmem>>, vector<1x128xbf16>
      %14 = arith.extf %13 : vector<1x128xbf16> to vector<1x128xf32>
      %15 = vector.broadcast %14 : vector<1x128xf32> to vector<2x128xf32>
      %16 = arith.addf %12, %15 : vector<2x128xf32>
      %17 = arith.truncf %16 : vector<2x128xf32> to vector<2x128xbf16>
      %c0_14 = arith.constant 0 : index
      %c0_15 = arith.constant 0 : index
      %18 = vector.load %arg6[%c0_14, %c0_15] : memref<2x128xbf16, #tpu.memory_space<vmem>>, vector<2x128xbf16>
      tpu.vector_store %arg6[%c0_14, %c0_15], %17 {strides = array<i32>} : memref<2x128xbf16, #tpu.memory_space<vmem>>, vector<2x128xbf16>,
    } else {
    }
    return
  }
  func.func @transform_0(%arg0: i32, %arg1: i32, %arg2: i32) -> (i32, i32) {
    %c0_i32 = arith.constant 0 : i32
    return %arg0, %arg2 : i32, i32
  }
  func.func @transform_1(%arg0: i32, %arg1: i32, %arg2: i32) -> (i32, i32) {
    %c0_i32 = arith.constant 0 : i32
    return %arg2, %arg1 : i32, i32
  }
  func.func @transform_2(%arg0: i32, %arg1: i32, %arg2: i32) -> (i32, i32) {
    %c0_i32 = arith.constant 0 : i32
    %c0_i32_0 = arith.constant 0 : i32
    return %c0_i32, %arg1 : i32, i32
  }
  func.func @transform_3(%arg0: i32, %arg1: i32, %arg2: i32) -> (i32, i32) {
    %c0_i32 = arith.constant 0 : i32
    return %arg0, %arg1 : i32, i32
  }
}

module attributes {stable_mosaic.version = 11 : i64} {
  func.func @_ln_kernel(%arg0: i32, %arg1: memref<38x128xbf16, #tpu.memory_space<vmem>>, %arg2: memref<1x128xbf16, #tpu.memory_space<vmem>>, %arg3: memref<1x128xbf16, #tpu.memory_space<vmem>>, %arg4: memref<38x128xbf16, #tpu.memory_space<vmem>>) attributes {dimension_semantics = [#tpu.dimension_semantics<arbitrary>], iteration_bounds = array<i64: 1>, scalar_prefetch = 0 : i64, scratch_operands = 0 : i64, tpu.core_type = #tpu.core_type<tc>, window_params = [{pipeline_mode = #tpu.pipeline_mode<synchronous>, transform_indices = @transform_0, window_bounds = array<i64: 38, 128>}, {pipeline_mode = #tpu.pipeline_mode<synchronous>, transform_indices = @transform_1, window_bounds = array<i64: 1, 128>}, {pipeline_mode = #tpu.pipeline_mode<synchronous>, transform_indices = @transform_2, window_bounds = array<i64: 1, 128>}, {pipeline_mode = #tpu.pipeline_mode<synchronous>, transform_indices = @transform_3, window_bounds = array<i64: 38, 128>}]} {
    %c0 = arith.constant 0 : index
    %c0_0 = arith.constant 0 : index
    %0 = vector.load %arg1[%c0, %c0_0] : memref<38x128xbf16, #tpu.memory_space<vmem>>, vector<38x128xbf16>
    %1 = arith.extf %0 : vector<38x128xbf16> to vector<38x128xf32>
    %cst = arith.constant dense<0.000000e+00> : vector<38xf32>
    %2 = vector.multi_reduction <add>, %1, %cst [1] : vector<38x128xf32> to vector<38xf32>
    %3 = vector.shape_cast %2 : vector<38xf32> to vector<38x1xf32>
    %cst_1 = arith.constant 1.280000e+02 : f32
    %4 = vector.broadcast %cst_1 : f32 to vector<38x1xf32>
    %5 = arith.divf %3, %4 : vector<38x1xf32>
    %6 = vector.broadcast %5 : vector<38x1xf32> to vector<38x128xf32>
    %7 = arith.subf %1, %6 : vector<38x128xf32>
    %8 = arith.mulf %7, %7 : vector<38x128xf32>
    %cst_2 = arith.constant dense<0.000000e+00> : vector<38xf32>
    %9 = vector.multi_reduction <add>, %8, %cst_2 [1] : vector<38x128xf32> to vector<38xf32>
    %10 = vector.shape_cast %9 : vector<38xf32> to vector<38x1xf32>
    %cst_3 = arith.constant 1.280000e+02 : f32
    %11 = vector.broadcast %cst_3 : f32 to vector<38x1xf32>
    %12 = arith.divf %10, %11 : vector<38x1xf32>
    %cst_4 = arith.constant 9.99999974E-6 : f32
    %13 = vector.broadcast %cst_4 : f32 to vector<38x1xf32>
    %14 = arith.addf %12, %13 : vector<38x1xf32>
    %15 = math.rsqrt %14 : vector<38x1xf32>
    %16 = vector.broadcast %15 : vector<38x1xf32> to vector<38x128xf32>
    %17 = arith.mulf %7, %16 : vector<38x128xf32>
    %c0_5 = arith.constant 0 : index
    %c0_6 = arith.constant 0 : index
    %18 = vector.load %arg2[%c0_5, %c0_6] : memref<1x128xbf16, #tpu.memory_space<vmem>>, vector<1x128xbf16>
    %19 = arith.extf %18 : vector<1x128xbf16> to vector<1x128xf32>
    %20 = vector.broadcast %19 : vector<1x128xf32> to vector<38x128xf32>
    %21 = arith.mulf %17, %20 : vector<38x128xf32>
    %c0_7 = arith.constant 0 : index
    %c0_8 = arith.constant 0 : index
    %22 = vector.load %arg3[%c0_7, %c0_8] : memref<1x128xbf16, #tpu.memory_space<vmem>>, vector<1x128xbf16>
    %23 = arith.extf %22 : vector<1x128xbf16> to vector<1x128xf32>
    %24 = vector.broadcast %23 : vector<1x128xf32> to vector<38x128xf32>
    %25 = arith.addf %21, %24 : vector<38x128xf32>
    %26 = arith.truncf %25 : vector<38x128xf32> to vector<38x128xbf16>
    %c0_9 = arith.constant 0 : index
    %c0_10 = arith.constant 0 : index
    %27 = vector.load %arg4[%c0_9, %c0_10] : memref<38x128xbf16, #tpu.memory_space<vmem>>, vector<38x128xbf16>
    tpu.vector_store %arg4[%c0_9, %c0_10], %26 {strides = array<i32>} : memref<38x128xbf16, #tpu.memory_space<vmem>>, vector<38x128xbf16>,
    return
  }
  func.func @transform_0(%arg0: i32) -> (i32, i32) {
    %c0_i32 = arith.constant 0 : i32
    %c0_i32_0 = arith.constant 0 : i32
    %c0_i32_1 = arith.constant 0 : i32
    return %c0_i32, %c0_i32_0 : i32, i32
  }
  func.func @transform_1(%arg0: i32) -> (i32, i32) {
    %c0_i32 = arith.constant 0 : i32
    %c0_i32_0 = arith.constant 0 : i32
    %c0_i32_1 = arith.constant 0 : i32
    return %c0_i32, %c0_i32_0 : i32, i32
  }
  func.func @transform_2(%arg0: i32) -> (i32, i32) {
    %c0_i32 = arith.constant 0 : i32
    %c0_i32_0 = arith.constant 0 : i32
    %c0_i32_1 = arith.constant 0 : i32
    return %c0_i32, %c0_i32_0 : i32, i32
  }
  func.func @transform_3(%arg0: i32) -> (i32, i32) {
    %c0_i32 = arith.constant 0 : i32
    %c0_i32_0 = arith.constant 0 : i32
    %c0_i32_1 = arith.constant 0 : i32
    return %c0_i32, %c0_i32_0 : i32, i32
  }
}

module attributes {stable_mosaic.version = 11 : i64} {
  func.func @_block_kernel(%arg0: i32, %arg1: memref<1x19x128xbf16, #tpu.memory_space<vmem>>, %arg2: memref<1x128xbf16, #tpu.memory_space<vmem>>, %arg3: memref<1x128xbf16, #tpu.memory_space<vmem>>, %arg4: memref<128x384xbf16, #tpu.memory_space<vmem>>, %arg5: memref<1x384xbf16, #tpu.memory_space<vmem>>, %arg6: memref<128x128xbf16, #tpu.memory_space<vmem>>, %arg7: memref<1x128xbf16, #tpu.memory_space<vmem>>, %arg8: memref<1x128xbf16, #tpu.memory_space<vmem>>, %arg9: memref<1x128xbf16, #tpu.memory_space<vmem>>, %arg10: memref<128x512xbf16, #tpu.memory_space<vmem>>, %arg11: memref<1x512xbf16, #tpu.memory_space<vmem>>, %arg12: memref<512x128xbf16, #tpu.memory_space<vmem>>, %arg13: memref<1x128xbf16, #tpu.memory_space<vmem>>, %arg14: memref<1x19x128xbf16, #tpu.memory_space<vmem>>) attributes {dimension_semantics = [#tpu.dimension_semantics<parallel>], iteration_bounds = array<i64: 2>, scalar_prefetch = 0 : i64, scratch_operands = 0 : i64, tpu.core_type = #tpu.core_type<tc>, window_params = [{transform_indices = @transform_0, window_bounds = array<i64: 1, 19, 128>}, {pipeline_mode = #tpu.pipeline_mode<synchronous>, transform_indices = @transform_1, window_bounds = array<i64: 1, 128>}, {pipeline_mode = #tpu.pipeline_mode<synchronous>, transform_indices = @transform_2, window_bounds = array<i64: 1, 128>}, {pipeline_mode = #tpu.pipeline_mode<synchronous>, transform_indices = @transform_3, window_bounds = array<i64: 128, 384>}, {pipeline_mode = #tpu.pipeline_mode<synchronous>, transform_indices = @transform_4, window_bounds = array<i64: 1, 384>}, {pipeline_mode = #tpu.pipeline_mode<synchronous>, transform_indices = @transform_5, window_bounds = array<i64: 128, 128>}, {pipeline_mode = #tpu.pipeline_mode<synchronous>, transform_indices = @transform_6, window_bounds = array<i64: 1, 128>}, {pipeline_mode = #tpu.pipeline_mode<synchronous>, transform_indices = @transform_7, window_bounds = array<i64: 1, 128>}, {pipeline_mode = #tpu.pipeline_mode<synchronous>, transform_indices = @transform_8, window_bounds = array<i64: 1, 128>}, {pipeline_mode = #tpu.pipeline_mode<synchronous>, transform_indices = @transform_9, window_bounds = array<i64: 128, 512>}, {pipeline_mode = #tpu.pipeline_mode<synchronous>, transform_indices = @transform_10, window_bounds = array<i64: 1, 512>}, {pipeline_mode = #tpu.pipeline_mode<synchronous>, transform_indices = @transform_11, window_bounds = array<i64: 512, 128>}, {pipeline_mode = #tpu.pipeline_mode<synchronous>, transform_indices = @transform_12, window_bounds = array<i64: 1, 128>}, {transform_indices = @transform_13, window_bounds = array<i64: 1, 19, 128>}]} {
    %c0 = arith.constant 0 : index
    %c0_0 = arith.constant 0 : index
    %c0_1 = arith.constant 0 : index
    %0 = vector.load %arg1[%c0, %c0_0, %c0_1] : memref<1x19x128xbf16, #tpu.memory_space<vmem>>, vector<1x19x128xbf16>
    %1 = vector.shape_cast %0 : vector<1x19x128xbf16> to vector<19x128xbf16>
    %2 = arith.extf %1 : vector<19x128xbf16> to vector<19x128xf32>
    %cst = arith.constant dense<0.000000e+00> : vector<19xf32>
    %3 = vector.multi_reduction <add>, %2, %cst [1] : vector<19x128xf32> to vector<19xf32>
    %4 = vector.shape_cast %3 : vector<19xf32> to vector<19x1xf32>
    %cst_2 = arith.constant 1.280000e+02 : f32
    %5 = vector.broadcast %cst_2 : f32 to vector<19x1xf32>
    %6 = arith.divf %4, %5 : vector<19x1xf32>
    %7 = vector.broadcast %6 : vector<19x1xf32> to vector<19x128xf32>
    %8 = arith.subf %2, %7 : vector<19x128xf32>
    %9 = arith.mulf %8, %8 : vector<19x128xf32>
    %cst_3 = arith.constant dense<0.000000e+00> : vector<19xf32>
    %10 = vector.multi_reduction <add>, %9, %cst_3 [1] : vector<19x128xf32> to vector<19xf32>
    %11 = vector.shape_cast %10 : vector<19xf32> to vector<19x1xf32>
    %cst_4 = arith.constant 1.280000e+02 : f32
    %12 = vector.broadcast %cst_4 : f32 to vector<19x1xf32>
    %13 = arith.divf %11, %12 : vector<19x1xf32>
    %cst_5 = arith.constant 9.99999974E-6 : f32
    %14 = vector.broadcast %cst_5 : f32 to vector<19x1xf32>
    %15 = arith.addf %13, %14 : vector<19x1xf32>
    %16 = math.rsqrt %15 : vector<19x1xf32>
    %17 = vector.broadcast %16 : vector<19x1xf32> to vector<19x128xf32>
    %18 = arith.mulf %8, %17 : vector<19x128xf32>
    %c0_6 = arith.constant 0 : index
    %c0_7 = arith.constant 0 : index
    %19 = vector.load %arg2[%c0_6, %c0_7] : memref<1x128xbf16, #tpu.memory_space<vmem>>, vector<1x128xbf16>
    %20 = arith.extf %19 : vector<1x128xbf16> to vector<1x128xf32>
    %21 = vector.broadcast %20 : vector<1x128xf32> to vector<19x128xf32>
    %22 = arith.mulf %18, %21 : vector<19x128xf32>
    %c0_8 = arith.constant 0 : index
    %c0_9 = arith.constant 0 : index
    %23 = vector.load %arg3[%c0_8, %c0_9] : memref<1x128xbf16, #tpu.memory_space<vmem>>, vector<1x128xbf16>
    %24 = arith.extf %23 : vector<1x128xbf16> to vector<1x128xf32>
    %25 = vector.broadcast %24 : vector<1x128xf32> to vector<19x128xf32>
    %26 = arith.addf %22, %25 : vector<19x128xf32>
    %27 = arith.truncf %26 : vector<19x128xf32> to vector<19x128xbf16>
    %c0_10 = arith.constant 0 : index
    %c0_11 = arith.constant 0 : index
    %28 = vector.load %arg4[%c0_10, %c0_11] : memref<128x384xbf16, #tpu.memory_space<vmem>>, vector<128x384xbf16>
    %cst_12 = arith.constant dense<0.000000e+00> : vector<19x384xf32>
    %29 = tpu.matmul %27, %28, %cst_12 {dimension_numbers = #tpu.dot_dimension_numbers<[1], [0], [0], [1], [0, 0, 1, 1], [], []>} : vector<19x128xbf16>, vector<128x384xbf16>, vector<19x384xf32> -> vector<19x384xf32>
    %c0_13 = arith.constant 0 : index
    %c0_14 = arith.constant 0 : index
    %30 = vector.load %arg5[%c0_13, %c0_14] : memref<1x384xbf16, #tpu.memory_space<vmem>>, vector<1x384xbf16>
    %31 = arith.extf %30 : vector<1x384xbf16> to vector<1x384xf32>
    %32 = vector.broadcast %31 : vector<1x384xf32> to vector<19x384xf32>
    %33 = arith.addf %29, %32 : vector<19x384xf32>
    %c0_15 = arith.constant 0 : index
    %c0_16 = arith.constant 0 : index
    %34 = vector.load %arg6[%c0_15, %c0_16] : memref<128x128xbf16, #tpu.memory_space<vmem>>, vector<128x128xbf16>
    %c0_17 = arith.constant 0 : index
    %c0_18 = arith.constant 0 : index
    %35 = vector.load %arg7[%c0_17, %c0_18] : memref<1x128xbf16, #tpu.memory_space<vmem>>, vector<1x128xbf16>
    %36 = arith.extf %35 : vector<1x128xbf16> to vector<1x128xf32>
    %37 = vector.extract_strided_slice %33 {offsets = [0, 0], sizes = [19, 64], strides = [1, 1]} : vector<19x384xf32> to vector<19x64xf32>
    %cst_19 = arith.constant 1.250000e-01 : f32
    %38 = vector.broadcast %cst_19 : f32 to vector<19x64xf32>
    %39 = arith.mulf %37, %38 : vector<19x64xf32>
    %40 = arith.truncf %39 : vector<19x64xf32> to vector<19x64xbf16>
    %41 = vector.extract_strided_slice %33 {offsets = [0, 128], sizes = [19, 64], strides = [1, 1]} : vector<19x384xf32> to vector<19x64xf32>
    %42 = arith.truncf %41 : vector<19x64xf32> to vector<19x64xbf16>
    %43 = vector.extract_strided_slice %33 {offsets = [0, 256], sizes = [19, 64], strides = [1, 1]} : vector<19x384xf32> to vector<19x64xf32>
    %44 = arith.truncf %43 : vector<19x64xf32> to vector<19x64xbf16>
    %45 = tpu.transpose %42, [1, 0] : vector<19x64xbf16> -> vector<64x19xbf16>
    %cst_20 = arith.constant dense<0.000000e+00> : vector<19x19xf32>
    %46 = tpu.matmul %40, %45, %cst_20 {dimension_numbers = #tpu.dot_dimension_numbers<[1], [0], [0], [1], [0, 0, 1, 1], [], []>} : vector<19x64xbf16>, vector<64x19xbf16>, vector<19x19xf32> -> vector<19x19xf32>
    %cst_21 = arith.constant dense<0xFF800000> : vector<19xf32>
    %47 = vector.multi_reduction <maximumf>, %46, %cst_21 [1] : vector<19x19xf32> to vector<19xf32>
    %48 = vector.shape_cast %47 : vector<19xf32> to vector<19x1xf32>
    %49 = vector.broadcast %48 : vector<19x1xf32> to vector<19x19xf32>
    %50 = arith.subf %46, %49 : vector<19x19xf32>
    %51 = math.exp %50 : vector<19x19xf32>
    %cst_22 = arith.constant dense<0.000000e+00> : vector<19xf32>
    %52 = vector.multi_reduction <add>, %51, %cst_22 [1] : vector<19x19xf32> to vector<19xf32>
    %53 = vector.shape_cast %52 : vector<19xf32> to vector<19x1xf32>
    %54 = tpu.reciprocal %53 {approx = true} : vector<19x1xf32> -> vector<19x1xf32>
    %55 = vector.broadcast %54 : vector<19x1xf32> to vector<19x19xf32>
    %56 = arith.mulf %51, %55 : vector<19x19xf32>
    %57 = arith.truncf %56 : vector<19x19xf32> to vector<19x19xbf16>
    %cst_23 = arith.constant dense<0.000000e+00> : vector<19x64xf32>
    %58 = tpu.matmul %57, %44, %cst_23 {dimension_numbers = #tpu.dot_dimension_numbers<[1], [0], [0], [1], [0, 0, 1, 1], [], []>} : vector<19x19xbf16>, vector<19x64xbf16>, vector<19x64xf32> -> vector<19x64xf32>
    %59 = arith.truncf %58 : vector<19x64xf32> to vector<19x64xbf16>
    %60 = vector.extract_strided_slice %34 {offsets = [0, 0], sizes = [64, 128], strides = [1, 1]} : vector<128x128xbf16> to vector<64x128xbf16>
    %cst_24 = arith.constant dense<0.000000e+00> : vector<19x128xf32>
    %61 = tpu.matmul %59, %60, %cst_24 {dimension_numbers = #tpu.dot_dimension_numbers<[1], [0], [0], [1], [0, 0, 1, 1], [], []>} : vector<19x64xbf16>, vector<64x128xbf16>, vector<19x128xf32> -> vector<19x128xf32>
    %62 = vector.broadcast %36 : vector<1x128xf32> to vector<19x128xf32>
    %63 = arith.addf %62, %61 : vector<19x128xf32>
    %64 = vector.extract_strided_slice %33 {offsets = [0, 64], sizes = [19, 64], strides = [1, 1]} : vector<19x384xf32> to vector<19x64xf32>
    %cst_25 = arith.constant 1.250000e-01 : f32
    %65 = vector.broadcast %cst_25 : f32 to vector<19x64xf32>
    %66 = arith.mulf %64, %65 : vector<19x64xf32>
    %67 = arith.truncf %66 : vector<19x64xf32> to vector<19x64xbf16>
    %68 = vector.extract_strided_slice %33 {offsets = [0, 192], sizes = [19, 64], strides = [1, 1]} : vector<19x384xf32> to vector<19x64xf32>
    %69 = arith.truncf %68 : vector<19x64xf32> to vector<19x64xbf16>
    %70 = vector.extract_strided_slice %33 {offsets = [0, 320], sizes = [19, 64], strides = [1, 1]} : vector<19x384xf32> to vector<19x64xf32>
    %71 = arith.truncf %70 : vector<19x64xf32> to vector<19x64xbf16>
    %72 = tpu.transpose %69, [1, 0] : vector<19x64xbf16> -> vector<64x19xbf16>
    %cst_26 = arith.constant dense<0.000000e+00> : vector<19x19xf32>
    %73 = tpu.matmul %67, %72, %cst_26 {dimension_numbers = #tpu.dot_dimension_numbers<[1], [0], [0], [1], [0, 0, 1, 1], [], []>} : vector<19x64xbf16>, vector<64x19xbf16>, vector<19x19xf32> -> vector<19x19xf32>
    %cst_27 = arith.constant dense<0xFF800000> : vector<19xf32>
    %74 = vector.multi_reduction <maximumf>, %73, %cst_27 [1] : vector<19x19xf32> to vector<19xf32>
    %75 = vector.shape_cast %74 : vector<19xf32> to vector<19x1xf32>
    %76 = vector.broadcast %75 : vector<19x1xf32> to vector<19x19xf32>
    %77 = arith.subf %73, %76 : vector<19x19xf32>
    %78 = math.exp %77 : vector<19x19xf32>
    %cst_28 = arith.constant dense<0.000000e+00> : vector<19xf32>
    %79 = vector.multi_reduction <add>, %78, %cst_28 [1] : vector<19x19xf32> to vector<19xf32>
    %80 = vector.shape_cast %79 : vector<19xf32> to vector<19x1xf32>
    %81 = tpu.reciprocal %80 {approx = true} : vector<19x1xf32> -> vector<19x1xf32>
    %82 = vector.broadcast %81 : vector<19x1xf32> to vector<19x19xf32>
    %83 = arith.mulf %78, %82 : vector<19x19xf32>
    %84 = arith.truncf %83 : vector<19x19xf32> to vector<19x19xbf16>
    %cst_29 = arith.constant dense<0.000000e+00> : vector<19x64xf32>
    %85 = tpu.matmul %84, %71, %cst_29 {dimension_numbers = #tpu.dot_dimension_numbers<[1], [0], [0], [1], [0, 0, 1, 1], [], []>} : vector<19x19xbf16>, vector<19x64xbf16>, vector<19x64xf32> -> vector<19x64xf32>
    %86 = arith.truncf %85 : vector<19x64xf32> to vector<19x64xbf16>
    %87 = vector.extract_strided_slice %34 {offsets = [64, 0], sizes = [64, 128], strides = [1, 1]} : vector<128x128xbf16> to vector<64x128xbf16>
    %cst_30 = arith.constant dense<0.000000e+00> : vector<19x128xf32>
    %88 = tpu.matmul %86, %87, %cst_30 {dimension_numbers = #tpu.dot_dimension_numbers<[1], [0], [0], [1], [0, 0, 1, 1], [], []>} : vector<19x64xbf16>, vector<64x128xbf16>, vector<19x128xf32> -> vector<19x128xf32>
    %89 = arith.addf %63, %88 : vector<19x128xf32>
    %90 = arith.addf %2, %89 : vector<19x128xf32>
    %cst_31 = arith.constant dense<0.000000e+00> : vector<19xf32>
    %91 = vector.multi_reduction <add>, %90, %cst_31 [1] : vector<19x128xf32> to vector<19xf32>
    %92 = vector.shape_cast %91 : vector<19xf32> to vector<19x1xf32>
    %cst_32 = arith.constant 1.280000e+02 : f32
    %93 = vector.broadcast %cst_32 : f32 to vector<19x1xf32>
    %94 = arith.divf %92, %93 : vector<19x1xf32>
    %95 = vector.broadcast %94 : vector<19x1xf32> to vector<19x128xf32>
    %96 = arith.subf %90, %95 : vector<19x128xf32>
    %97 = arith.mulf %96, %96 : vector<19x128xf32>
    %cst_33 = arith.constant dense<0.000000e+00> : vector<19xf32>
    %98 = vector.multi_reduction <add>, %97, %cst_33 [1] : vector<19x128xf32> to vector<19xf32>
    %99 = vector.shape_cast %98 : vector<19xf32> to vector<19x1xf32>
    %cst_34 = arith.constant 1.280000e+02 : f32
    %100 = vector.broadcast %cst_34 : f32 to vector<19x1xf32>
    %101 = arith.divf %99, %100 : vector<19x1xf32>
    %cst_35 = arith.constant 9.99999974E-6 : f32
    %102 = vector.broadcast %cst_35 : f32 to vector<19x1xf32>
    %103 = arith.addf %101, %102 : vector<19x1xf32>
    %104 = math.rsqrt %103 : vector<19x1xf32>
    %105 = vector.broadcast %104 : vector<19x1xf32> to vector<19x128xf32>
    %106 = arith.mulf %96, %105 : vector<19x128xf32>
    %c0_36 = arith.constant 0 : index
    %c0_37 = arith.constant 0 : index
    %107 = vector.load %arg8[%c0_36, %c0_37] : memref<1x128xbf16, #tpu.memory_space<vmem>>, vector<1x128xbf16>
    %108 = arith.extf %107 : vector<1x128xbf16> to vector<1x128xf32>
    %109 = vector.broadcast %108 : vector<1x128xf32> to vector<19x128xf32>
    %110 = arith.mulf %106, %109 : vector<19x128xf32>
    %c0_38 = arith.constant 0 : index
    %c0_39 = arith.constant 0 : index
    %111 = vector.load %arg9[%c0_38, %c0_39] : memref<1x128xbf16, #tpu.memory_space<vmem>>, vector<1x128xbf16>
    %112 = arith.extf %111 : vector<1x128xbf16> to vector<1x128xf32>
    %113 = vector.broadcast %112 : vector<1x128xf32> to vector<19x128xf32>
    %114 = arith.addf %110, %113 : vector<19x128xf32>
    %115 = arith.truncf %114 : vector<19x128xf32> to vector<19x128xbf16>
    %c0_40 = arith.constant 0 : index
    %c0_41 = arith.constant 0 : index
    %116 = vector.load %arg10[%c0_40, %c0_41] : memref<128x512xbf16, #tpu.memory_space<vmem>>, vector<128x512xbf16>
    %cst_42 = arith.constant dense<0.000000e+00> : vector<19x512xf32>
    %117 = tpu.matmul %115, %116, %cst_42 {dimension_numbers = #tpu.dot_dimension_numbers<[1], [0], [0], [1], [0, 0, 1, 1], [], []>} : vector<19x128xbf16>, vector<128x512xbf16>, vector<19x512xf32> -> vector<19x512xf32>
    %c0_43 = arith.constant 0 : index
    %c0_44 = arith.constant 0 : index
    %118 = vector.load %arg11[%c0_43, %c0_44] : memref<1x512xbf16, #tpu.memory_space<vmem>>, vector<1x512xbf16>
    %119 = arith.extf %118 : vector<1x512xbf16> to vector<1x512xf32>
    %120 = vector.broadcast %119 : vector<1x512xf32> to vector<19x512xf32>
    %121 = arith.addf %117, %120 : vector<19x512xf32>
    %cst_45 = arith.constant 1.702000e+00 : f32
    %122 = vector.broadcast %cst_45 : f32 to vector<19x512xf32>
    %123 = arith.mulf %122, %121 : vector<19x512xf32>
    %124 = arith.negf %123 : vector<19x512xf32>
    %125 = math.exp %124 : vector<19x512xf32>
    %cst_46 = arith.constant 1.000000e+00 : f32
    %126 = vector.broadcast %cst_46 : f32 to vector<19x512xf32>
    %127 = arith.addf %126, %125 : vector<19x512xf32>
    %128 = arith.divf %126, %127 : vector<19x512xf32>
    %129 = arith.mulf %121, %128 : vector<19x512xf32>
    %130 = arith.truncf %129 : vector<19x512xf32> to vector<19x512xbf16>
    %c0_47 = arith.constant 0 : index
    %c0_48 = arith.constant 0 : index
    %131 = vector.load %arg12[%c0_47, %c0_48] : memref<512x128xbf16, #tpu.memory_space<vmem>>, vector<512x128xbf16>
    %cst_49 = arith.constant dense<0.000000e+00> : vector<19x128xf32>
    %132 = tpu.matmul %130, %131, %cst_49 {dimension_numbers = #tpu.dot_dimension_numbers<[1], [0], [0], [1], [0, 0, 1, 1], [], []>} : vector<19x512xbf16>, vector<512x128xbf16>, vector<19x128xf32> -> vector<19x128xf32>
    %c0_50 = arith.constant 0 : index
    %c0_51 = arith.constant 0 : index
    %133 = vector.load %arg13[%c0_50, %c0_51] : memref<1x128xbf16, #tpu.memory_space<vmem>>, vector<1x128xbf16>
    %134 = arith.extf %133 : vector<1x128xbf16> to vector<1x128xf32>
    %135 = vector.broadcast %134 : vector<1x128xf32> to vector<19x128xf32>
    %136 = arith.addf %132, %135 : vector<19x128xf32>
    %137 = arith.addf %90, %136 : vector<19x128xf32>
    %138 = arith.truncf %137 : vector<19x128xf32> to vector<19x128xbf16>
    %c0_52 = arith.constant 0 : index
    %c0_53 = arith.constant 0 : index
    %c0_54 = arith.constant 0 : index
    %139 = vector.load %arg14[%c0_52, %c0_53, %c0_54] : memref<1x19x128xbf16, #tpu.memory_space<vmem>>, vector<1x19x128xbf16>
    %140 = vector.shape_cast %139 : vector<1x19x128xbf16> to vector<19x128xbf16>
    %141 = vector.shape_cast %138 : vector<19x128xbf16> to vector<1x19x128xbf16>
    tpu.vector_store %arg14[%c0_52, %c0_53, %c0_54], %141 {strides = array<i32>} : memref<1x19x128xbf16, #tpu.memory_space<vmem>>, vector<1x19x128xbf16>,
    return
  }
  func.func @transform_0(%arg0: i32) -> (i32, i32, i32) {
    %c0_i32 = arith.constant 0 : i32
    %c0_i32_0 = arith.constant 0 : i32
    %c0_i32_1 = arith.constant 0 : i32
    return %arg0, %c0_i32, %c0_i32_0 : i32, i32, i32
  }
  func.func @transform_1(%arg0: i32) -> (i32, i32) {
    %c0_i32 = arith.constant 0 : i32
    %c0_i32_0 = arith.constant 0 : i32
    %c0_i32_1 = arith.constant 0 : i32
    return %c0_i32, %c0_i32_0 : i32, i32
  }
  func.func @transform_2(%arg0: i32) -> (i32, i32) {
    %c0_i32 = arith.constant 0 : i32
    %c0_i32_0 = arith.constant 0 : i32
    %c0_i32_1 = arith.constant 0 : i32
    return %c0_i32, %c0_i32_0 : i32, i32
  }
  func.func @transform_3(%arg0: i32) -> (i32, i32) {
    %c0_i32 = arith.constant 0 : i32
    %c0_i32_0 = arith.constant 0 : i32
    %c0_i32_1 = arith.constant 0 : i32
    return %c0_i32, %c0_i32_0 : i32, i32
  }
  func.func @transform_4(%arg0: i32) -> (i32, i32) {
    %c0_i32 = arith.constant 0 : i32
    %c0_i32_0 = arith.constant 0 : i32
    %c0_i32_1 = arith.constant 0 : i32
    return %c0_i32, %c0_i32_0 : i32, i32
  }
  func.func @transform_5(%arg0: i32) -> (i32, i32) {
    %c0_i32 = arith.constant 0 : i32
    %c0_i32_0 = arith.constant 0 : i32
    %c0_i32_1 = arith.constant 0 : i32
    return %c0_i32, %c0_i32_0 : i32, i32
  }
  func.func @transform_6(%arg0: i32) -> (i32, i32) {
    %c0_i32 = arith.constant 0 : i32
    %c0_i32_0 = arith.constant 0 : i32
    %c0_i32_1 = arith.constant 0 : i32
    return %c0_i32, %c0_i32_0 : i32, i32
  }
  func.func @transform_7(%arg0: i32) -> (i32, i32) {
    %c0_i32 = arith.constant 0 : i32
    %c0_i32_0 = arith.constant 0 : i32
    %c0_i32_1 = arith.constant 0 : i32
    return %c0_i32, %c0_i32_0 : i32, i32
  }
  func.func @transform_8(%arg0: i32) -> (i32, i32) {
    %c0_i32 = arith.constant 0 : i32
    %c0_i32_0 = arith.constant 0 : i32
    %c0_i32_1 = arith.constant 0 : i32
    return %c0_i32, %c0_i32_0 : i32, i32
  }
  func.func @transform_9(%arg0: i32) -> (i32, i32) {
    %c0_i32 = arith.constant 0 : i32
    %c0_i32_0 = arith.constant 0 : i32
    %c0_i32_1 = arith.constant 0 : i32
    return %c0_i32, %c0_i32_0 : i32, i32
  }
  func.func @transform_10(%arg0: i32) -> (i32, i32) {
    %c0_i32 = arith.constant 0 : i32
    %c0_i32_0 = arith.constant 0 : i32
    %c0_i32_1 = arith.constant 0 : i32
    return %c0_i32, %c0_i32_0 : i32, i32
  }
  func.func @transform_11(%arg0: i32) -> (i32, i32) {
    %c0_i32 = arith.constant 0 : i32
    %c0_i32_0 = arith.constant 0 : i32
    %c0_i32_1 = arith.constant 0 : i32
    return %c0_i32, %c0_i32_0 : i32, i32
  }
  func.func @transform_12(%arg0: i32) -> (i32, i32) {
    %c0_i32 = arith.constant 0 : i32
    %c0_i32_0 = arith.constant 0 : i32
    %c0_i32_1 = arith.constant 0 : i32
    return %c0_i32, %c0_i32_0 : i32, i32
  }
  func.func @transform_13(%arg0: i32) -> (i32, i32, i32) {
    %c0_i32 = arith.constant 0 : i32
    %c0_i32_0 = arith.constant 0 : i32
    %c0_i32_1 = arith.constant 0 : i32
    return %arg0, %c0_i32, %c0_i32_0 : i32, i32, i32
  }
}

module attributes {stable_mosaic.version = 11 : i64} {
  func.func @_ln_proj_kernel(%arg0: i32, %arg1: memref<2x128xbf16, #tpu.memory_space<vmem>>, %arg2: memref<1x128xbf16, #tpu.memory_space<vmem>>, %arg3: memref<1x128xbf16, #tpu.memory_space<vmem>>, %arg4: memref<128x128xbf16, #tpu.memory_space<vmem>>, %arg5: memref<2x128xf32, #tpu.memory_space<vmem>>) attributes {dimension_semantics = [#tpu.dimension_semantics<arbitrary>], iteration_bounds = array<i64: 1>, scalar_prefetch = 0 : i64, scratch_operands = 0 : i64, tpu.core_type = #tpu.core_type<tc>, window_params = [{pipeline_mode = #tpu.pipeline_mode<synchronous>, transform_indices = @transform_0, window_bounds = array<i64: 2, 128>}, {pipeline_mode = #tpu.pipeline_mode<synchronous>, transform_indices = @transform_1, window_bounds = array<i64: 1, 128>}, {pipeline_mode = #tpu.pipeline_mode<synchronous>, transform_indices = @transform_2, window_bounds = array<i64: 1, 128>}, {pipeline_mode = #tpu.pipeline_mode<synchronous>, transform_indices = @transform_3, window_bounds = array<i64: 128, 128>}, {pipeline_mode = #tpu.pipeline_mode<synchronous>, transform_indices = @transform_4, window_bounds = array<i64: 2, 128>}]} {
    %c0 = arith.constant 0 : index
    %c0_0 = arith.constant 0 : index
    %0 = vector.load %arg1[%c0, %c0_0] : memref<2x128xbf16, #tpu.memory_space<vmem>>, vector<2x128xbf16>
    %1 = arith.extf %0 : vector<2x128xbf16> to vector<2x128xf32>
    %cst = arith.constant dense<0.000000e+00> : vector<2xf32>
    %2 = vector.multi_reduction <add>, %1, %cst [1] : vector<2x128xf32> to vector<2xf32>
    %3 = vector.shape_cast %2 : vector<2xf32> to vector<2x1xf32>
    %cst_1 = arith.constant 1.280000e+02 : f32
    %4 = vector.broadcast %cst_1 : f32 to vector<2x1xf32>
    %5 = arith.divf %3, %4 : vector<2x1xf32>
    %6 = vector.broadcast %5 : vector<2x1xf32> to vector<2x128xf32>
    %7 = arith.subf %1, %6 : vector<2x128xf32>
    %8 = arith.mulf %7, %7 : vector<2x128xf32>
    %cst_2 = arith.constant dense<0.000000e+00> : vector<2xf32>
    %9 = vector.multi_reduction <add>, %8, %cst_2 [1] : vector<2x128xf32> to vector<2xf32>
    %10 = vector.shape_cast %9 : vector<2xf32> to vector<2x1xf32>
    %cst_3 = arith.constant 1.280000e+02 : f32
    %11 = vector.broadcast %cst_3 : f32 to vector<2x1xf32>
    %12 = arith.divf %10, %11 : vector<2x1xf32>
    %cst_4 = arith.constant 9.99999974E-6 : f32
    %13 = vector.broadcast %cst_4 : f32 to vector<2x1xf32>
    %14 = arith.addf %12, %13 : vector<2x1xf32>
    %15 = math.rsqrt %14 : vector<2x1xf32>
    %16 = vector.broadcast %15 : vector<2x1xf32> to vector<2x128xf32>
    %17 = arith.mulf %7, %16 : vector<2x128xf32>
    %c0_5 = arith.constant 0 : index
    %c0_6 = arith.constant 0 : index
    %18 = vector.load %arg2[%c0_5, %c0_6] : memref<1x128xbf16, #tpu.memory_space<vmem>>, vector<1x128xbf16>
    %19 = arith.extf %18 : vector<1x128xbf16> to vector<1x128xf32>
    %20 = vector.broadcast %19 : vector<1x128xf32> to vector<2x128xf32>
    %21 = arith.mulf %17, %20 : vector<2x128xf32>
    %c0_7 = arith.constant 0 : index
    %c0_8 = arith.constant 0 : index
    %22 = vector.load %arg3[%c0_7, %c0_8] : memref<1x128xbf16, #tpu.memory_space<vmem>>, vector<1x128xbf16>
    %23 = arith.extf %22 : vector<1x128xbf16> to vector<1x128xf32>
    %24 = vector.broadcast %23 : vector<1x128xf32> to vector<2x128xf32>
    %25 = arith.addf %21, %24 : vector<2x128xf32>
    %26 = arith.truncf %25 : vector<2x128xf32> to vector<2x128xbf16>
    %c0_9 = arith.constant 0 : index
    %c0_10 = arith.constant 0 : index
    %27 = vector.load %arg4[%c0_9, %c0_10] : memref<128x128xbf16, #tpu.memory_space<vmem>>, vector<128x128xbf16>
    %cst_11 = arith.constant dense<0.000000e+00> : vector<2x128xf32>
    %28 = tpu.matmul %26, %27, %cst_11 {dimension_numbers = #tpu.dot_dimension_numbers<[1], [0], [0], [1], [0, 0, 1, 1], [], []>} : vector<2x128xbf16>, vector<128x128xbf16>, vector<2x128xf32> -> vector<2x128xf32>
    %c0_12 = arith.constant 0 : index
    %c0_13 = arith.constant 0 : index
    %29 = vector.load %arg5[%c0_12, %c0_13] : memref<2x128xf32, #tpu.memory_space<vmem>>, vector<2x128xf32>
    tpu.vector_store %arg5[%c0_12, %c0_13], %28 {strides = array<i32>} : memref<2x128xf32, #tpu.memory_space<vmem>>, vector<2x128xf32>,
    return
  }
  func.func @transform_0(%arg0: i32) -> (i32, i32) {
    %c0_i32 = arith.constant 0 : i32
    %c0_i32_0 = arith.constant 0 : i32
    %c0_i32_1 = arith.constant 0 : i32
    return %c0_i32, %c0_i32_0 : i32, i32
  }
  func.func @transform_1(%arg0: i32) -> (i32, i32) {
    %c0_i32 = arith.constant 0 : i32
    %c0_i32_0 = arith.constant 0 : i32
    %c0_i32_1 = arith.constant 0 : i32
    return %c0_i32, %c0_i32_0 : i32, i32
  }
  func.func @transform_2(%arg0: i32) -> (i32, i32) {
    %c0_i32 = arith.constant 0 : i32
    %c0_i32_0 = arith.constant 0 : i32
    %c0_i32_1 = arith.constant 0 : i32
    return %c0_i32, %c0_i32_0 : i32, i32
  }
  func.func @transform_3(%arg0: i32) -> (i32, i32) {
    %c0_i32 = arith.constant 0 : i32
    %c0_i32_0 = arith.constant 0 : i32
    %c0_i32_1 = arith.constant 0 : i32
    return %c0_i32, %c0_i32_0 : i32, i32
  }
  func.func @transform_4(%arg0: i32) -> (i32, i32) {
    %c0_i32 = arith.constant 0 : i32
    %c0_i32_0 = arith.constant 0 : i32
    %c0_i32_1 = arith.constant 0 : i32
    return %c0_i32, %c0_i32_0 : i32, i32
  }
}

module attributes {stable_mosaic.version = 11 : i64} {
  func.func @_logits_kernel(%arg0: i32, %arg1: memref<2x128xf32, #tpu.memory_space<vmem>>, %arg2: memref<4x128xf32, #tpu.memory_space<vmem>>, %arg3: memref<1x1xf32, #tpu.memory_space<vmem>>, %arg4: memref<2x4xf32, #tpu.memory_space<vmem>>) attributes {dimension_semantics = [#tpu.dimension_semantics<arbitrary>], iteration_bounds = array<i64: 1>, scalar_prefetch = 0 : i64, scratch_operands = 0 : i64, tpu.core_type = #tpu.core_type<tc>, window_params = [{pipeline_mode = #tpu.pipeline_mode<synchronous>, transform_indices = @transform_0, window_bounds = array<i64: 2, 128>}, {pipeline_mode = #tpu.pipeline_mode<synchronous>, transform_indices = @transform_1, window_bounds = array<i64: 4, 128>}, {pipeline_mode = #tpu.pipeline_mode<synchronous>, transform_indices = @transform_2, window_bounds = array<i64: 1, 1>}, {pipeline_mode = #tpu.pipeline_mode<synchronous>, transform_indices = @transform_3, window_bounds = array<i64: 2, 4>}]} {
    %c0 = arith.constant 0 : index
    %c0_0 = arith.constant 0 : index
    %0 = vector.load %arg1[%c0, %c0_0] : memref<2x128xf32, #tpu.memory_space<vmem>>, vector<2x128xf32>
    %c0_1 = arith.constant 0 : index
    %c0_2 = arith.constant 0 : index
    %1 = vector.load %arg2[%c0_1, %c0_2] : memref<4x128xf32, #tpu.memory_space<vmem>>, vector<4x128xf32>
    %2 = arith.mulf %0, %0 : vector<2x128xf32>
    %cst = arith.constant dense<0.000000e+00> : vector<2xf32>
    %3 = vector.multi_reduction <add>, %2, %cst [1] : vector<2x128xf32> to vector<2xf32>
    %4 = vector.shape_cast %3 : vector<2xf32> to vector<2x1xf32>
    %5 = math.rsqrt %4 : vector<2x1xf32>
    %6 = vector.broadcast %5 : vector<2x1xf32> to vector<2x128xf32>
    %7 = arith.mulf %0, %6 : vector<2x128xf32>
    %8 = arith.mulf %1, %1 : vector<4x128xf32>
    %cst_3 = arith.constant dense<0.000000e+00> : vector<4xf32>
    %9 = vector.multi_reduction <add>, %8, %cst_3 [1] : vector<4x128xf32> to vector<4xf32>
    %10 = vector.shape_cast %9 : vector<4xf32> to vector<4x1xf32>
    %11 = math.rsqrt %10 : vector<4x1xf32>
    %12 = vector.broadcast %11 : vector<4x1xf32> to vector<4x128xf32>
    %13 = arith.mulf %1, %12 : vector<4x128xf32>
    %c0_4 = arith.constant 0 : index
    %c0_5 = arith.constant 0 : index
    %14 = vector.load %arg3[%c0_4, %c0_5] : memref<1x1xf32, #tpu.memory_space<vmem>>, vector<1x1xf32>
    %15 = vector.extract %14[0, 0] : f32 from vector<1x1xf32>
    %16 = math.exp %15 : f32
    %17 = tpu.transpose %13, [1, 0] : vector<4x128xf32> -> vector<128x4xf32>
    %cst_6 = arith.constant dense<0.000000e+00> : vector<2x4xf32>
    %18 = tpu.matmul %7, %17, %cst_6 {dimension_numbers = #tpu.dot_dimension_numbers<[1], [0], [0], [1], [0, 0, 1, 1], [], []>} : vector<2x128xf32>, vector<128x4xf32>, vector<2x4xf32> -> vector<2x4xf32>
    %19 = vector.broadcast %16 : f32 to vector<2x4xf32>
    %20 = arith.mulf %19, %18 : vector<2x4xf32>
    %c0_7 = arith.constant 0 : index
    %c0_8 = arith.constant 0 : index
    %21 = vector.load %arg4[%c0_7, %c0_8] : memref<2x4xf32, #tpu.memory_space<vmem>>, vector<2x4xf32>
    tpu.vector_store %arg4[%c0_7, %c0_8], %20 {strides = array<i32>} : memref<2x4xf32, #tpu.memory_space<vmem>>, vector<2x4xf32>,
    return
  }
  func.func @transform_0(%arg0: i32) -> (i32, i32) {
    %c0_i32 = arith.constant 0 : i32
    %c0_i32_0 = arith.constant 0 : i32
    %c0_i32_1 = arith.constant 0 : i32
    return %c0_i32, %c0_i32_0 : i32, i32
  }
  func.func @transform_1(%arg0: i32) -> (i32, i32) {
    %c0_i32 = arith.constant 0 : i32
    %c0_i32_0 = arith.constant 0 : i32
    %c0_i32_1 = arith.constant 0 : i32
    return %c0_i32, %c0_i32_0 : i32, i32
  }
  func.func @transform_2(%arg0: i32) -> (i32, i32) {
    %c0_i32 = arith.constant 0 : i32
    %c0_i32_0 = arith.constant 0 : i32
    %c0_i32_1 = arith.constant 0 : i32
    return %c0_i32, %c0_i32_0 : i32, i32
  }
  func.func @transform_3(%arg0: i32) -> (i32, i32) {
    %c0_i32 = arith.constant 0 : i32
    %c0_i32_0 = arith.constant 0 : i32
    %c0_i32_1 = arith.constant 0 : i32
    return %c0_i32, %c0_i32_0 : i32, i32
  }
}

</mosaic_0001>

<bundles_post_ra>
// kernel: _lambda_.15
= control target key start
LH: loop header
LB: loop body
LE: loop exit
PB: predicated region body
PF: predicated region fallthrough
CT: control target
= control target key end

     0   :  { %vm20_vm0 = vcmask 1043456   ;;  %v208_v3 = vmov 0.0   ;;  %vm209_vm1 = vmmov 0   ;;  %v37_v19 = vlaneseq  ;;  %s273_s0 = inlined_call_operand.vmem [shape: bf16[4,128], index: 0, kind: input, shape index: {}]   ;;  %s274_s3 = inlined_call_operand.vmem [shape: bf16[128,128], index: 3, kind: input, shape index: {}]   ;;  %s275_s1 = inlined_call_operand.vmem [shape: bf16[1,128], index: 1, kind: input, shape index: {}]   ;;  %s276_s2 = inlined_call_operand.vmem [shape: bf16[1,128], index: 2, kind: input, shape index: {}]   ;;  %s277_s4 = inlined_call_operand.vmem [shape: f32[4,128], index: 4, kind: output, shape index: {}]  }
   0x1   :  { %v18_v0 = vld [vmem:[%s273_s0] sm:$0x3]  ;;  %176 = vmatprep.subr.bf16.mxu0 %v208_v3  ;;  %v199_v5 = vld [vmem:[%s274_s3 + $0x8] sm:$0xff]   ;;  %v200_v11 = vld [vmem:[%s274_s3 + $0x10] sm:$0xff]   ;;  %192 = vmatprep.mubr.msk.bf16.mxu0 %vm209_vm1, %v208_v3 }
   0x2   :  { %v19_v1 = vunpack.c.l.bf16 %v18_v0  ;;  %v198_v4 = vld [vmem:[%s274_s3] sm:$0xff]   ;;  %v201_v12 = vld [vmem:[%s274_s3 + $0x18] sm:$0xff]   ;;  %v203_v14 = vld [vmem:[%s274_s3 + $0x28] sm:$0xff]   ;;  %v38_v21 = vshrl.u32 %v37_v19, 7 }
   0x3   :  { %177 = vmatpush3.bf16.msra.mxu0 %v198_v4  ;;  %v202_v13 = vld [vmem:[%s274_s3 + $0x20] sm:$0xff]   ;;  %v204_v15 = vld [vmem:[%s274_s3 + $0x30] sm:$0xff]   ;;  %v205_v16 = vld [vmem:[%s274_s3 + $0x38] sm:$0xff]  }
   0x4   :  { %v21_v2 = vsel %vm20_vm0, %v19_v1, 0.0  ;;  %178 = vmatprep.subr.bf16.mxu0 %v208_v3  ;;  %v35_v22 = vld [vmem:[%s275_s1] sm:$0x1]  ;;  %v39_v25 = vsub.s32 0, %v38_v21 }
   0x5   :  { %22 = vadd.xlane.f32.xlu0 %v21_v2  ;;  %v42_v23 = vld [vmem:[%s276_s2] sm:$0x1]  ;;  %v36_v24 = vunpack.c.l.bf16 %v35_v22 }
   0x6   :  { %v43_v26 = vunpack.c.l.bf16 %v42_v23 }
   0x7   :  { %179 = vmatpush3.bf16.msra.mxu0 %v199_v5  ;;  %v40_v27 = vrot.slane %v36_v24, %v39_v25 }
   0x8   :  { %180 = vmatprep.subr.bf16.mxu0 %v208_v3  ;;  %v47_v30 = vrot.slane %v43_v26, %v39_v25 }
   0xb   :  { %181 = vmatpush3.bf16.msra.mxu0 %v200_v11 }
   0xc   :  { %182 = vmatprep.subr.bf16.mxu0 %v208_v3 }
   0xf   :  { %183 = vmatpush3.bf16.msra.mxu0 %v201_v12 }
  0x10   :  { %184 = vmatprep.subr.bf16.mxu0 %v208_v3 }
  0x13   :  { %185 = vmatpush3.bf16.msra.mxu0 %v202_v13 }
  0x14   :  { %186 = vmatprep.subr.bf16.mxu0 %v208_v3 }
  0x17   :  { %187 = vmatpush3.bf16.msra.mxu0 %v203_v14 }
  0x18   :  { %188 = vmatprep.subr.bf16.mxu0 %v208_v3 }
  0x1b   :  { %189 = vmatpush3.bf16.msra.mxu0 %v204_v15 }
  0x1c   :  { %190 = vmatprep.subr.bf16.mxu0 %v208_v3 }
  0x1f   :  { %191 = vmatpush3.bf16.msra.mxu0 %v205_v16 }
  0x92   :  { %v23_v6 = vpop.xlane.xlu0 %22 }
  0x93   :  { %v25_v7 = vmul.f32 0.0078125, %v23_v6 }
  0x95   :  { %v26_v8 = vsub.f32 %v19_v1, %v25_v7 }
  0x97   :  { %v27_v9 = vmul.f32 %v26_v8, %v26_v8 }
  0x99   :  { %v28_v10 = vsel %vm20_vm0, %v27_v9, 0.0 }
  0x9a   :  { %29 = vadd.xlane.f32.xlu0 %v28_v10 }
 0x127   :  { %v30_v17 = vpop.xlane.xlu0 %29 }
 0x128   :  { %v31_v18 = vmul.f32 0.0078125, %v30_v17 }
 0x12a   :  { %v32_v20 = vadd.f32 1e-05, %v31_v18 }
 0x12c   :  { %206 = vrsqrt.f32 %v32_v20 }
 0x136   :  { %v207_v28 = vpop.eup %206 }
 0x137   :  { %v34_v29 = vmul.f32 %v207_v28, %v26_v8 }
 0x139   :  { %v41_v31 = vmul.f32 %v40_v27, %v34_v29 }
 0x13b   :  { %v48_v32 = vadd.f32 %v47_v30, %v41_v31 }
 0x13d   :  { %v49_v33 = vpack.c.bf16 %v48_v32, %v48_v32 }
 0x13f   :  { %193 = vmatmul.mubr.bf16.vlgmr.msra.gmra.mrb[0].mxu0 %v49_v33 }
 0x212   :  { %v148_v34 = vpop.f32.mrb[0].mxu0 }
 0x213   :  { %154 = vst [vmem:[%s277_s4] sm:$0xf] %v148_v34  ;;  %v194_v35 = vpop.f32.mrb[1].mxu0 }
 0x214   :  { %v151_v36 = vpop.f32.mrb[2].mxu0 }
 0x215   :  { %v195_v37 = vpop.f32.mrb[3].mxu0 }

// kernel: _lambda_.14
= control target key start
LH: loop header
LB: loop body
LE: loop exit
PB: predicated region body
PF: predicated region fallthrough
CT: control target
= control target key end

     0   :  { %s2585_s29 = smov 0   ;;  %s3082_s0 = inlined_call_operand.vmem [shape: bf16[4,16,128], index: 0, kind: input, shape index: {}]   ;;  %s3083_s1 = inlined_call_operand.vmem [shape: bf16[1,128], index: 1, kind: input, shape index: {}]   ;;  %s3084_s2 = inlined_call_operand.vmem [shape: bf16[1,128], index: 2, kind: input, shape index: {}]   ;;  %s3085_s3 = inlined_call_operand.vmem [shape: bf16[128,384], index: 3, kind: input, shape index: {}]   ;;  %s3086_s4 = inlined_call_operand.vmem [shape: bf16[1,384], index: 4, kind: input, shape index: {}]   ;;  %s3087_s5 = inlined_call_operand.vmem [shape: bf16[128,128], index: 5, kind: input, shape index: {}]   ;;  %s3088_s6 = inlined_call_operand.vmem [shape: bf16[1,128], index: 6, kind: input, shape index: {}]   ;;  %s3089_s7 = inlined_call_operand.vmem [shape: bf16[1,128], index: 7, kind: input, shape index: {}]   ;;  %s3090_s8 = inlined_call_operand.vmem [shape: bf16[1,128], index: 8, kind: input, shape index: {}]   ;;  %s3091_s9 = inlined_call_operand.vmem [shape: bf16[128,512], index: 9, kind: input, shape index: {}]   ;;  %s3092_s10 = inlined_call_operand.vmem [shape: bf16[1,512], index: 10, kind: input, shape index: {}]   ;;  %s3093_s11 = inlined_call_operand.vmem [shape: bf16[512,128], index: 11, kind: input, shape index: {}]   ;;  %s3094_s12 = inlined_call_operand.vmem [shape: bf16[1,128], index: 12, kind: input, shape index: {}]   ;;  %s3095_s13 = inlined_call_operand.vmem [shape: f32[16,16], index: 13, kind: input, shape index: {}]   ;;  %s3096_s14 = inlined_call_operand.vmem [shape: bf16[4,16,128], index: 14, kind: output, shape index: {}]  }
   0x1 LB: > { %s2035_s30 = sadd.s32 4294967295, %s2504_s29   ;;  %p2039_p0 = scmp.ge.s32.totalorder %s2504_s29, 1  ;;  %s2504_s29 = sphi %s2585_s29, %s24_s29  }
   0x2   : > { %p412_p1 = scmp.lt.s32.totalorder %s2504_s29, 5 }
   0x4   : > { %p413_p2 = pnand %p2039_p0, %p412_p1 }
   0x5   : > { %p458_p3 = scmp.lt.s32.totalorder (!%p413_p2), %s2035_s30, 3  ;;  %v2322_v3 = vld [vmem:[%s3085_s3 + $0x4] ss:$12 sps:$4 sm:$0xff] (!%p413_p2)   ;;  %v2324_v4 = vld [vmem:[%s3085_s3] ss:$12 sps:$4 sm:$0xff] (!%p413_p2)   ;;  %v2506_v5 = vmov (!%p413_p2), 0.0   ;;  %v498_v41 = vlaneseq (!%p413_p2) }
   0x6   : > { %416 = sbr.rel (%p413_p2) target bundleno = 2863 (0xb2f), region = 76  ;;  %2242 = vmatprep.subr.bf16.mxu1 (!%p413_p2), %v2506_v5  ;;  %v2325_v6 = vld [vmem:[%s3085_s3 + $0x8] ss:$12 sps:$4 sm:$0xff] (!%p413_p2)   ;;  %703 = vmatprep.subr.bf16.mxu0 (!%p413_p2), %v2322_v3  ;;  %v2328_v16 = vld [vmem:[%s3085_s3 + $0x18] ss:$12 sps:$4 sm:$0xff] (!%p413_p2)   ;;  %v2507_v31 = vmov (!%p413_p2), 0  }
   0x7   : > { %v2326_v7 = vld [vmem:[%s3085_s3 + $0x1c] ss:$12 sps:$4 sm:$0xff] (!%p413_p2)   ;;  %704 = vmatpush1.bf16.msra.mxu0 (!%p413_p2), %v2324_v4  ;;  %2243 = vmatpush3.bf16.msra.mxu1 (!%p413_p2), %v2325_v6  ;;  %v2329_v17 = vld [vmem:[%s3085_s3 + $0x20] ss:$12 sps:$4 sm:$0xff] (!%p413_p2)   ;;  %v2333_v20 = vld [vmem:[%s3085_s3 + $0x38] ss:$12 sps:$4 sm:$0xff] (!%p413_p2)  }
   0x8   : > { %705 = vmatprep.subr.bf16.mxu0 (!%p413_p2), %v2326_v7  ;;  %2244 = vmatprep.subr.bf16.mxu1 (!%p413_p2), %v2506_v5  ;;  %v2330_v18 = vld [vmem:[%s3085_s3 + $0x34] ss:$12 sps:$4 sm:$0xff] (!%p413_p2)   ;;  %v2332_v19 = vld [vmem:[%s3085_s3 + $0x30] ss:$12 sps:$4 sm:$0xff] (!%p413_p2)   ;;  %v2334_v21 = vld [vmem:[%s3085_s3 + $0x4c] ss:$12 sps:$4 sm:$0xff] (!%p413_p2)  }
   0x9   : > { %v2336_v22 = vld [vmem:[%s3085_s3 + $0x48] ss:$12 sps:$4 sm:$0xff] (!%p413_p2)   ;;  %v2337_v23 = vld [vmem:[%s3085_s3 + $0x50] ss:$12 sps:$4 sm:$0xff] (!%p413_p2)   ;;  %v2340_v25 = vld [vmem:[%s3085_s3 + $0x60] ss:$12 sps:$4 sm:$0xff] (!%p413_p2)   ;;  %735 = vmatprep.mubr.bf16.mxu0 (!%p413_p2), %v2507_v31 }
   0xa   : > { %v2338_v24 = vld [vmem:[%s3085_s3 + $0x64] ss:$12 sps:$4 sm:$0xff] (!%p413_p2)   ;;  %v2341_v26 = vld [vmem:[%s3085_s3 + $0x68] ss:$12 sps:$4 sm:$0xff] (!%p413_p2)   ;;  %v2345_v29 = vld [vmem:[%s3085_s3 + $0x80] ss:$12 sps:$4 sm:$0xff] (!%p413_p2)  }
   0xb   : > { %706 = vmatpush1.bf16.msra.mxu0 (!%p413_p2), %v2328_v16  ;;  %2245 = vmatpush3.bf16.msra.mxu1 (!%p413_p2), %v2329_v17  ;;  %v2342_v27 = vld [vmem:[%s3085_s3 + $0x7c] ss:$12 sps:$4 sm:$0xff] (!%p413_p2)   ;;  %v2344_v28 = vld [vmem:[%s3085_s3 + $0x78] ss:$12 sps:$4 sm:$0xff] (!%p413_p2)   ;;  %v2346_v30 = vld [vmem:[%s3085_s3 + $0x94] ss:$12 sps:$4 sm:$0xff] (!%p413_p2)  }
   0xc   : > { %2246 = vmatprep.subr.bf16.mxu1 (!%p413_p2), %v2506_v5  ;;  %707 = vmatprep.subr.bf16.mxu0 (!%p413_p2), %v2330_v18  ;;  %vm2508_vm0 = vmmov (!%p413_p2), 0   ;;  %v2348_v32 = vld [vmem:[%s3085_s3 + $0x90] ss:$12 sps:$4 sm:$0xff] (!%p413_p2)   ;;  %v2349_v33 = vld [vmem:[%s3085_s3 + $0x98] ss:$12 sps:$4 sm:$0xff] (!%p413_p2)   ;;  %v2702_v44 = vshrl.u32 (!%p413_p2), %v498_v41, 7 }
   0xd   : > { %s3098_s30 = smov (!%p458_p3, %s2035_s30), 3  ;;  %2258 = vmatprep.mubr.msk.bf16.mxu1 %vm2508_vm0, %v2506_v5  ;;  %v2350_v34 = vld [vmem:[%s3085_s3 + $0xac] ss:$12 sps:$4 sm:$0xff]   ;;  %v2352_v35 = vld [vmem:[%s3085_s3 + $0xa8] ss:$12 sps:$4 sm:$0xff]   ;;  %vm812_vm1 = vcmask 523264  }
   0xe   : > { %s2158_s15 = sshll.u32 %s3098_s30, 3  ;;  %v2353_v36 = vld [vmem:[%s3085_s3 + $0xb0] ss:$12 sps:$4 sm:$0xff]   ;;  %v496_v45 = vld [vmem:[%s3083_s1] sm:$0x1]  ;;  %v2708_v47 = vsub.s32 0, %v2702_v44 }
   0xf   : > { %s462_s18 = scalar_lea.vmem %s3082_s0, %s2158_s15  ;;  %708 = vmatpush1.bf16.msra.mxu0 %v2332_v19  ;;  %2247 = vmatpush3.bf16.msra.mxu1 %v2333_v20  ;;  %v497_v46 = vunpack.c.l.bf16 %v496_v45  ;;  %v504_v48 = vld [vmem:[%s3084_s2] sm:$0x1]  ;;  %v558_v63 = vsub.s32 4, %v2702_v44  ;;  %vm860_vm2 = vcmask 130048   ;;  %s2509_s25 = smov 64  }
  0x10   : > { %v2163_v0 = vld [vmem:[%s462_s18] sm:$0xff]   ;;  %2248 = vmatprep.subr.bf16.mxu1 %v2506_v5  ;;  %709 = vmatprep.subr.bf16.mxu0 %v2334_v21  ;;  %v505_v52 = vunpack.c.l.bf16 %v504_v48  ;;  %s467_s27 = scalar_lea.vmem %s3096_s14, %s2158_s15 }
  0x11   : > { %v2601_v1 = vunpack.c.l.bf16 %v2163_v0  ;;  %v2604_v2 = vunpack.c.h.bf16 %v2163_v0  ;;  %v501_v51 = vrot.slane %v497_v46, %v2708_v47  ;;  %v545_v61 = vld [vmem:[%s3086_s4] sm:$0x7]  ;;  %v554_v0 = vsub.s32 2, %v2702_v44 }
  0x12   : > { %v509_v56 = vrot.slane %v505_v52, %v2708_v47  ;;  %v546_v62 = vunpack.c.l.bf16 %v545_v61 }
  0x13   : > { %473 = vadd.xlane.f32.xlu0 %v2601_v1  ;;  %710 = vmatpush1.bf16.msra.mxu0 %v2336_v22 }
  0x14   : > { %2249 = vmatpush3.bf16.msra.mxu1 %v2337_v23  ;;  %711 = vmatprep.subr.bf16.mxu0 %v2338_v24  ;;  %v551_v3 = vrot.slane %v546_v62, %v2708_v47  ;;  %v559_v4 = vrot.slane %v546_v62, %v558_v63  ;;  %v555_v6 = vrot.slane %v546_v62, %v554_v0 }
  0x15   : > { %2250 = vmatprep.subr.bf16.mxu1 %v2506_v5 }
  0x16   : > { %v566_v7 = vrot.slane %v551_v3, %v2708_v47 }
  0x17   : > { %475 = vadd.xlane.f32.xlu0 %v2604_v2  ;;  %712 = vmatpush1.bf16.msra.mxu0 %v2340_v25 }
  0x18   : > { %2251 = vmatpush3.bf16.msra.mxu1 %v2341_v26  ;;  %713 = vmatprep.subr.bf16.mxu0 %v2342_v27 }
  0x19   : > { %2252 = vmatprep.subr.bf16.mxu1 %v2506_v5 }
  0x1b   : > { %714 = vmatpush1.bf16.msra.mxu0 %v2344_v28 }
  0x1c   : > { %2253 = vmatpush3.bf16.msra.mxu1 %v2345_v29  ;;  %715 = vmatprep.subr.bf16.mxu0 %v2346_v30  ;;  %v2746_v30 = vld [vmem:[%s3095_s13] sm:$0xff] }
  0x1d   : > { %2254 = vmatprep.subr.bf16.mxu1 %v2506_v5 }
  0x1f   : > { %716 = vmatpush1.bf16.msra.mxu0 %v2348_v32 }
  0x20   : > { %2255 = vmatpush3.bf16.msra.mxu1 %v2349_v33  ;;  %717 = vmatprep.subr.bf16.mxu0 %v2350_v34  ;;  %v2751_v33 = vld [vmem:[%s3095_s13 + $0x8] sm:$0xff] }
  0x21   : > { %2256 = vmatprep.subr.bf16.mxu1 %v2506_v5 }
  0x23   : > { %718 = vmatpush1.bf16.msra.mxu0 %v2352_v35 }
  0x24   : > { %2257 = vmatpush3.bf16.msra.mxu1 %v2353_v36  ;;  %2274 = vmatprep.subr.bf16.mxu0 %v2506_v5 }
  0x25   : > { %2262 = vmatprep.subr.bf16.mxu1 %v2506_v5 }
  0xa0   : > { %v474_v8 = vpop.xlane.xlu0 %473 }
  0xa1   : > { %v478_v9 = vmul.f32 0.0078125, %v474_v8  ;;  %v574_v8 = vrot.slane %v559_v4, %v2708_v47 }
  0xa3   : > { %v2622_v10 = vsub.f32 %v2601_v1, %v478_v9 }
  0xa4   : > { %v476_v11 = vpop.xlane.xlu0 %475 }
  0xa5   : > { %v479_v12 = vmul.f32 0.0078125, %v476_v11  ;;  %v482_v13 = vmul.f32 %v2622_v10, %v2622_v10  ;;  %v570_v11 = vrot.slane %v555_v6, %v2708_v47 }
  0xa7   : > { %v2627_v14 = vsub.f32 %v2604_v2, %v479_v12  ;;  %484 = vadd.xlane.f32.xlu1 %v482_v13 }
  0xa9   : > { %v483_v15 = vmul.f32 %v2627_v14, %v2627_v14 }
  0xab   : > { %486 = vadd.xlane.f32.xlu1 %v483_v15 }
 0x134   : > { %v485_v37 = vpop.xlane.xlu1 %484 }
 0x135   : > { %v488_v38 = vmul.f32 0.0078125, %v485_v37 }
 0x137   : > { %v490_v39 = vadd.f32 1e-05, %v488_v38 }
 0x138   : > { %v487_v40 = vpop.xlane.xlu1 %486 }
 0x139   : > { %2442 = vrsqrt.f32 %v490_v39  ;;  %v489_v42 = vmul.f32 0.0078125, %v487_v40 }
 0x13b   : > { %v491_v43 = vadd.f32 1e-05, %v489_v42 }
 0x13d   : > { %2444 = vrsqrt.f32 %v491_v43 }
 0x143   : > { %v2443_v49 = vpop.eup %2442 }
 0x144   : > { %v494_v50 = vmul.f32 %v2443_v49, %v2622_v10 }
 0x146   : > { %v502_v55 = vmul.f32 %v501_v51, %v494_v50 }
 0x147   : > { %v2445_v53 = vpop.eup %2444 }
 0x148   : > { %v495_v54 = vmul.f32 %v2445_v53, %v2627_v14  ;;  %v510_v58 = vadd.f32 %v509_v56, %v502_v55  ;;  %v2354_v53 = vld [vmem:[%s3087_s5] sm:$0xff]   ;;  %v2356_v55 = vld [vmem:[%s3087_s5 + $0x10] sm:$0xff]  }
 0x14a   : > { %v503_v57 = vmul.f32 %v501_v51, %v495_v54  ;;  %v2355_v54 = vld [vmem:[%s3087_s5 + $0x8] sm:$0xff]  }
 0x14c   : > { %v511_v59 = vadd.f32 %v509_v56, %v503_v57 }
 0x14e   : > { %v512_v60 = vpack.c.bf16 %v511_v59, %v510_v58 }
 0x150   : > { %736 = vmatmul.mubr.bf16.vlgmr.msra.gmra.mrb[0].mxu0 %v512_v60  ;;  %2259 = vmatmul.mubr.bf16.vlgmr.msra.gmra.mrb[0].mxu1 %v512_v60 }
 0x151   : > { %2264 = vmatprep.mubr.msk.bf16.mxu1 %vm2508_vm0, %v2506_v5  ;;  %2282 = vmatprep.mubr.msk.bf16.mxu0 %vm2508_vm0, %v2506_v5 }
 0x152   : > { %2275 = vmatpush3.bf16.msra.mxu0 %v2354_v53 }
 0x153   : > { %2276 = vmatprep.subr.bf16.mxu0 %v2506_v5 }
 0x156   : > { %2277 = vmatpush3.bf16.msra.mxu0 %v2355_v54  ;;  %v803_v54 = vld [vmem:[%s3088_s6] sm:$0x1] }
 0x157   : > { %2278 = vmatprep.subr.bf16.mxu0 %v2506_v5 }
 0x15a   : > { %2279 = vmatpush3.bf16.msra.mxu0 %v2356_v55  ;;  %v804_v55 = vunpack.c.l.bf16 %v803_v54 }
 0x15b   : > { %2280 = vmatprep.subr.bf16.mxu0 %v2506_v5 }
 0x223   : > { %v737_v9 = vpop.f32.mrb[0].mxu0  ;;  %v780_v10 = vpop.f32.mrb[0].mxu1 }
 0x224   : > { %v738_v12 = vadd.f32 %v737_v9, %v566_v7  ;;  %v739_v13 = vpop.f32.mrb[1].mxu0  ;;  %v2260_v14 = vpop.f32.mrb[1].mxu1  ;;  %v781_v17 = vadd.f32 %v780_v10, %v574_v8 }
 0x225   : > { %v741_v15 = vpop.f32.mrb[2].mxu0  ;;  %v783_v16 = vpop.f32.mrb[2].mxu1  ;;  %v740_v22 = vadd.f32 %v739_v13, %v570_v11 }
 0x226   : > { %v742_v18 = vadd.f32 %v741_v15, %v566_v7  ;;  %v784_v19 = vadd.f32 %v783_v16, %v574_v8  ;;  %v743_v20 = vpop.f32.mrb[3].mxu0  ;;  %v2261_v21 = vpop.f32.mrb[3].mxu1  ;;  %v805_v24 = vmul.f32 0.125, %v738_v12  ;;  %v2357_v7 = vld [vmem:[%s3087_s5 + $0x18] sm:$0xff]  }
 0x227   : > { %v744_v23 = vadd.f32 %v743_v20, %v570_v11  ;;  %2281 = vmatpush3.bf16.msra.mxu0 %v2357_v7  ;;  %v2362_v7 = vld [vmem:[%s3091_s9] ss:$16 sps:$4 sm:$0xff]  }
 0x228   : > { %v806_v25 = vmul.f32 0.125, %v742_v18  ;;  %v2734_v26 = vpack.c.bf16 %v784_v19, %v781_v17  ;;  %2298 = vmatprep.subr.bf16.mxu0 %v2506_v5 }
 0x229   : > { %v808_v27 = vpack.c.bf16 %v744_v23, %v740_v22 }
 0x22a   : > { %v807_v28 = vpack.c.bf16 %v806_v25, %v805_v24 }
 0x22b   : > { %v817_v29 = vsel %vm812_vm1, %v808_v27, 0 }
 0x22c   : > { %2263 = vmatpush3.bf16.xpose.msra.mxu1 %v817_v29 }
 0x22d   : > { %2268 = vmatprep.subr.bf16.mxu1 %v2506_v5 }
 0x233   : > { %2265 = vmatmul.mubr.msk.bf16.vlgmr.msra.gmra.mrb[4].mxu1 %vm812_vm1, %v807_v28 }
 0x234   : > { %2269 = vmatpush3.bf16.msra.mxu1 %v2734_v26  ;;  %2270 = vmatprep.mubr.msk.bf16.mxu1 %vm2508_vm0, %v2506_v5 }
 0x235   : > { %2286 = vmatprep.subr.bf16.mxu1 %v2506_v5 }
 0x306   : > { %v853_v32 = vpop.f32.mrb[4].mxu1 }
 0x307   : > { %v854_v34 = vadd.f32 %v853_v32, %v2746_v30  ;;  %v2266_v35 = vpop.f32.mrb[5].mxu1 }
 0x308   : > { %v856_v36 = vpop.f32.mrb[6].mxu1  ;;  %v2360_v35 = vld [vmem:[%s3087_s5 + $0x30] sm:$0xff]  }
 0x309   : > { %v857_v37 = vadd.f32 %v856_v36, %v2751_v33  ;;  %v2267_v38 = vpop.f32.mrb[7].mxu1  ;;  %v861_v39 = vsel %vm860_vm2, %v854_v34, -inf }
 0x30a   : > { %862 = vmax.xlane.f32.xlu0 %v861_v39 }
 0x30b   : > { %v864_v40 = vsel %vm860_vm2, %v857_v37, -inf }
 0x30c   : > { %865 = vmax.xlane.f32.xlu1 %v864_v40 }
 0x397   : > { %v863_v41 = vpop.xlane.xlu0 %862 }
 0x398   : > { %v867_v42 = vsub.f32 %v854_v34, %v863_v41  ;;  %v2359_v34 = vld [vmem:[%s3087_s5 + $0x28] sm:$0xff]  }
 0x399   : > { %v866_v43 = vpop.xlane.xlu1 %865 }
 0x39a   : > { %v869_v45 = vmul.f32 1.442695, %v867_v42  ;;  %v868_v46 = vsub.f32 %v857_v37, %v866_v43 }
 0x39c   : > { %2446 = vpow2.f32 %v869_v45  ;;  %v871_v48 = vmul.f32 1.442695, %v868_v46 }
 0x39e   : > { %2448 = vpow2.f32 %v871_v48 }
 0x3a6   : > { %v2447_v49 = vpop.eup %2446 }
 0x3a7   : > { %v873_v50 = vsel %vm860_vm2, %v2447_v49, 0.0 }
 0x3a8   : > { %v2449_v51 = vpop.eup %2448  ;;  %874 = vadd.xlane.f32.xlu0 %v873_v50 }
 0x3a9   : > { %v876_v52 = vsel %vm860_vm2, %v2449_v51, 0.0 }
 0x3aa   : > { %877 = vadd.xlane.f32.xlu1 %v876_v52 }
 0x3bb   : > { %1004 = vrot.lane.b32.xlu1 %v807_v28, %s2509_s25 }
 0x3be   : > { %1007 = vrot.lane.b32.xlu0 %v808_v27, %s2509_s25 }
 0x435   : > { %v875_v56 = vpop.xlane.xlu0 %874 }
 0x436   : > { %2450 = vrcp.f32 %v875_v56  ;;  %v1000_v56 = vrot.slane %v804_v55, %v2708_v47  ;;  %v1230_v55 = vld [vmem:[%s3090_s8] sm:$0x1] }
 0x437   : > { %v878_v57 = vpop.xlane.xlu1 %877 }
 0x438   : > { %2452 = vrcp.f32 %v878_v57 }
 0x439   : > { %v1008_v62 = vpop.permute.xlu0 %1007 }
 0x43a   : > { %v1013_v4 = vsel %vm812_vm1, %v1008_v62, 0 }
 0x43b   : > { %v1005_v6 = vpop.permute.xlu1 %1004 }
 0x440   : > { %v2451_v58 = vpop.eup %2450 }
 0x441   : > { %v881_v60 = vmul.f32 %v2451_v58, %v2447_v49 }
 0x442   : > { %v2453_v59 = vpop.eup %2452 }
 0x443   : > { %v882_v61 = vmul.f32 %v2453_v59, %v2449_v51 }
 0x445   : > { %v883_v3 = vpack.c.bf16 %v882_v61, %v881_v60 }
 0x447   : > { %2271 = vmatmul.mubr.msk.bf16.vlgmr.msra.gmra.mrb[8].mxu1 %vm860_vm2, %v883_v3 }
 0x448   : > { %2287 = vmatpush3.bf16.xpose.msra.mxu1 %v1013_v4  ;;  %2288 = vmatprep.mubr.msk.bf16.mxu1 %vm2508_vm0, %v2506_v5 }
 0x449   : > { %2292 = vmatprep.subr.bf16.mxu1 %v2506_v5 }
 0x44f   : > { %2289 = vmatmul.mubr.msk.bf16.vlgmr.msra.gmra.mrb[12].mxu1 %vm812_vm1, %v1005_v6 }
 0x450   : > { %2294 = vmatprep.mubr.msk.bf16.mxu1 %vm2508_vm0, %v2506_v5 }
 0x51a   : > { %v921_v8 = vpop.f32.mrb[8].mxu1 }
 0x51b   : > { %v2272_v9 = vpop.f32.mrb[9].mxu1 }
 0x51c   : > { %v924_v10 = vpop.f32.mrb[10].mxu1  ;;  %v2367_v9 = vld [vmem:[%s3091_s9 + $0xc] ss:$16 sps:$4 sm:$0xff]  }
 0x51d   : > { %v928_v11 = vpack.c.bf16 %v924_v10, %v921_v8  ;;  %v2273_v12 = vpop.f32.mrb[11].mxu1  ;;  %v2364_v8 = vld [vmem:[%s3091_s9 + $0x4] ss:$16 sps:$4 sm:$0xff]   ;;  %v2373_v10 = vld [vmem:[%s3091_s9 + $0x2c] ss:$16 sps:$4 sm:$0xff]  }
 0x51e   : > { %v2371_v12 = vld [vmem:[%s3091_s9 + $0x28] ss:$16 sps:$4 sm:$0xff]  }
 0x51f   : > { %2283 = vmatmul.mubr.msk.bf16.vlgmr.msra.gmra.mrb[4].mxu0 %vm812_vm1, %v928_v11  ;;  %v2368_v11 = vld [vmem:[%s3091_s9 + $0x20] ss:$16 sps:$4 sm:$0xff]  }
 0x520   : > { %2306 = vmatprep.mubr.msk.bf16.mxu0 %vm2508_vm0, %v2506_v5 }
 0x522   : > { %v1049_v13 = vpop.f32.mrb[12].mxu1 }
 0x523   : > { %v1050_v14 = vadd.f32 %v1049_v13, %v2746_v30  ;;  %v2290_v15 = vpop.f32.mrb[13].mxu1 }
 0x524   : > { %v1052_v16 = vpop.f32.mrb[14].mxu1 }
 0x525   : > { %v1053_v17 = vadd.f32 %v1052_v16, %v2751_v33  ;;  %v2291_v18 = vpop.f32.mrb[15].mxu1  ;;  %v1056_v19 = vsel %vm860_vm2, %v1050_v14, -inf  ;;  %v2358_v33 = vld [vmem:[%s3087_s5 + $0x20] sm:$0xff]  }
 0x526   : > { %1057 = vmax.xlane.f32.xlu1 %v1056_v19  ;;  %2299 = vmatpush3.bf16.msra.mxu0 %v2358_v33  ;;  %v2386_v33 = vld [vmem:[%s3091_s9 + $0x80] ss:$16 sps:$4 sm:$0xff]  }
 0x527   : > { %v1059_v20 = vsel %vm860_vm2, %v1053_v17, -inf  ;;  %2300 = vmatprep.subr.bf16.mxu0 %v2506_v5 }
 0x528   : > { %1060 = vmax.xlane.f32.xlu0 %v1059_v20 }
 0x52a   : > { %2301 = vmatpush3.bf16.msra.mxu0 %v2359_v34  ;;  %v2389_v34 = vld [vmem:[%s3091_s9 + $0x88] ss:$16 sps:$4 sm:$0xff]  }
 0x52b   : > { %2302 = vmatprep.subr.bf16.mxu0 %v2506_v5 }
 0x52e   : > { %2303 = vmatpush3.bf16.msra.mxu0 %v2360_v35  ;;  %v2394_v35 = vld [vmem:[%s3091_s9 + $0xa4] ss:$16 sps:$4 sm:$0xff]  }
 0x52f   : > { %2304 = vmatprep.subr.bf16.mxu0 %v2506_v5  ;;  %v2361_v5 = vld [vmem:[%s3087_s5 + $0x38] sm:$0xff]  }
 0x532   : > { %2305 = vmatpush3.bf16.msra.mxu0 %v2361_v5 }
 0x533   : > { %1513 = vmatprep.subr.bf16.mxu0 %v2367_v9  ;;  %v2410_v9 = vld [vmem:[%s3093_s11 + $0x40] sm:$0xff]  }
 0x5b3   : > { %v1058_v21 = vpop.xlane.xlu1 %1057 }
 0x5b4   : > { %v1062_v22 = vsub.f32 %v1050_v14, %v1058_v21  ;;  %v2376_v21 = vld [vmem:[%s3091_s9 + $0x44] ss:$16 sps:$4 sm:$0xff]  }
 0x5b5   : > { %v1061_v23 = vpop.xlane.xlu0 %1060 }
 0x5b6   : > { %v1064_v24 = vmul.f32 1.442695, %v1062_v22  ;;  %v1063_v25 = vsub.f32 %v1053_v17, %v1061_v23  ;;  %v2379_v22 = vld [vmem:[%s3091_s9 + $0x4c] ss:$16 sps:$4 sm:$0xff]   ;;  %v2374_v23 = vld [vmem:[%s3091_s9 + $0x40] ss:$16 sps:$4 sm:$0xff]  }
 0x5b8   : > { %2454 = vpow2.f32 %v1064_v24  ;;  %v1066_v27 = vmul.f32 1.442695, %v1063_v25  ;;  %v2377_v24 = vld [vmem:[%s3091_s9 + $0x48] ss:$16 sps:$4 sm:$0xff]   ;;  %v2382_v25 = vld [vmem:[%s3091_s9 + $0x64] ss:$16 sps:$4 sm:$0xff]  }
 0x5ba   : > { %2456 = vpow2.f32 %v1066_v27  ;;  %v2385_v27 = vld [vmem:[%s3091_s9 + $0x6c] ss:$16 sps:$4 sm:$0xff]  }
 0x5c2   : > { %v2455_v28 = vpop.eup %2454 }
 0x5c3   : > { %v1068_v29 = vsel %vm860_vm2, %v2455_v28, 0.0 }
 0x5c4   : > { %v2457_v30 = vpop.eup %2456  ;;  %1069 = vadd.xlane.f32.xlu0 %v1068_v29  ;;  %v2383_v29 = vld [vmem:[%s3091_s9 + $0x68] ss:$16 sps:$4 sm:$0xff]  }
 0x5c5   : > { %v1071_v32 = vsel %vm860_vm2, %v2457_v30, 0.0 }
 0x5c6   : > { %1072 = vadd.xlane.f32.xlu1 %v1071_v32  ;;  %v2391_v32 = vld [vmem:[%s3091_s9 + $0x8c] ss:$16 sps:$4 sm:$0xff]  }
 0x5da   : > { %1080 = vrot.lane.b32.xlu0 %v2734_v26, %s2509_s25 }
 0x5f2   : > { %v990_v26 = vpop.f32.mrb[4].mxu0 }
 0x5f3   : > { %v2284_v36 = vpop.f32.mrb[5].mxu0  ;;  %v1001_v57 = vadd.f32 %v1000_v56, %v990_v26  ;;  %v2397_v26 = vld [vmem:[%s3091_s9 + $0xac] ss:$16 sps:$4 sm:$0xff]  }
 0x5f4   : > { %v993_v37 = vpop.f32.mrb[6].mxu0  ;;  %v2392_v36 = vld [vmem:[%s3091_s9 + $0xa0] ss:$16 sps:$4 sm:$0xff]  }
 0x5f5   : > { %v2285_v38 = vpop.f32.mrb[7].mxu0  ;;  %v1002_v59 = vadd.f32 %v1000_v56, %v993_v37  ;;  %v2395_v37 = vld [vmem:[%s3091_s9 + $0xa8] ss:$16 sps:$4 sm:$0xff]  }
 0x5f6   : > { %v2400_v38 = vld [vmem:[%s3091_s9 + $0xc4] ss:$16 sps:$4 sm:$0xff]  }
 0x651   : > { %v1070_v39 = vpop.xlane.xlu0 %1069 }
 0x652   : > { %2458 = vrcp.f32 %v1070_v39  ;;  %v2403_v39 = vld [vmem:[%s3091_s9 + $0xcc] ss:$16 sps:$4 sm:$0xff]  }
 0x653   : > { %v1073_v40 = vpop.xlane.xlu1 %1072 }
 0x654   : > { %2460 = vrcp.f32 %v1073_v40  ;;  %v2398_v40 = vld [vmem:[%s3091_s9 + $0xc0] ss:$16 sps:$4 sm:$0xff]  }
 0x655   : > { %v1081_v41 = vpop.permute.xlu0 %1080 }
 0x656   : > { %2293 = vmatpush3.bf16.msra.mxu1 %v1081_v41  ;;  %v2401_v41 = vld [vmem:[%s3091_s9 + $0xc8] ss:$16 sps:$4 sm:$0xff]  }
 0x657   : > { %1470 = vmatprep.subr.bf16.mxu1 %v2364_v8 }
 0x65c   : > { %v2459_v42 = vpop.eup %2458 }
 0x65d   : > { %v1076_v45 = vmul.f32 %v2459_v42, %v2455_v28  ;;  %v2380_v28 = vld [vmem:[%s3091_s9 + $0x60] ss:$16 sps:$4 sm:$0xff]   ;;  %v2406_v42 = vld [vmem:[%s3091_s9 + $0xe4] ss:$16 sps:$4 sm:$0xff]  }
 0x65e   : > { %v2461_v43 = vpop.eup %2460 }
 0x65f   : > { %v1077_v46 = vmul.f32 %v2461_v43, %v2457_v30  ;;  %v2388_v30 = vld [vmem:[%s3091_s9 + $0x84] ss:$16 sps:$4 sm:$0xff]   ;;  %v2409_v43 = vld [vmem:[%s3091_s9 + $0xec] ss:$16 sps:$4 sm:$0xff]  }
 0x661   : > { %v1078_v48 = vpack.c.bf16 %v1077_v46, %v1076_v45  ;;  %v2404_v45 = vld [vmem:[%s3091_s9 + $0xe0] ss:$16 sps:$4 sm:$0xff]   ;;  %v2407_v46 = vld [vmem:[%s3091_s9 + $0xe8] ss:$16 sps:$4 sm:$0xff]  }
 0x663   : > { %2295 = vmatmul.mubr.msk.bf16.vlgmr.msra.gmra.mrb[16].mxu1 %vm860_vm2, %v1078_v48 }
 0x664   : > { %1502 = vmatprep.mubr.bf16.mxu1 %v2507_v31  ;;  %1471 = vmatpush1.bf16.msra.mxu1 %v2362_v7 }
 0x736   : > { %v1120_v49 = vpop.f32.mrb[16].mxu1 }
 0x737   : > { %v2296_v50 = vpop.f32.mrb[17].mxu1 }
 0x738   : > { %v1123_v51 = vpop.f32.mrb[18].mxu1 }
 0x739   : > { %v1127_v52 = vpack.c.bf16 %v1123_v51, %v1120_v49  ;;  %v2297_v53 = vpop.f32.mrb[19].mxu1 }
 0x73a   : > { %v1222_v53 = vld [vmem:[%s3089_s7] sm:$0x1] }
 0x73b   : > { %2307 = vmatmul.mubr.msk.bf16.vlgmr.msra.gmra.mrb[8].mxu0 %vm812_vm1, %v1127_v52  ;;  %v1223_v54 = vunpack.c.l.bf16 %v1222_v53 }
 0x73c   : > { %1545 = vmatprep.mubr.bf16.mxu0 %v2507_v31 }
 0x80e   : > { %v1189_v58 = vpop.f32.mrb[8].mxu0 }
 0x80f   : > { %v1196_v60 = vadd.f32 %v1189_v58, %v1001_v57  ;;  %v2308_v61 = vpop.f32.mrb[9].mxu0  ;;  %v1227_v58 = vrot.slane %v1223_v54, %v2708_v47 }
 0x810   : > { %v1192_v62 = vpop.f32.mrb[10].mxu0 }
 0x811   : > { %v2820_v3 = vadd.f32 %v2601_v1, %v1196_v60  ;;  %v1197_v4 = vadd.f32 %v1192_v62, %v1002_v59  ;;  %v2309_v6 = vpop.f32.mrb[11].mxu0  ;;  %v2365_v1 = vld [vmem:[%s3091_s9 + $0x8] ss:$16 sps:$4 sm:$0xff]   ;;  %v1231_v59 = vunpack.c.l.bf16 %v1230_v55 }
 0x812   : > { %1514 = vmatpush1.bf16.msra.mxu0 %v2365_v1 }
 0x813   : > { %1200 = vadd.xlane.f32.xlu1 %v2820_v3  ;;  %v2824_v31 = vadd.f32 %v2604_v2, %v1197_v4  ;;  %v2370_v2 = vld [vmem:[%s3091_s9 + $0x24] ss:$16 sps:$4 sm:$0xff]   ;;  %1515 = vmatprep.subr.bf16.mxu0 %v2373_v10  ;;  %v1235_v4 = vrot.slane %v1231_v59, %v2708_v47 }
 0x814   : > { %1472 = vmatprep.subr.bf16.mxu1 %v2370_v2  ;;  %v2411_v2 = vld [vmem:[%s3093_s11 + $0xc0] sm:$0xff]  }
 0x815   : > { %1473 = vmatpush1.bf16.msra.mxu1 %v2368_v11  ;;  %v2412_v10 = vld [vmem:[%s3093_s11] sm:$0xff]  }
 0x816   : > { %1516 = vmatpush1.bf16.msra.mxu0 %v2371_v12  ;;  %1474 = vmatprep.subr.bf16.mxu1 %v2376_v21  ;;  %v2413_v11 = vld [vmem:[%s3093_s11 + $0x80] sm:$0xff]   ;;  %v2414_v12 = vld [vmem:[%s3093_s11 + $0x48] sm:$0xff]   ;;  %v2423_v21 = vld [vmem:[%s3093_s11 + $0xd8] sm:$0xff]  }
 0x817   : > { %1202 = vadd.xlane.f32.xlu1 %v2824_v31  ;;  %1517 = vmatprep.subr.bf16.mxu0 %v2379_v22  ;;  %v2424_v22 = vld [vmem:[%s3093_s11 + $0x18] sm:$0xff]  }
 0x819   : > { %1475 = vmatpush1.bf16.msra.mxu1 %v2374_v23  ;;  %v2425_v23 = vld [vmem:[%s3093_s11 + $0x98] sm:$0xff]  }
 0x81a   : > { %1518 = vmatpush1.bf16.msra.mxu0 %v2377_v24  ;;  %1476 = vmatprep.subr.bf16.mxu1 %v2382_v25  ;;  %v2426_v24 = vld [vmem:[%s3093_s11 + $0x60] sm:$0xff]  }
 0x81b   : > { %1519 = vmatprep.subr.bf16.mxu0 %v2385_v27  ;;  %v2427_v25 = vld [vmem:[%s3093_s11 + $0xe0] sm:$0xff]  }
 0x81c   : > { %v2428_v27 = vld [vmem:[%s3093_s11 + $0x20] sm:$0xff]  }
 0x81d   : > { %1477 = vmatpush1.bf16.msra.mxu1 %v2380_v28  ;;  %v2429_v28 = vld [vmem:[%s3093_s11 + $0xa0] sm:$0xff]  }
 0x81e   : > { %1520 = vmatpush1.bf16.msra.mxu0 %v2383_v29  ;;  %1478 = vmatprep.subr.bf16.mxu1 %v2388_v30  ;;  %v2430_v29 = vld [vmem:[%s3093_s11 + $0x68] sm:$0xff]  }
 0x81f   : > { %1521 = vmatprep.subr.bf16.mxu0 %v2391_v32  ;;  %v2431_v30 = vld [vmem:[%s3093_s11 + $0xe8] sm:$0xff]  }
 0x820   : > { %v2432_v32 = vld [vmem:[%s3093_s11 + $0x28] sm:$0xff]  }
 0x821   : > { %1479 = vmatpush1.bf16.msra.mxu1 %v2386_v33  ;;  %v2433_v33 = vld [vmem:[%s3093_s11 + $0xa8] sm:$0xff]  }
 0x822   : > { %1522 = vmatpush1.bf16.msra.mxu0 %v2389_v34  ;;  %1480 = vmatprep.subr.bf16.mxu1 %v2394_v35  ;;  %v2434_v34 = vld [vmem:[%s3093_s11 + $0x70] sm:$0xff]  }
 0x823   : > { %1523 = vmatprep.subr.bf16.mxu0 %v2397_v26  ;;  %v2435_v35 = vld [vmem:[%s3093_s11 + $0xf0] sm:$0xff]  }
 0x824   : > { %v2436_v26 = vld [vmem:[%s3093_s11 + $0x30] sm:$0xff]  }
 0x825   : > { %1481 = vmatpush1.bf16.msra.mxu1 %v2392_v36  ;;  %v2437_v36 = vld [vmem:[%s3093_s11 + $0xb0] sm:$0xff]  }
 0x826   : > { %1524 = vmatpush1.bf16.msra.mxu0 %v2395_v37  ;;  %1482 = vmatprep.subr.bf16.mxu1 %v2400_v38  ;;  %v2438_v37 = vld [vmem:[%s3093_s11 + $0x78] sm:$0xff]  }
 0x827   : > { %1525 = vmatprep.subr.bf16.mxu0 %v2403_v39  ;;  %v2439_v38 = vld [vmem:[%s3093_s11 + $0xf8] sm:$0xff]  }
 0x828   : > { %v2440_v39 = vld [vmem:[%s3093_s11 + $0x38] sm:$0xff]  }
 0x829   : > { %1483 = vmatpush1.bf16.msra.mxu1 %v2398_v40  ;;  %v2441_v40 = vld [vmem:[%s3093_s11 + $0xb8] sm:$0xff]  }
 0x82a   : > { %1526 = vmatpush1.bf16.msra.mxu0 %v2401_v41  ;;  %1484 = vmatprep.subr.bf16.mxu1 %v2406_v42  ;;  %v1271_v41 = vld [vmem:[%s3092_s10] sm:$0xf] }
 0x82b   : > { %1527 = vmatprep.subr.bf16.mxu0 %v2409_v43  ;;  %v1272_v42 = vunpack.c.l.bf16 %v1271_v41  ;;  %v1288_v43 = vsub.s32 6, %v2702_v44 }
 0x82d   : > { %1485 = vmatpush1.bf16.msra.mxu1 %v2404_v45  ;;  %v1277_v45 = vrot.slane %v1272_v42, %v2708_v47 }
 0x82e   : > { %1528 = vmatpush1.bf16.msra.mxu0 %v2407_v46  ;;  %2198 = vmatprep.subr.bf16.mxu1 %v2410_v9  ;;  %v1285_v46 = vrot.slane %v1272_v42, %v558_v63 }
 0x82f   : > { %2220 = vmatprep.subr.bf16.mxu0 %v2411_v2 }
 0x8a0   : > { %v1201_v13 = vpop.xlane.xlu1 %1200 }
 0x8a1   : > { %v1204_v14 = vmul.f32 0.0078125, %v1201_v13  ;;  %v2415_v13 = vld [vmem:[%s3093_s11 + $0xc8] sm:$0xff]  }
 0x8a3   : > { %v2852_v15 = vsub.f32 %v2820_v3, %v1204_v14  ;;  %v2416_v14 = vld [vmem:[%s3093_s11 + $0x8] sm:$0xff]  }
 0x8a4   : > { %v1203_v16 = vpop.xlane.xlu1 %1202 }
 0x8a5   : > { %v1205_v17 = vmul.f32 0.0078125, %v1203_v16  ;;  %v1208_v18 = vmul.f32 %v2852_v15, %v2852_v15  ;;  %v2418_v16 = vld [vmem:[%s3093_s11 + $0x50] sm:$0xff]  }
 0x8a7   : > { %v2857_v19 = vsub.f32 %v2824_v31, %v1205_v17  ;;  %1210 = vadd.xlane.f32.xlu1 %v1208_v18  ;;  %v2419_v17 = vld [vmem:[%s3093_s11 + $0xd0] sm:$0xff]  }
 0x8a8   : > { %v2420_v18 = vld [vmem:[%s3093_s11 + $0x10] sm:$0xff]  }
 0x8a9   : > { %v1209_v20 = vmul.f32 %v2857_v19, %v2857_v19 }
 0x8ab   : > { %1212 = vadd.xlane.f32.xlu1 %v1209_v20  ;;  %v2422_v20 = vld [vmem:[%s3093_s11 + $0x58] sm:$0xff]  }
 0x934   : > { %v1211_v48 = vpop.xlane.xlu1 %1210 }
 0x935   : > { %v1214_v5 = vmul.f32 0.0078125, %v1211_v48  ;;  %v1281_v48 = vrot.slane %v1272_v42, %v554_v0 }
 0x937   : > { %v1216_v49 = vadd.f32 1e-05, %v1214_v5  ;;  %v1289_v5 = vrot.slane %v1272_v42, %v1288_v43 }
 0x938   : > { %v1213_v50 = vpop.xlane.xlu1 %1212 }
 0x939   : > { %2462 = vrsqrt.f32 %v1216_v49  ;;  %v1215_v51 = vmul.f32 0.0078125, %v1213_v50  ;;  %v1297_v49 = vrot.slane %v1277_v45, %v2708_v47  ;;  %v1305_v50 = vrot.slane %v1285_v46, %v2708_v47 }
 0x93b   : > { %v1217_v52 = vadd.f32 1e-05, %v1215_v51  ;;  %v1301_v51 = vrot.slane %v1281_v48, %v2708_v47 }
 0x93d   : > { %2464 = vrsqrt.f32 %v1217_v52  ;;  %v1309_v52 = vrot.slane %v1289_v5, %v2708_v47 }
 0x943   : > { %v2463_v56 = vpop.eup %2462 }
 0x944   : > { %v1220_v57 = vmul.f32 %v2463_v56, %v2852_v15  ;;  %v2417_v15 = vld [vmem:[%s3093_s11 + $0x88] sm:$0xff]  }
 0x946   : > { %v1228_v62 = vmul.f32 %v1227_v58, %v1220_v57 }
 0x947   : > { %v2465_v60 = vpop.eup %2464 }
 0x948   : > { %v1221_v61 = vmul.f32 %v2465_v60, %v2857_v19  ;;  %v1236_v7 = vadd.f32 %v1235_v4, %v1228_v62  ;;  %v2421_v19 = vld [vmem:[%s3093_s11 + $0x90] sm:$0xff]  }
 0x94a   : > { %v1229_v6 = vmul.f32 %v1227_v58, %v1221_v61 }
 0x94c   : > { %v1237_v8 = vadd.f32 %v1235_v4, %v1229_v6 }
 0x94e   : > { %v1238_v1 = vpack.c.bf16 %v1237_v8, %v1236_v7 }
 0x950   : > { %1503 = vmatmul.mubr.bf16.vlgmr.msra.gmra.mrb[20].mxu1 %v1238_v1  ;;  %1546 = vmatmul.mubr.bf16.vlgmr.msra.gmra.mrb[12].mxu0 %v1238_v1 }
 0x951   : > { %2199 = vmatpush3.bf16.msra.mxu1 %v2412_v10  ;;  %2221 = vmatpush3.bf16.msra.mxu0 %v2413_v11 }
 0x952   : > { %2200 = vmatprep.subr.bf16.mxu1 %v2414_v12  ;;  %2222 = vmatprep.subr.bf16.mxu0 %v2415_v13 }
 0x955   : > { %2201 = vmatpush3.bf16.msra.mxu1 %v2416_v14  ;;  %2223 = vmatpush3.bf16.msra.mxu0 %v2417_v15 }
 0x956   : > { %2202 = vmatprep.subr.bf16.mxu1 %v2418_v16  ;;  %2224 = vmatprep.subr.bf16.mxu0 %v2419_v17 }
 0x959   : > { %2203 = vmatpush3.bf16.msra.mxu1 %v2420_v18  ;;  %2225 = vmatpush3.bf16.msra.mxu0 %v2421_v19 }
 0x95a   : > { %2204 = vmatprep.subr.bf16.mxu1 %v2422_v20  ;;  %2226 = vmatprep.subr.bf16.mxu0 %v2423_v21 }
 0x95d   : > { %2205 = vmatpush3.bf16.msra.mxu1 %v2424_v22  ;;  %2227 = vmatpush3.bf16.msra.mxu0 %v2425_v23 }
 0x95e   : > { %2206 = vmatprep.subr.bf16.mxu1 %v2426_v24  ;;  %2228 = vmatprep.subr.bf16.mxu0 %v2427_v25 }
 0x961   : > { %2207 = vmatpush3.bf16.msra.mxu1 %v2428_v27  ;;  %2229 = vmatpush3.bf16.msra.mxu0 %v2429_v28 }
 0x962   : > { %2208 = vmatprep.subr.bf16.mxu1 %v2430_v29  ;;  %2230 = vmatprep.subr.bf16.mxu0 %v2431_v30 }
 0x965   : > { %2209 = vmatpush3.bf16.msra.mxu1 %v2432_v32  ;;  %2231 = vmatpush3.bf16.msra.mxu0 %v2433_v33 }
 0x966   : > { %2210 = vmatprep.subr.bf16.mxu1 %v2434_v34  ;;  %2232 = vmatprep.subr.bf16.mxu0 %v2435_v35 }
 0x969   : > { %2211 = vmatpush3.bf16.msra.mxu1 %v2436_v26  ;;  %2233 = vmatpush3.bf16.msra.mxu0 %v2437_v36 }
 0x96a   : > { %2212 = vmatprep.subr.bf16.mxu1 %v2438_v37  ;;  %2234 = vmatprep.subr.bf16.mxu0 %v2439_v38 }
 0x96d   : > { %2213 = vmatpush3.bf16.msra.mxu1 %v2440_v39  ;;  %2235 = vmatpush3.bf16.msra.mxu0 %v2441_v40 }
 0xa23   : > { %v1504_v53 = vpop.f32.mrb[20].mxu1  ;;  %v1547_v54 = vpop.f32.mrb[12].mxu0 }
 0xa24   : > { %v3052_v55 = vadd.f32 %v1504_v53, %v1297_v49  ;;  %v3054_v56 = vadd.f32 %v1547_v54, %v1305_v50  ;;  %v1506_v57 = vpop.f32.mrb[21].mxu1  ;;  %v1549_v63 = vpop.f32.mrb[13].mxu0 }
 0xa25   : > { %v3056_v58 = vadd.f32 %v1506_v57, %v1301_v51  ;;  %v3058_v44 = vadd.f32 %v1549_v63, %v1309_v52  ;;  %v1508_v0 = vpop.f32.mrb[22].mxu1  ;;  %v1551_v59 = vpop.f32.mrb[14].mxu0 }
 0xa26   : > { %v2114_v60 = vmul.f32 -1.702, %v3052_v55  ;;  %v2116_v61 = vmul.f32 -1.702, %v3054_v56  ;;  %v1509_v62 = vadd.f32 %v1508_v0, %v1297_v49  ;;  %v1552_v4 = vadd.f32 %v1551_v59, %v1305_v50  ;;  %v1510_v6 = vpop.f32.mrb[23].mxu1  ;;  %v1553_v7 = vpop.f32.mrb[15].mxu0 }
 0xa27   : > { %v2115_v8 = vmul.f32 -1.702, %v3056_v58  ;;  %v2117_v1 = vmul.f32 -1.702, %v3058_v44  ;;  %v1511_v9 = vadd.f32 %v1510_v6, %v1301_v51  ;;  %v1554_v2 = vadd.f32 %v1553_v7, %v1309_v52 }
 0xa28   : > { %v1572_v10 = vmul.f32 1.442695, %v2114_v60  ;;  %v1576_v11 = vmul.f32 1.442695, %v2116_v61  ;;  %v2118_v12 = vmul.f32 -1.702, %v1509_v62 }
 0xa29   : > { %v1574_v13 = vmul.f32 1.442695, %v2115_v8  ;;  %v1578_v14 = vmul.f32 1.442695, %v2117_v1  ;;  %v2120_v15 = vmul.f32 -1.702, %v1552_v4 }
 0xa2a   : > { %2466 = vpow2.f32 %v1572_v10  ;;  %v1580_v16 = vmul.f32 1.442695, %v2118_v12  ;;  %v2119_v17 = vmul.f32 -1.702, %v1511_v9  ;;  %v2121_v18 = vmul.f32 -1.702, %v1554_v2 }
 0xa2b   : > { %2468 = vpow2.f32 %v1576_v11  ;;  %v1584_v19 = vmul.f32 1.442695, %v2120_v15 }
 0xa2c   : > { %2470 = vpow2.f32 %v1574_v13  ;;  %v1582_v20 = vmul.f32 1.442695, %v2119_v17  ;;  %v1586_v21 = vmul.f32 1.442695, %v2121_v18 }
 0xa2d   : > { %2472 = vpow2.f32 %v1578_v14 }
 0xa2e   : > { %2474 = vpow2.f32 %v1580_v16 }
 0xa2f   : > { %2476 = vpow2.f32 %v1584_v19 }
 0xa30   : > { %2478 = vpow2.f32 %v1582_v20 }
 0xa31   : > { %2480 = vpow2.f32 %v1586_v21 }
 0xa34   : > { %v2467_v22 = vpop.eup %2466 }
 0xa35   : > { %v2469_v23 = vpop.eup %2468  ;;  %v1588_v24 = vadd.f32 1.0, %v2467_v22 }
 0xa36   : > { %v2471_v25 = vpop.eup %2470  ;;  %v1590_v27 = vadd.f32 1.0, %v2469_v23 }
 0xa37   : > { %v2473_v28 = vpop.eup %2472  ;;  %2482 = vrcp.f32 %v1588_v24  ;;  %v1589_v29 = vadd.f32 1.0, %v2471_v25 }
 0xa38   : > { %v2475_v30 = vpop.eup %2474  ;;  %2484 = vrcp.f32 %v1590_v27  ;;  %v1591_v32 = vadd.f32 1.0, %v2473_v28 }
 0xa39   : > { %v2477_v33 = vpop.eup %2476  ;;  %2486 = vrcp.f32 %v1589_v29  ;;  %v1592_v34 = vadd.f32 1.0, %v2475_v30 }
 0xa3a   : > { %v2479_v35 = vpop.eup %2478  ;;  %2488 = vrcp.f32 %v1591_v32  ;;  %v1594_v26 = vadd.f32 1.0, %v2477_v33 }
 0xa3b   : > { %v2481_v36 = vpop.eup %2480  ;;  %2490 = vrcp.f32 %v1592_v34  ;;  %v1593_v37 = vadd.f32 1.0, %v2479_v35 }
 0xa3c   : > { %2492 = vrcp.f32 %v1594_v26  ;;  %v1595_v38 = vadd.f32 1.0, %v2481_v36 }
 0xa3d   : > { %2494 = vrcp.f32 %v1593_v37 }
 0xa3e   : > { %2496 = vrcp.f32 %v1595_v38 }
 0xa41   : > { %v2483_v39 = vpop.eup %2482 }
 0xa42   : > { %v2485_v40 = vpop.eup %2484  ;;  %v1612_v46 = vmul.f32 %v2483_v39, %v3052_v55  ;;  %v1688_v55 = vld [vmem:[%s3094_s12] sm:$0x1] }
 0xa43   : > { %v2487_v41 = vpop.eup %2486  ;;  %v1614_v49 = vmul.f32 %v2485_v40, %v3054_v56  ;;  %v1689_v56 = vunpack.c.l.bf16 %v1688_v55 }
 0xa44   : > { %v2489_v42 = vpop.eup %2488  ;;  %v1613_v52 = vmul.f32 %v2487_v41, %v3056_v58 }
 0xa45   : > { %v2491_v43 = vpop.eup %2490  ;;  %v1615_v57 = vmul.f32 %v2489_v42, %v3058_v44  ;;  %v1693_v58 = vrot.slane %v1689_v56, %v2708_v47 }
 0xa46   : > { %v2493_v45 = vpop.eup %2492  ;;  %v1616_v48 = vmul.f32 %v2491_v43, %v1509_v62 }
 0xa47   : > { %v2495_v5 = vpop.eup %2494  ;;  %v1618_v50 = vmul.f32 %v2493_v45, %v1552_v4 }
 0xa48   : > { %v2497_v51 = vpop.eup %2496  ;;  %v1620_v53 = vpack.c.bf16 %v1616_v48, %v1612_v46  ;;  %v1617_v54 = vmul.f32 %v2495_v5, %v1511_v9 }
 0xa49   : > { %v1622_v63 = vpack.c.bf16 %v1618_v50, %v1614_v49  ;;  %v1619_v0 = vmul.f32 %v2497_v51, %v1554_v2 }
 0xa4a   : > { %v1621_v59 = vpack.c.bf16 %v1617_v54, %v1613_v52 }
 0xa4b   : > { %v1623_v60 = vpack.c.bf16 %v1619_v0, %v1615_v57 }
 0xa4c   : > { %1918 = vmatprep.mubr.bf16.mxu1 %v1621_v59 }
 0xa4d   : > { %1959 = vmatprep.mubr.bf16.mxu0 %v1623_v60  ;;  %1919 = vmatmul.mubr.bf16.vlgmr.msra.gmra.mrb[24].mxu1 %v1620_v53 }
 0xa4e   : > { %1960 = vmatmul.mubr.bf16.vlgmr.msra.gmra.mrb[16].mxu0 %v1622_v63 }
 0xb20   : > { %v2214_v61 = vpop.f32.mrb[24].mxu1 }
 0xb21   : > { %v2236_v62 = vpop.f32.mrb[16].mxu0  ;;  %v2215_v4 = vpop.f32.mrb[25].mxu1 }
 0xb22   : > { %v2216_v44 = vadd.f32 %v2215_v4, %v2214_v61  ;;  %v2237_v6 = vpop.f32.mrb[17].mxu0  ;;  %v2217_v7 = vpop.f32.mrb[26].mxu1 }
 0xb23   : > { %v2238_v8 = vadd.f32 %v2237_v6, %v2236_v62  ;;  %v2239_v1 = vpop.f32.mrb[18].mxu0  ;;  %v2218_v9 = vpop.f32.mrb[27].mxu1 }
 0xb24   : > { %v1921_v2 = vadd.f32 %v2216_v44, %v1693_v58  ;;  %v2219_v10 = vadd.f32 %v2218_v9, %v2217_v7  ;;  %v2240_v11 = vpop.f32.mrb[19].mxu0 }
 0xb25   : > { %v2241_v12 = vadd.f32 %v2240_v11, %v2239_v1 }
 0xb26   : > { %v1962_v13 = vadd.f32 %v2238_v8, %v1921_v2  ;;  %v1924_v14 = vadd.f32 %v2219_v10, %v1693_v58 }
 0xb28   : > { %v1965_v15 = vadd.f32 %v2241_v12, %v1924_v14  ;;  %v1968_v16 = vadd.f32 %v1962_v13, %v2820_v3 }
 0xb2a   : > { %v1969_v47 = vadd.f32 %v1965_v15, %v2824_v31 }
 0xb2c   : > { %v2169_v17 = vpack.c.bf16 %v1969_v47, %v1968_v16 }
 0xb2e   : > { %2170 = vst [vmem:[%s467_s27] sm:$0xff] %v2169_v17  }
 0xb2f PF: > { %s24_s29 = sadd.s32 1, %s2504_s29  }
 0xb30   : > { %p21_p4 = scmp.ge.s32.totalorder %s24_s29, 6  }
 0xb32   :  { %23 = sbr.rel (!%p21_p4) target bundleno = 1 (0x1), region = 106 }

// kernel: _lambda_.13
= control target key start
LH: loop header
LB: loop body
LE: loop exit
PB: predicated region body
PF: predicated region fallthrough
CT: control target
= control target key end

     0   :  { %19 = vsyncpa [#allocation3], 0  ;;  %s3141_s0 = inlined_call_operand.vmem [shape: bf16[4,16,128], index: 0, kind: input, shape index: {}]   ;;  %s3142_s1 = inlined_call_operand.vmem [shape: bf16[1,128], index: 1, kind: input, shape index: {}]   ;;  %s3143_s2 = inlined_call_operand.vmem [shape: bf16[1,128], index: 2, kind: input, shape index: {}]   ;;  %s3144_s3 = inlined_call_operand.hbm [shape: bf16[128,384], index: 3, kind: input, shape index: {}]   ;;  %s3145_s4 = inlined_call_operand.vmem [shape: bf16[1,384], index: 4, kind: input, shape index: {}]   ;;  %s3146_s5 = inlined_call_operand.vmem [shape: bf16[128,128], index: 5, kind: input, shape index: {}]   ;;  %s3147_s6 = inlined_call_operand.vmem [shape: bf16[1,128], index: 6, kind: input, shape index: {}]   ;;  %s3148_s7 = inlined_call_operand.vmem [shape: bf16[1,128], index: 7, kind: input, shape index: {}]   ;;  %s3149_s8 = inlined_call_operand.vmem [shape: bf16[1,128], index: 8, kind: input, shape index: {}]   ;;  %s3150_s9 = inlined_call_operand.vmem [shape: bf16[128,512], index: 9, kind: input, shape index: {}]   ;;  %s3151_s10 = inlined_call_operand.vmem [shape: bf16[1,512], index: 10, kind: input, shape index: {}]   ;;  %s3152_s11 = inlined_call_operand.hbm [shape: bf16[512,128], index: 11, kind: input, shape index: {}]   ;;  %s3153_s12 = inlined_call_operand.vmem [shape: bf16[1,128], index: 12, kind: input, shape index: {}]   ;;  %s3154_s13 = inlined_call_operand.vmem [shape: f32[16,16], index: 13, kind: input, shape index: {}]   ;;  %s3155_s14 = inlined_call_operand.vmem [shape: bf16[4,16,128], index: 14, kind: output, shape index: {}]  }
   0x1   :  { %20 = vsyncpa [#allocation5], 0  ;;  %s2736_s29 = smov 0  }
   0x2 LB: > { %3159 = sst [smem:[#allocation8_spill]] %s2649_s29  ;;  %s2651_s30 = smov [#allocation2]   ;;  %s2649_s29 = sphi %s2736_s29, %s26_s29  }
   0x3   : > { %s374_s15 = sshll.u32 %s2651_s30, 4  ;;  %s2742_s16 = sadd.s32 4294967295, %s2649_s29   ;;  %s375_s15 = int_to_ptr.vmem [resolvable:$true] %s374_s15 }
   0x4   : > { %p2089_p0 = scmp.ge.s32.totalorder %s2649_s29, 1  ;;  %p356_p1 = scmp.lt.s32.totalorder %s2649_s29, 5 }
   0x5   : > { %p3156_p3 = scmp.eq.s32.totalorder %s2742_s16, 0  ;;  %s2652_s18 = smov [#allocation4]  }
   0x6   : > { %p2746_p2 = pnand %p2089_p0, %p356_p1  ;;  %s408_s19 = sshll.u32 %s2652_s18, 4  ;;  %s2759_s19 = int_to_ptr.vmem [resolvable:$true] %s408_s19 }
   0x7   : > { %s2579_s23 = scalar_lea.hbm %s3144_s3, 3072 }
   0x8   : > { %s3160_s17 = scalar_select %p2746_p2, 1, 0 }
   0x9   : > { %p2374_p4 = pneg %p2746_p2  ;;  %p2580_p6 = scmp.ne.s32.totalorder %s3144_s3, %s2579_s23 }
   0xa   : > { %p2586_p10 = scmp.lt.u32.totalorder %s2579_s23, %s3144_s3 }
   0xb   : > { %p2755_p5 = pnand %p3156_p3, %p2374_p4 }
   0xd   : > { %p2581_p7 = pneg %p2755_p5 }
   0xf   : > { %p2582_p8 = pnand %p2581_p7, %p2580_p6 }
  0x11   : > { %p2583_p9 = pneg %p2582_p8 }
  0x13   : > { %p2588_p11 = pnand %p2586_p10, %p2583_p9 }
  0x15   : > { %2591 = shalt.err (!%p2588_p11)
}
  0x16   : > { %s2592_s28 = scalar_lea.vmem %s375_s15, 3072  ;;  %p2600_p1 = scmp.lt.s32.totalorder %s375_s15, %s375_s15 }
  0x17   : > { %p2593_p12 = scmp.ne.s32.totalorder %s375_s15, %s2592_s28  ;;  %p2601_p4 = scmp.lt.s32.totalorder %s2592_s28, %s2592_s28 }
  0x19   : > { %p2595_p13 = pnand %p2593_p12, %p2581_p7  ;;  %p2602_p3 = por %p2601_p4, %p2600_p1 }
  0x1b   : > { %p2596_p0 = pneg %p2595_p13 }
  0x1d   : > { %p2603_p2 = pnand %p2602_p3, %p2596_p0 }
  0x1f   : > { %2606 = shalt.err (!%p2603_p2)
}
  0x20   : > { %s2653_s30 = smov 192   ;;  %s2654_s18 = smov 12  }
  0x21   : > { %2377 = dma.hbm_to_vmem [thread:$0]  (!%p2755_p5), %s3144_s3, 3072, %s375_s15, [#allocation3], %s2653_s30, %s2653_s30, %s2654_s18  }
  0x22   : > { %s2607_s25 = scalar_lea.hbm %s3152_s11, 4096 }
  0x23   : > { %p2608_p6 = scmp.ne.s32.totalorder %s3152_s11, %s2607_s25  ;;  %p2614_p8 = scmp.lt.u32.totalorder %s2607_s25, %s3152_s11 }
  0x25   : > { %p2610_p2 = pnand %p2608_p6, %p2581_p7 }
  0x27   : > { %p2611_p3 = pneg %p2610_p2 }
  0x29   : > { %p2616_p9 = pnand %p2614_p8, %p2611_p3 }
  0x2b   : > { %2619 = shalt.err (!%p2616_p9)
}
  0x2c   : > { %s2620_s15 = scalar_lea.vmem %s2759_s19, 4096  ;;  %p2628_p13 = scmp.lt.s32.totalorder %s2759_s19, %s2759_s19 }
  0x2d   : > { %p2621_p10 = scmp.ne.s32.totalorder %s2759_s19, %s2620_s15  ;;  %p2629_p0 = scmp.lt.s32.totalorder %s2620_s15, %s2620_s15 }
  0x2f   : > { %p2623_p11 = pnand %p2621_p10, %p2581_p7  ;;  %p2630_p1 = por %p2629_p0, %p2628_p13 }
  0x31   : > { %p2624_p12 = pneg %p2623_p11 }
  0x33   : > { %p2631_p4 = pnand %p2630_p1, %p2624_p12 }
  0x35   : > { %2634 = shalt.err (!%p2631_p4)
}
  0x36   : > { %s2655_s29 = smov 64   ;;  %s2656_s30 = smov 4  }
  0x37   : > { %2380 = dma.hbm_to_vmem [thread:$0]  (!%p2755_p5), %s3152_s11, 4096, %s2759_s19, [#allocation5], %s2655_s29, %s2655_s29, %s2656_s30  }
  0x38   : > { %p3162_p6 = scmp.ne.s32.totalorder %s3160_s17, 0 }
  0x39   : > { %p3163_p7 = scmp.eq.s32.totalorder (!%p3162_p6), %s2742_s16, 0 }
  0x3a   : > { %438 = sbr.rel (%p3162_p6) target bundleno = 2922 (0xb6a), region = 76 }
  0x41   : > { %2640 = dma.done.wait (%p3163_p7), [#allocation3], 3072   ;;  %p3164_p2 = pmov %p3163_p7 }
  0x43   : > { %2642 = vsyncadd (%p3164_p2), [#allocation3], 4294964224  ;;  %p3165_p3 = pmov %p3164_p2 }
  0x44   : > { %p3166_p8 = pmov %p3164_p2 }
  0x45   : > { %2644 = dma.done.wait (%p3165_p3), [#allocation5], 4096  }
  0x46   : > { %2646 = vsyncadd (%p3166_p8), [#allocation5], 4294963200  ;;  %p488_p9 = scmp.lt.s32.totalorder %s2742_s16, 3  ;;  %v2403_v3 = vld [vmem:[#allocation2 + $0x4] ss:$12 sps:$4 sm:$0xff]   ;;  %v2657_v5 = vmov 0.0   ;;  %v528_v41 = vlaneseq }
  0x47   : > { %v2405_v4 = vld [vmem:[#allocation2] ss:$12 sps:$4 sm:$0xff]   ;;  %2298 = vmatprep.subr.bf16.mxu1 %v2657_v5  ;;  %v2406_v6 = vld [vmem:[#allocation2 + $0x8] ss:$12 sps:$4 sm:$0xff]   ;;  %733 = vmatprep.subr.bf16.mxu0 %v2403_v3  ;;  %v2409_v16 = vld [vmem:[#allocation2 + $0x18] ss:$12 sps:$4 sm:$0xff]  }
  0x48   : > { %s3169_s16 = smov (!%p488_p9, %s2742_s16), 3  ;;  %v2407_v7 = vld [vmem:[#allocation2 + $0x1c] ss:$12 sps:$4 sm:$0xff]   ;;  %734 = vmatpush1.bf16.msra.mxu0 %v2405_v4  ;;  %2299 = vmatpush3.bf16.msra.mxu1 %v2406_v6  ;;  %v2410_v17 = vld [vmem:[#allocation2 + $0x20] ss:$12 sps:$4 sm:$0xff]   ;;  %v2658_v31 = vmov 0  }
  0x49   : > { %s2214_s17 = sshll.u32 %s3169_s16, 3  ;;  %735 = vmatprep.subr.bf16.mxu0 %v2407_v7  ;;  %2300 = vmatprep.subr.bf16.mxu1 %v2657_v5  ;;  %v2411_v18 = vld [vmem:[#allocation2 + $0x34] ss:$12 sps:$4 sm:$0xff]   ;;  %v2413_v19 = vld [vmem:[#allocation2 + $0x30] ss:$12 sps:$4 sm:$0xff]   ;;  %vm2659_vm0 = vmmov 0  }
  0x4a   : > { %s492_s22 = scalar_lea.vmem %s3141_s0, %s2214_s17  ;;  %v2414_v20 = vld [vmem:[#allocation2 + $0x38] ss:$12 sps:$4 sm:$0xff]   ;;  %v2417_v22 = vld [vmem:[#allocation2 + $0x48] ss:$12 sps:$4 sm:$0xff]   ;;  %v2418_v23 = vld [vmem:[#allocation2 + $0x50] ss:$12 sps:$4 sm:$0xff]   ;;  %765 = vmatprep.mubr.bf16.mxu0 %v2658_v31  ;;  %2314 = vmatprep.mubr.msk.bf16.mxu1 %vm2659_vm0, %v2657_v5  ;;  %s497_s28 = scalar_lea.vmem %s3155_s14, %s2214_s17 }
  0x4b   : > { %v2219_v0 = vld [vmem:[%s492_s22] sm:$0xff]   ;;  %v2415_v21 = vld [vmem:[#allocation2 + $0x4c] ss:$12 sps:$4 sm:$0xff]   ;;  %v2422_v26 = vld [vmem:[#allocation2 + $0x68] ss:$12 sps:$4 sm:$0xff]   ;;  %v2857_v44 = vshrl.u32 %v528_v41, 7 }
  0x4c   : > { %v2828_v1 = vunpack.c.l.bf16 %v2219_v0  ;;  %v2831_v2 = vunpack.c.h.bf16 %v2219_v0  ;;  %736 = vmatpush1.bf16.msra.mxu0 %v2409_v16  ;;  %2301 = vmatpush3.bf16.msra.mxu1 %v2410_v17  ;;  %v2419_v24 = vld [vmem:[#allocation2 + $0x64] ss:$12 sps:$4 sm:$0xff]   ;;  %v2421_v25 = vld [vmem:[#allocation2 + $0x60] ss:$12 sps:$4 sm:$0xff]   ;;  %v2423_v27 = vld [vmem:[#allocation2 + $0x7c] ss:$12 sps:$4 sm:$0xff]  }
  0x4d   : > { %2302 = vmatprep.subr.bf16.mxu1 %v2657_v5  ;;  %737 = vmatprep.subr.bf16.mxu0 %v2411_v18  ;;  %v2425_v28 = vld [vmem:[#allocation2 + $0x78] ss:$12 sps:$4 sm:$0xff]   ;;  %v2426_v29 = vld [vmem:[#allocation2 + $0x80] ss:$12 sps:$4 sm:$0xff]   ;;  %v2429_v32 = vld [vmem:[#allocation2 + $0x90] ss:$12 sps:$4 sm:$0xff]  }
  0x4e   : > { %503 = vadd.xlane.f32.xlu0 %v2828_v1  ;;  %v2427_v30 = vld [vmem:[#allocation2 + $0x94] ss:$12 sps:$4 sm:$0xff]   ;;  %v2430_v33 = vld [vmem:[#allocation2 + $0x98] ss:$12 sps:$4 sm:$0xff]   ;;  %v2434_v36 = vld [vmem:[#allocation2 + $0xb0] ss:$12 sps:$4 sm:$0xff]  }
  0x4f   : > { %v2431_v34 = vld [vmem:[#allocation2 + $0xac] ss:$12 sps:$4 sm:$0xff]   ;;  %v2433_v35 = vld [vmem:[#allocation2 + $0xa8] ss:$12 sps:$4 sm:$0xff]   ;;  %v526_v45 = vld [vmem:[%s3142_s1] sm:$0x1] }
  0x50   : > { %738 = vmatpush1.bf16.msra.mxu0 %v2413_v19  ;;  %2303 = vmatpush3.bf16.msra.mxu1 %v2414_v20  ;;  %v527_v46 = vunpack.c.l.bf16 %v526_v45  ;;  %v2863_v47 = vsub.s32 0, %v2857_v44  ;;  %v534_v48 = vld [vmem:[%s3143_s2] sm:$0x1]  ;;  %v588_v63 = vsub.s32 4, %v2857_v44  ;;  %v584_v0 = vsub.s32 2, %v2857_v44  ;;  %s2660_s21 = smov 64  }
  0x51   : > { %2304 = vmatprep.subr.bf16.mxu1 %v2657_v5  ;;  %739 = vmatprep.subr.bf16.mxu0 %v2415_v21  ;;  %v535_v52 = vunpack.c.l.bf16 %v534_v48  ;;  %v575_v61 = vld [vmem:[%s3145_s4] sm:$0x7]  ;;  %vm842_vm1 = vcmask 523264   ;;  %vm890_vm2 = vcmask 130048  }
  0x52   : > { %505 = vadd.xlane.f32.xlu0 %v2831_v2  ;;  %v531_v51 = vrot.slane %v527_v46, %v2863_v47  ;;  %v576_v62 = vunpack.c.l.bf16 %v575_v61 }
  0x53   : > { %v539_v56 = vrot.slane %v535_v52, %v2863_v47 }
  0x54   : > { %740 = vmatpush1.bf16.msra.mxu0 %v2417_v22  ;;  %2305 = vmatpush3.bf16.msra.mxu1 %v2418_v23  ;;  %v581_v3 = vrot.slane %v576_v62, %v2863_v47  ;;  %v589_v4 = vrot.slane %v576_v62, %v588_v63  ;;  %v585_v6 = vrot.slane %v576_v62, %v584_v0 }
  0x55   : > { %2306 = vmatprep.subr.bf16.mxu1 %v2657_v5  ;;  %741 = vmatprep.subr.bf16.mxu0 %v2419_v24 }
  0x56   : > { %v596_v7 = vrot.slane %v581_v3, %v2863_v47 }
  0x58   : > { %742 = vmatpush1.bf16.msra.mxu0 %v2421_v25  ;;  %2307 = vmatpush3.bf16.msra.mxu1 %v2422_v26 }
  0x59   : > { %743 = vmatprep.subr.bf16.mxu0 %v2423_v27  ;;  %2308 = vmatprep.subr.bf16.mxu1 %v2657_v5 }
  0x5c   : > { %744 = vmatpush1.bf16.msra.mxu0 %v2425_v28  ;;  %2309 = vmatpush3.bf16.msra.mxu1 %v2426_v29 }
  0x5d   : > { %745 = vmatprep.subr.bf16.mxu0 %v2427_v30  ;;  %2310 = vmatprep.subr.bf16.mxu1 %v2657_v5  ;;  %v2901_v30 = vld [vmem:[%s3154_s13] sm:$0xff] }
  0x60   : > { %746 = vmatpush1.bf16.msra.mxu0 %v2429_v32  ;;  %2311 = vmatpush3.bf16.msra.mxu1 %v2430_v33  ;;  %v2906_v33 = vld [vmem:[%s3154_s13 + $0x8] sm:$0xff] }
  0x61   : > { %747 = vmatprep.subr.bf16.mxu0 %v2431_v34  ;;  %2312 = vmatprep.subr.bf16.mxu1 %v2657_v5 }
  0x64   : > { %748 = vmatpush1.bf16.msra.mxu0 %v2433_v35  ;;  %2313 = vmatpush3.bf16.msra.mxu1 %v2434_v36 }
  0x65   : > { %2318 = vmatprep.subr.bf16.mxu1 %v2657_v5  ;;  %2330 = vmatprep.subr.bf16.mxu0 %v2657_v5 }
  0xdb   : > { %v504_v8 = vpop.xlane.xlu0 %503 }
  0xdc   : > { %v508_v9 = vmul.f32 0.0078125, %v504_v8  ;;  %v604_v8 = vrot.slane %v589_v4, %v2863_v47 }
  0xde   : > { %v2837_v10 = vsub.f32 %v2828_v1, %v508_v9 }
  0xdf   : > { %v506_v11 = vpop.xlane.xlu0 %505 }
  0xe0   : > { %v509_v12 = vmul.f32 0.0078125, %v506_v11  ;;  %v512_v13 = vmul.f32 %v2837_v10, %v2837_v10  ;;  %v600_v11 = vrot.slane %v585_v6, %v2863_v47 }
  0xe2   : > { %v2842_v14 = vsub.f32 %v2831_v2, %v509_v12  ;;  %514 = vadd.xlane.f32.xlu1 %v512_v13 }
  0xe4   : > { %v513_v15 = vmul.f32 %v2842_v14, %v2842_v14 }
  0xe6   : > { %516 = vadd.xlane.f32.xlu1 %v513_v15 }
 0x16f   : > { %v515_v37 = vpop.xlane.xlu1 %514 }
 0x170   : > { %v518_v38 = vmul.f32 0.0078125, %v515_v37 }
 0x172   : > { %v520_v39 = vadd.f32 1e-05, %v518_v38 }
 0x173   : > { %v517_v40 = vpop.xlane.xlu1 %516 }
 0x174   : > { %2523 = vrsqrt.f32 %v520_v39  ;;  %v519_v42 = vmul.f32 0.0078125, %v517_v40 }
 0x176   : > { %v521_v43 = vadd.f32 1e-05, %v519_v42 }
 0x178   : > { %2525 = vrsqrt.f32 %v521_v43 }
 0x17e   : > { %v2524_v49 = vpop.eup %2523 }
 0x17f   : > { %v524_v50 = vmul.f32 %v2524_v49, %v2837_v10 }
 0x181   : > { %v532_v55 = vmul.f32 %v531_v51, %v524_v50 }
 0x182   : > { %v2526_v53 = vpop.eup %2525 }
 0x183   : > { %v525_v54 = vmul.f32 %v2526_v53, %v2842_v14  ;;  %v540_v58 = vadd.f32 %v539_v56, %v532_v55  ;;  %v2435_v53 = vld [vmem:[%s3146_s5] sm:$0xff]   ;;  %v2437_v55 = vld [vmem:[%s3146_s5 + $0x10] sm:$0xff]  }
 0x185   : > { %v533_v57 = vmul.f32 %v531_v51, %v525_v54  ;;  %v2436_v54 = vld [vmem:[%s3146_s5 + $0x8] sm:$0xff]  }
 0x187   : > { %v541_v59 = vadd.f32 %v539_v56, %v533_v57 }
 0x189   : > { %v542_v60 = vpack.c.bf16 %v541_v59, %v540_v58 }
 0x18b   : > { %766 = vmatmul.mubr.bf16.vlgmr.msra.gmra.mrb[0].mxu0 %v542_v60  ;;  %2315 = vmatmul.mubr.bf16.vlgmr.msra.gmra.mrb[0].mxu1 %v542_v60 }
 0x18c   : > { %2320 = vmatprep.mubr.msk.bf16.mxu1 %vm2659_vm0, %v2657_v5  ;;  %2338 = vmatprep.mubr.msk.bf16.mxu0 %vm2659_vm0, %v2657_v5 }
 0x18d   : > { %2331 = vmatpush3.bf16.msra.mxu0 %v2435_v53 }
 0x18e   : > { %2332 = vmatprep.subr.bf16.mxu0 %v2657_v5 }
 0x191   : > { %2333 = vmatpush3.bf16.msra.mxu0 %v2436_v54  ;;  %v833_v54 = vld [vmem:[%s3147_s6] sm:$0x1] }
 0x192   : > { %2334 = vmatprep.subr.bf16.mxu0 %v2657_v5 }
 0x195   : > { %2335 = vmatpush3.bf16.msra.mxu0 %v2437_v55  ;;  %v834_v55 = vunpack.c.l.bf16 %v833_v54 }
 0x196   : > { %2336 = vmatprep.subr.bf16.mxu0 %v2657_v5 }
 0x25e   : > { %v767_v9 = vpop.f32.mrb[0].mxu0  ;;  %v810_v10 = vpop.f32.mrb[0].mxu1 }
 0x25f   : > { %v768_v12 = vadd.f32 %v767_v9, %v596_v7  ;;  %v769_v13 = vpop.f32.mrb[1].mxu0  ;;  %v2316_v14 = vpop.f32.mrb[1].mxu1  ;;  %v811_v17 = vadd.f32 %v810_v10, %v604_v8 }
 0x260   : > { %v771_v15 = vpop.f32.mrb[2].mxu0  ;;  %v813_v16 = vpop.f32.mrb[2].mxu1  ;;  %v770_v22 = vadd.f32 %v769_v13, %v600_v11 }
 0x261   : > { %v772_v18 = vadd.f32 %v771_v15, %v596_v7  ;;  %v814_v19 = vadd.f32 %v813_v16, %v604_v8  ;;  %v773_v20 = vpop.f32.mrb[3].mxu0  ;;  %v2317_v21 = vpop.f32.mrb[3].mxu1  ;;  %v835_v24 = vmul.f32 0.125, %v768_v12  ;;  %v2438_v7 = vld [vmem:[%s3146_s5 + $0x18] sm:$0xff]  }
 0x262   : > { %v774_v23 = vadd.f32 %v773_v20, %v600_v11  ;;  %2337 = vmatpush3.bf16.msra.mxu0 %v2438_v7  ;;  %v2443_v7 = vld [vmem:[%s3150_s9] ss:$16 sps:$4 sm:$0xff]  }
 0x263   : > { %v836_v25 = vmul.f32 0.125, %v772_v18  ;;  %v2889_v26 = vpack.c.bf16 %v814_v19, %v811_v17  ;;  %2354 = vmatprep.subr.bf16.mxu0 %v2657_v5 }
 0x264   : > { %v838_v27 = vpack.c.bf16 %v774_v23, %v770_v22 }
 0x265   : > { %v837_v28 = vpack.c.bf16 %v836_v25, %v835_v24 }
 0x266   : > { %v847_v29 = vsel %vm842_vm1, %v838_v27, 0 }
 0x267   : > { %2319 = vmatpush3.bf16.xpose.msra.mxu1 %v847_v29 }
 0x268   : > { %2324 = vmatprep.subr.bf16.mxu1 %v2657_v5 }
 0x26e   : > { %2321 = vmatmul.mubr.msk.bf16.vlgmr.msra.gmra.mrb[4].mxu1 %vm842_vm1, %v837_v28 }
 0x26f   : > { %2325 = vmatpush3.bf16.msra.mxu1 %v2889_v26  ;;  %2326 = vmatprep.mubr.msk.bf16.mxu1 %vm2659_vm0, %v2657_v5 }
 0x270   : > { %2342 = vmatprep.subr.bf16.mxu1 %v2657_v5 }
 0x341   : > { %v883_v32 = vpop.f32.mrb[4].mxu1 }
 0x342   : > { %v884_v34 = vadd.f32 %v883_v32, %v2901_v30  ;;  %v2322_v35 = vpop.f32.mrb[5].mxu1 }
 0x343   : > { %v886_v36 = vpop.f32.mrb[6].mxu1  ;;  %v2441_v35 = vld [vmem:[%s3146_s5 + $0x30] sm:$0xff]  }
 0x344   : > { %v887_v37 = vadd.f32 %v886_v36, %v2906_v33  ;;  %v2323_v38 = vpop.f32.mrb[7].mxu1  ;;  %v891_v39 = vsel %vm890_vm2, %v884_v34, -inf }
 0x345   : > { %892 = vmax.xlane.f32.xlu0 %v891_v39 }
 0x346   : > { %v894_v40 = vsel %vm890_vm2, %v887_v37, -inf }
 0x347   : > { %895 = vmax.xlane.f32.xlu1 %v894_v40 }
 0x3d2   : > { %v893_v41 = vpop.xlane.xlu0 %892 }
 0x3d3   : > { %v897_v42 = vsub.f32 %v884_v34, %v893_v41  ;;  %v2440_v34 = vld [vmem:[%s3146_s5 + $0x28] sm:$0xff]  }
 0x3d4   : > { %v896_v43 = vpop.xlane.xlu1 %895 }
 0x3d5   : > { %v899_v45 = vmul.f32 1.442695, %v897_v42  ;;  %v898_v46 = vsub.f32 %v887_v37, %v896_v43 }
 0x3d7   : > { %2527 = vpow2.f32 %v899_v45  ;;  %v901_v48 = vmul.f32 1.442695, %v898_v46 }
 0x3d9   : > { %2529 = vpow2.f32 %v901_v48 }
 0x3e1   : > { %v2528_v49 = vpop.eup %2527 }
 0x3e2   : > { %v903_v50 = vsel %vm890_vm2, %v2528_v49, 0.0 }
 0x3e3   : > { %v2530_v51 = vpop.eup %2529  ;;  %904 = vadd.xlane.f32.xlu0 %v903_v50 }
 0x3e4   : > { %v906_v52 = vsel %vm890_vm2, %v2530_v51, 0.0 }
 0x3e5   : > { %907 = vadd.xlane.f32.xlu1 %v906_v52 }
 0x3f6   : > { %1034 = vrot.lane.b32.xlu1 %v837_v28, %s2660_s21 }
 0x3f9   : > { %1037 = vrot.lane.b32.xlu0 %v838_v27, %s2660_s21 }
 0x470   : > { %v905_v56 = vpop.xlane.xlu0 %904 }
 0x471   : > { %2531 = vrcp.f32 %v905_v56  ;;  %v1030_v56 = vrot.slane %v834_v55, %v2863_v47  ;;  %v1260_v55 = vld [vmem:[%s3149_s8] sm:$0x1] }
 0x472   : > { %v908_v57 = vpop.xlane.xlu1 %907 }
 0x473   : > { %2533 = vrcp.f32 %v908_v57 }
 0x474   : > { %v1038_v62 = vpop.permute.xlu0 %1037 }
 0x475   : > { %v1043_v4 = vsel %vm842_vm1, %v1038_v62, 0 }
 0x476   : > { %v1035_v6 = vpop.permute.xlu1 %1034 }
 0x47b   : > { %v2532_v58 = vpop.eup %2531 }
 0x47c   : > { %v911_v60 = vmul.f32 %v2532_v58, %v2528_v49 }
 0x47d   : > { %v2534_v59 = vpop.eup %2533 }
 0x47e   : > { %v912_v61 = vmul.f32 %v2534_v59, %v2530_v51 }
 0x480   : > { %v913_v3 = vpack.c.bf16 %v912_v61, %v911_v60 }
 0x482   : > { %2327 = vmatmul.mubr.msk.bf16.vlgmr.msra.gmra.mrb[8].mxu1 %vm890_vm2, %v913_v3 }
 0x483   : > { %2343 = vmatpush3.bf16.xpose.msra.mxu1 %v1043_v4  ;;  %2344 = vmatprep.mubr.msk.bf16.mxu1 %vm2659_vm0, %v2657_v5 }
 0x484   : > { %2348 = vmatprep.subr.bf16.mxu1 %v2657_v5 }
 0x48a   : > { %2345 = vmatmul.mubr.msk.bf16.vlgmr.msra.gmra.mrb[12].mxu1 %vm842_vm1, %v1035_v6 }
 0x48b   : > { %2350 = vmatprep.mubr.msk.bf16.mxu1 %vm2659_vm0, %v2657_v5 }
 0x555   : > { %v951_v8 = vpop.f32.mrb[8].mxu1 }
 0x556   : > { %v2328_v9 = vpop.f32.mrb[9].mxu1 }
 0x557   : > { %v954_v10 = vpop.f32.mrb[10].mxu1  ;;  %v2448_v9 = vld [vmem:[%s3150_s9 + $0xc] ss:$16 sps:$4 sm:$0xff]  }
 0x558   : > { %v958_v11 = vpack.c.bf16 %v954_v10, %v951_v8  ;;  %v2329_v12 = vpop.f32.mrb[11].mxu1  ;;  %v2445_v8 = vld [vmem:[%s3150_s9 + $0x4] ss:$16 sps:$4 sm:$0xff]   ;;  %v2454_v10 = vld [vmem:[%s3150_s9 + $0x2c] ss:$16 sps:$4 sm:$0xff]  }
 0x559   : > { %v2452_v12 = vld [vmem:[%s3150_s9 + $0x28] ss:$16 sps:$4 sm:$0xff]  }
 0x55a   : > { %2339 = vmatmul.mubr.msk.bf16.vlgmr.msra.gmra.mrb[4].mxu0 %vm842_vm1, %v958_v11  ;;  %v2449_v11 = vld [vmem:[%s3150_s9 + $0x20] ss:$16 sps:$4 sm:$0xff]  }
 0x55b   : > { %2362 = vmatprep.mubr.msk.bf16.mxu0 %vm2659_vm0, %v2657_v5 }
 0x55d   : > { %v1079_v13 = vpop.f32.mrb[12].mxu1 }
 0x55e   : > { %v1080_v14 = vadd.f32 %v1079_v13, %v2901_v30  ;;  %v2346_v15 = vpop.f32.mrb[13].mxu1 }
 0x55f   : > { %v1082_v16 = vpop.f32.mrb[14].mxu1 }
 0x560   : > { %v1083_v17 = vadd.f32 %v1082_v16, %v2906_v33  ;;  %v2347_v18 = vpop.f32.mrb[15].mxu1  ;;  %v1086_v19 = vsel %vm890_vm2, %v1080_v14, -inf  ;;  %v2439_v33 = vld [vmem:[%s3146_s5 + $0x20] sm:$0xff]  }
 0x561   : > { %1087 = vmax.xlane.f32.xlu1 %v1086_v19  ;;  %2355 = vmatpush3.bf16.msra.mxu0 %v2439_v33  ;;  %v2467_v33 = vld [vmem:[%s3150_s9 + $0x80] ss:$16 sps:$4 sm:$0xff]  }
 0x562   : > { %v1089_v20 = vsel %vm890_vm2, %v1083_v17, -inf  ;;  %2356 = vmatprep.subr.bf16.mxu0 %v2657_v5 }
 0x563   : > { %1090 = vmax.xlane.f32.xlu0 %v1089_v20 }
 0x565   : > { %2357 = vmatpush3.bf16.msra.mxu0 %v2440_v34  ;;  %v2470_v34 = vld [vmem:[%s3150_s9 + $0x88] ss:$16 sps:$4 sm:$0xff]  }
 0x566   : > { %2358 = vmatprep.subr.bf16.mxu0 %v2657_v5 }
 0x569   : > { %2359 = vmatpush3.bf16.msra.mxu0 %v2441_v35  ;;  %v2475_v35 = vld [vmem:[%s3150_s9 + $0xa4] ss:$16 sps:$4 sm:$0xff]  }
 0x56a   : > { %2360 = vmatprep.subr.bf16.mxu0 %v2657_v5  ;;  %v2442_v5 = vld [vmem:[%s3146_s5 + $0x38] sm:$0xff]  }
 0x56d   : > { %2361 = vmatpush3.bf16.msra.mxu0 %v2442_v5 }
 0x56e   : > { %1543 = vmatprep.subr.bf16.mxu0 %v2448_v9  ;;  %v2491_v9 = vld [vmem:[#allocation4 + $0x40] sm:$0xff]  }
 0x5ee   : > { %v1088_v21 = vpop.xlane.xlu1 %1087 }
 0x5ef   : > { %v1092_v22 = vsub.f32 %v1080_v14, %v1088_v21  ;;  %v2457_v21 = vld [vmem:[%s3150_s9 + $0x44] ss:$16 sps:$4 sm:$0xff]  }
 0x5f0   : > { %v1091_v23 = vpop.xlane.xlu0 %1090 }
 0x5f1   : > { %v1094_v24 = vmul.f32 1.442695, %v1092_v22  ;;  %v1093_v25 = vsub.f32 %v1083_v17, %v1091_v23  ;;  %v2460_v22 = vld [vmem:[%s3150_s9 + $0x4c] ss:$16 sps:$4 sm:$0xff]   ;;  %v2455_v23 = vld [vmem:[%s3150_s9 + $0x40] ss:$16 sps:$4 sm:$0xff]  }
 0x5f3   : > { %2535 = vpow2.f32 %v1094_v24  ;;  %v1096_v27 = vmul.f32 1.442695, %v1093_v25  ;;  %v2458_v24 = vld [vmem:[%s3150_s9 + $0x48] ss:$16 sps:$4 sm:$0xff]   ;;  %v2463_v25 = vld [vmem:[%s3150_s9 + $0x64] ss:$16 sps:$4 sm:$0xff]  }
 0x5f5   : > { %2537 = vpow2.f32 %v1096_v27  ;;  %v2466_v27 = vld [vmem:[%s3150_s9 + $0x6c] ss:$16 sps:$4 sm:$0xff]  }
 0x5fd   : > { %v2536_v28 = vpop.eup %2535 }
 0x5fe   : > { %v1098_v29 = vsel %vm890_vm2, %v2536_v28, 0.0 }
 0x5ff   : > { %v2538_v30 = vpop.eup %2537  ;;  %1099 = vadd.xlane.f32.xlu0 %v1098_v29  ;;  %v2464_v29 = vld [vmem:[%s3150_s9 + $0x68] ss:$16 sps:$4 sm:$0xff]  }
 0x600   : > { %v1101_v32 = vsel %vm890_vm2, %v2538_v30, 0.0 }
 0x601   : > { %1102 = vadd.xlane.f32.xlu1 %v1101_v32  ;;  %v2472_v32 = vld [vmem:[%s3150_s9 + $0x8c] ss:$16 sps:$4 sm:$0xff]  }
 0x615   : > { %1110 = vrot.lane.b32.xlu0 %v2889_v26, %s2660_s21 }
 0x62d   : > { %v1020_v26 = vpop.f32.mrb[4].mxu0 }
 0x62e   : > { %v2340_v36 = vpop.f32.mrb[5].mxu0  ;;  %v1031_v57 = vadd.f32 %v1030_v56, %v1020_v26  ;;  %v2478_v26 = vld [vmem:[%s3150_s9 + $0xac] ss:$16 sps:$4 sm:$0xff]  }
 0x62f   : > { %v1023_v37 = vpop.f32.mrb[6].mxu0  ;;  %v2473_v36 = vld [vmem:[%s3150_s9 + $0xa0] ss:$16 sps:$4 sm:$0xff]  }
 0x630   : > { %v2341_v38 = vpop.f32.mrb[7].mxu0  ;;  %v1032_v59 = vadd.f32 %v1030_v56, %v1023_v37  ;;  %v2476_v37 = vld [vmem:[%s3150_s9 + $0xa8] ss:$16 sps:$4 sm:$0xff]  }
 0x631   : > { %v2481_v38 = vld [vmem:[%s3150_s9 + $0xc4] ss:$16 sps:$4 sm:$0xff]  }
 0x68c   : > { %v1100_v39 = vpop.xlane.xlu0 %1099 }
 0x68d   : > { %2539 = vrcp.f32 %v1100_v39  ;;  %v2484_v39 = vld [vmem:[%s3150_s9 + $0xcc] ss:$16 sps:$4 sm:$0xff]  }
 0x68e   : > { %v1103_v40 = vpop.xlane.xlu1 %1102 }
 0x68f   : > { %2541 = vrcp.f32 %v1103_v40  ;;  %v2479_v40 = vld [vmem:[%s3150_s9 + $0xc0] ss:$16 sps:$4 sm:$0xff]  }
 0x690   : > { %v1111_v41 = vpop.permute.xlu0 %1110 }
 0x691   : > { %2349 = vmatpush3.bf16.msra.mxu1 %v1111_v41  ;;  %v2482_v41 = vld [vmem:[%s3150_s9 + $0xc8] ss:$16 sps:$4 sm:$0xff]  }
 0x692   : > { %1500 = vmatprep.subr.bf16.mxu1 %v2445_v8 }
 0x697   : > { %v2540_v42 = vpop.eup %2539 }
 0x698   : > { %v1106_v45 = vmul.f32 %v2540_v42, %v2536_v28  ;;  %v2461_v28 = vld [vmem:[%s3150_s9 + $0x60] ss:$16 sps:$4 sm:$0xff]   ;;  %v2487_v42 = vld [vmem:[%s3150_s9 + $0xe4] ss:$16 sps:$4 sm:$0xff]  }
 0x699   : > { %v2542_v43 = vpop.eup %2541 }
 0x69a   : > { %v1107_v46 = vmul.f32 %v2542_v43, %v2538_v30  ;;  %v2469_v30 = vld [vmem:[%s3150_s9 + $0x84] ss:$16 sps:$4 sm:$0xff]   ;;  %v2490_v43 = vld [vmem:[%s3150_s9 + $0xec] ss:$16 sps:$4 sm:$0xff]  }
 0x69c   : > { %v1108_v48 = vpack.c.bf16 %v1107_v46, %v1106_v45  ;;  %v2485_v45 = vld [vmem:[%s3150_s9 + $0xe0] ss:$16 sps:$4 sm:$0xff]   ;;  %v2488_v46 = vld [vmem:[%s3150_s9 + $0xe8] ss:$16 sps:$4 sm:$0xff]  }
 0x69e   : > { %2351 = vmatmul.mubr.msk.bf16.vlgmr.msra.gmra.mrb[16].mxu1 %vm890_vm2, %v1108_v48 }
 0x69f   : > { %1532 = vmatprep.mubr.bf16.mxu1 %v2658_v31  ;;  %1501 = vmatpush1.bf16.msra.mxu1 %v2443_v7 }
 0x771   : > { %v1150_v49 = vpop.f32.mrb[16].mxu1 }
 0x772   : > { %v2352_v50 = vpop.f32.mrb[17].mxu1 }
 0x773   : > { %v1153_v51 = vpop.f32.mrb[18].mxu1 }
 0x774   : > { %v1157_v52 = vpack.c.bf16 %v1153_v51, %v1150_v49  ;;  %v2353_v53 = vpop.f32.mrb[19].mxu1 }
 0x775   : > { %v1252_v53 = vld [vmem:[%s3148_s7] sm:$0x1] }
 0x776   : > { %2363 = vmatmul.mubr.msk.bf16.vlgmr.msra.gmra.mrb[8].mxu0 %vm842_vm1, %v1157_v52  ;;  %v1253_v54 = vunpack.c.l.bf16 %v1252_v53 }
 0x777   : > { %1575 = vmatprep.mubr.bf16.mxu0 %v2658_v31 }
 0x849   : > { %v1219_v58 = vpop.f32.mrb[8].mxu0 }
 0x84a   : > { %v1226_v60 = vadd.f32 %v1219_v58, %v1031_v57  ;;  %v2364_v61 = vpop.f32.mrb[9].mxu0  ;;  %v1257_v58 = vrot.slane %v1253_v54, %v2863_v47 }
 0x84b   : > { %v1222_v62 = vpop.f32.mrb[10].mxu0 }
 0x84c   : > { %v2975_v3 = vadd.f32 %v2828_v1, %v1226_v60  ;;  %v1227_v4 = vadd.f32 %v1222_v62, %v1032_v59  ;;  %v2365_v6 = vpop.f32.mrb[11].mxu0  ;;  %v2446_v1 = vld [vmem:[%s3150_s9 + $0x8] ss:$16 sps:$4 sm:$0xff]   ;;  %v1261_v59 = vunpack.c.l.bf16 %v1260_v55 }
 0x84d   : > { %1544 = vmatpush1.bf16.msra.mxu0 %v2446_v1 }
 0x84e   : > { %1230 = vadd.xlane.f32.xlu1 %v2975_v3  ;;  %v2979_v31 = vadd.f32 %v2831_v2, %v1227_v4  ;;  %v2451_v2 = vld [vmem:[%s3150_s9 + $0x24] ss:$16 sps:$4 sm:$0xff]   ;;  %1545 = vmatprep.subr.bf16.mxu0 %v2454_v10  ;;  %v1265_v4 = vrot.slane %v1261_v59, %v2863_v47 }
 0x84f   : > { %1502 = vmatprep.subr.bf16.mxu1 %v2451_v2  ;;  %v2492_v2 = vld [vmem:[#allocation4 + $0xc0] sm:$0xff]  }
 0x850   : > { %1503 = vmatpush1.bf16.msra.mxu1 %v2449_v11  ;;  %v2493_v10 = vld [vmem:[#allocation4] sm:$0xff]  }
 0x851   : > { %1546 = vmatpush1.bf16.msra.mxu0 %v2452_v12  ;;  %1504 = vmatprep.subr.bf16.mxu1 %v2457_v21  ;;  %v2494_v11 = vld [vmem:[#allocation4 + $0x80] sm:$0xff]   ;;  %v2495_v12 = vld [vmem:[#allocation4 + $0x48] sm:$0xff]   ;;  %v2504_v21 = vld [vmem:[#allocation4 + $0xd8] sm:$0xff]  }
 0x852   : > { %1232 = vadd.xlane.f32.xlu1 %v2979_v31  ;;  %1547 = vmatprep.subr.bf16.mxu0 %v2460_v22  ;;  %v2505_v22 = vld [vmem:[#allocation4 + $0x18] sm:$0xff]  }
 0x854   : > { %1505 = vmatpush1.bf16.msra.mxu1 %v2455_v23  ;;  %v2506_v23 = vld [vmem:[#allocation4 + $0x98] sm:$0xff]  }
 0x855   : > { %1548 = vmatpush1.bf16.msra.mxu0 %v2458_v24  ;;  %1506 = vmatprep.subr.bf16.mxu1 %v2463_v25  ;;  %v2507_v24 = vld [vmem:[#allocation4 + $0x60] sm:$0xff]  }
 0x856   : > { %1549 = vmatprep.subr.bf16.mxu0 %v2466_v27  ;;  %v2508_v25 = vld [vmem:[#allocation4 + $0xe0] sm:$0xff]  }
 0x857   : > { %v2509_v27 = vld [vmem:[#allocation4 + $0x20] sm:$0xff]  }
 0x858   : > { %1507 = vmatpush1.bf16.msra.mxu1 %v2461_v28  ;;  %v2510_v28 = vld [vmem:[#allocation4 + $0xa0] sm:$0xff]  }
 0x859   : > { %1550 = vmatpush1.bf16.msra.mxu0 %v2464_v29  ;;  %1508 = vmatprep.subr.bf16.mxu1 %v2469_v30  ;;  %v2511_v29 = vld [vmem:[#allocation4 + $0x68] sm:$0xff]  }
 0x85a   : > { %1551 = vmatprep.subr.bf16.mxu0 %v2472_v32  ;;  %v2512_v30 = vld [vmem:[#allocation4 + $0xe8] sm:$0xff]  }
 0x85b   : > { %v2513_v32 = vld [vmem:[#allocation4 + $0x28] sm:$0xff]  }
 0x85c   : > { %1509 = vmatpush1.bf16.msra.mxu1 %v2467_v33  ;;  %v2514_v33 = vld [vmem:[#allocation4 + $0xa8] sm:$0xff]  }
 0x85d   : > { %1552 = vmatpush1.bf16.msra.mxu0 %v2470_v34  ;;  %1510 = vmatprep.subr.bf16.mxu1 %v2475_v35  ;;  %v2515_v34 = vld [vmem:[#allocation4 + $0x70] sm:$0xff]  }
 0x85e   : > { %1553 = vmatprep.subr.bf16.mxu0 %v2478_v26  ;;  %v2516_v35 = vld [vmem:[#allocation4 + $0xf0] sm:$0xff]  }
 0x85f   : > { %v2517_v26 = vld [vmem:[#allocation4 + $0x30] sm:$0xff]  }
 0x860   : > { %1511 = vmatpush1.bf16.msra.mxu1 %v2473_v36  ;;  %v2518_v36 = vld [vmem:[#allocation4 + $0xb0] sm:$0xff]  }
 0x861   : > { %1554 = vmatpush1.bf16.msra.mxu0 %v2476_v37  ;;  %1512 = vmatprep.subr.bf16.mxu1 %v2481_v38  ;;  %v2519_v37 = vld [vmem:[#allocation4 + $0x78] sm:$0xff]  }
 0x862   : > { %1555 = vmatprep.subr.bf16.mxu0 %v2484_v39  ;;  %v2520_v38 = vld [vmem:[#allocation4 + $0xf8] sm:$0xff]  }
 0x863   : > { %v2521_v39 = vld [vmem:[#allocation4 + $0x38] sm:$0xff]  }
 0x864   : > { %1513 = vmatpush1.bf16.msra.mxu1 %v2479_v40  ;;  %v2522_v40 = vld [vmem:[#allocation4 + $0xb8] sm:$0xff]  }
 0x865   : > { %1556 = vmatpush1.bf16.msra.mxu0 %v2482_v41  ;;  %1514 = vmatprep.subr.bf16.mxu1 %v2487_v42  ;;  %v1301_v41 = vld [vmem:[%s3151_s10] sm:$0xf] }
 0x866   : > { %1557 = vmatprep.subr.bf16.mxu0 %v2490_v43  ;;  %v1302_v42 = vunpack.c.l.bf16 %v1301_v41  ;;  %v1318_v43 = vsub.s32 6, %v2857_v44 }
 0x868   : > { %1515 = vmatpush1.bf16.msra.mxu1 %v2485_v45  ;;  %v1307_v45 = vrot.slane %v1302_v42, %v2863_v47 }
 0x869   : > { %1558 = vmatpush1.bf16.msra.mxu0 %v2488_v46  ;;  %2254 = vmatprep.subr.bf16.mxu1 %v2491_v9  ;;  %v1315_v46 = vrot.slane %v1302_v42, %v588_v63 }
 0x86a   : > { %2276 = vmatprep.subr.bf16.mxu0 %v2492_v2 }
 0x8db   : > { %v1231_v13 = vpop.xlane.xlu1 %1230 }
 0x8dc   : > { %v1234_v14 = vmul.f32 0.0078125, %v1231_v13  ;;  %v2496_v13 = vld [vmem:[#allocation4 + $0xc8] sm:$0xff]  }
 0x8de   : > { %v3007_v15 = vsub.f32 %v2975_v3, %v1234_v14  ;;  %v2497_v14 = vld [vmem:[#allocation4 + $0x8] sm:$0xff]  }
 0x8df   : > { %v1233_v16 = vpop.xlane.xlu1 %1232 }
 0x8e0   : > { %v1235_v17 = vmul.f32 0.0078125, %v1233_v16  ;;  %v1238_v18 = vmul.f32 %v3007_v15, %v3007_v15  ;;  %v2499_v16 = vld [vmem:[#allocation4 + $0x50] sm:$0xff]  }
 0x8e2   : > { %v3012_v19 = vsub.f32 %v2979_v31, %v1235_v17  ;;  %1240 = vadd.xlane.f32.xlu1 %v1238_v18  ;;  %v2500_v17 = vld [vmem:[#allocation4 + $0xd0] sm:$0xff]  }
 0x8e3   : > { %v2501_v18 = vld [vmem:[#allocation4 + $0x10] sm:$0xff]  }
 0x8e4   : > { %v1239_v20 = vmul.f32 %v3012_v19, %v3012_v19 }
 0x8e6   : > { %1242 = vadd.xlane.f32.xlu1 %v1239_v20  ;;  %v2503_v20 = vld [vmem:[#allocation4 + $0x58] sm:$0xff]  }
 0x96f   : > { %v1241_v48 = vpop.xlane.xlu1 %1240 }
 0x970   : > { %v1244_v5 = vmul.f32 0.0078125, %v1241_v48  ;;  %v1311_v48 = vrot.slane %v1302_v42, %v584_v0 }
 0x972   : > { %v1246_v49 = vadd.f32 1e-05, %v1244_v5  ;;  %v1319_v5 = vrot.slane %v1302_v42, %v1318_v43 }
 0x973   : > { %v1243_v50 = vpop.xlane.xlu1 %1242 }
 0x974   : > { %2543 = vrsqrt.f32 %v1246_v49  ;;  %v1245_v51 = vmul.f32 0.0078125, %v1243_v50  ;;  %v1327_v49 = vrot.slane %v1307_v45, %v2863_v47  ;;  %v1335_v50 = vrot.slane %v1315_v46, %v2863_v47 }
 0x976   : > { %v1247_v52 = vadd.f32 1e-05, %v1245_v51  ;;  %v1331_v51 = vrot.slane %v1311_v48, %v2863_v47 }
 0x978   : > { %2545 = vrsqrt.f32 %v1247_v52  ;;  %v1339_v52 = vrot.slane %v1319_v5, %v2863_v47 }
 0x97e   : > { %v2544_v56 = vpop.eup %2543 }
 0x97f   : > { %v1250_v57 = vmul.f32 %v2544_v56, %v3007_v15  ;;  %v2498_v15 = vld [vmem:[#allocation4 + $0x88] sm:$0xff]  }
 0x981   : > { %v1258_v62 = vmul.f32 %v1257_v58, %v1250_v57 }
 0x982   : > { %v2546_v60 = vpop.eup %2545 }
 0x983   : > { %v1251_v61 = vmul.f32 %v2546_v60, %v3012_v19  ;;  %v1266_v7 = vadd.f32 %v1265_v4, %v1258_v62  ;;  %v2502_v19 = vld [vmem:[#allocation4 + $0x90] sm:$0xff]  }
 0x985   : > { %v1259_v6 = vmul.f32 %v1257_v58, %v1251_v61 }
 0x987   : > { %v1267_v8 = vadd.f32 %v1265_v4, %v1259_v6 }
 0x989   : > { %v1268_v1 = vpack.c.bf16 %v1267_v8, %v1266_v7 }
 0x98b   : > { %1533 = vmatmul.mubr.bf16.vlgmr.msra.gmra.mrb[20].mxu1 %v1268_v1  ;;  %1576 = vmatmul.mubr.bf16.vlgmr.msra.gmra.mrb[12].mxu0 %v1268_v1 }
 0x98c   : > { %2255 = vmatpush3.bf16.msra.mxu1 %v2493_v10  ;;  %2277 = vmatpush3.bf16.msra.mxu0 %v2494_v11 }
 0x98d   : > { %2256 = vmatprep.subr.bf16.mxu1 %v2495_v12  ;;  %2278 = vmatprep.subr.bf16.mxu0 %v2496_v13 }
 0x990   : > { %2257 = vmatpush3.bf16.msra.mxu1 %v2497_v14  ;;  %2279 = vmatpush3.bf16.msra.mxu0 %v2498_v15 }
 0x991   : > { %2258 = vmatprep.subr.bf16.mxu1 %v2499_v16  ;;  %2280 = vmatprep.subr.bf16.mxu0 %v2500_v17 }
 0x994   : > { %2259 = vmatpush3.bf16.msra.mxu1 %v2501_v18  ;;  %2281 = vmatpush3.bf16.msra.mxu0 %v2502_v19 }
 0x995   : > { %2260 = vmatprep.subr.bf16.mxu1 %v2503_v20  ;;  %2282 = vmatprep.subr.bf16.mxu0 %v2504_v21 }
 0x998   : > { %2261 = vmatpush3.bf16.msra.mxu1 %v2505_v22  ;;  %2283 = vmatpush3.bf16.msra.mxu0 %v2506_v23 }
 0x999   : > { %2262 = vmatprep.subr.bf16.mxu1 %v2507_v24  ;;  %2284 = vmatprep.subr.bf16.mxu0 %v2508_v25 }
 0x99c   : > { %2263 = vmatpush3.bf16.msra.mxu1 %v2509_v27  ;;  %2285 = vmatpush3.bf16.msra.mxu0 %v2510_v28 }
 0x99d   : > { %2264 = vmatprep.subr.bf16.mxu1 %v2511_v29  ;;  %2286 = vmatprep.subr.bf16.mxu0 %v2512_v30 }
 0x9a0   : > { %2265 = vmatpush3.bf16.msra.mxu1 %v2513_v32  ;;  %2287 = vmatpush3.bf16.msra.mxu0 %v2514_v33 }
 0x9a1   : > { %2266 = vmatprep.subr.bf16.mxu1 %v2515_v34  ;;  %2288 = vmatprep.subr.bf16.mxu0 %v2516_v35 }
 0x9a4   : > { %2267 = vmatpush3.bf16.msra.mxu1 %v2517_v26  ;;  %2289 = vmatpush3.bf16.msra.mxu0 %v2518_v36 }
 0x9a5   : > { %2268 = vmatprep.subr.bf16.mxu1 %v2519_v37  ;;  %2290 = vmatprep.subr.bf16.mxu0 %v2520_v38 }
 0x9a8   : > { %2269 = vmatpush3.bf16.msra.mxu1 %v2521_v39  ;;  %2291 = vmatpush3.bf16.msra.mxu0 %v2522_v40 }
 0xa5e   : > { %v1534_v53 = vpop.f32.mrb[20].mxu1  ;;  %v1577_v54 = vpop.f32.mrb[12].mxu0 }
 0xa5f   : > { %v3111_v55 = vadd.f32 %v1534_v53, %v1327_v49  ;;  %v3113_v56 = vadd.f32 %v1577_v54, %v1335_v50  ;;  %v1536_v57 = vpop.f32.mrb[21].mxu1  ;;  %v1579_v63 = vpop.f32.mrb[13].mxu0 }
 0xa60   : > { %v3115_v58 = vadd.f32 %v1536_v57, %v1331_v51  ;;  %v3117_v44 = vadd.f32 %v1579_v63, %v1339_v52  ;;  %v1538_v0 = vpop.f32.mrb[22].mxu1  ;;  %v1581_v59 = vpop.f32.mrb[14].mxu0 }
 0xa61   : > { %v2170_v60 = vmul.f32 -1.702, %v3111_v55  ;;  %v2172_v61 = vmul.f32 -1.702, %v3113_v56  ;;  %v1539_v62 = vadd.f32 %v1538_v0, %v1327_v49  ;;  %v1582_v4 = vadd.f32 %v1581_v59, %v1335_v50  ;;  %v1540_v6 = vpop.f32.mrb[23].mxu1  ;;  %v1583_v7 = vpop.f32.mrb[15].mxu0 }
 0xa62   : > { %v2171_v8 = vmul.f32 -1.702, %v3115_v58  ;;  %v2173_v1 = vmul.f32 -1.702, %v3117_v44  ;;  %v1541_v9 = vadd.f32 %v1540_v6, %v1331_v51  ;;  %v1584_v2 = vadd.f32 %v1583_v7, %v1339_v52 }
 0xa63   : > { %v1602_v10 = vmul.f32 1.442695, %v2170_v60  ;;  %v1606_v11 = vmul.f32 1.442695, %v2172_v61  ;;  %v2174_v12 = vmul.f32 -1.702, %v1539_v62 }
 0xa64   : > { %v1604_v13 = vmul.f32 1.442695, %v2171_v8  ;;  %v1608_v14 = vmul.f32 1.442695, %v2173_v1  ;;  %v2176_v15 = vmul.f32 -1.702, %v1582_v4 }
 0xa65   : > { %2547 = vpow2.f32 %v1602_v10  ;;  %v1610_v16 = vmul.f32 1.442695, %v2174_v12  ;;  %v2175_v17 = vmul.f32 -1.702, %v1541_v9  ;;  %v2177_v18 = vmul.f32 -1.702, %v1584_v2 }
 0xa66   : > { %2549 = vpow2.f32 %v1606_v11  ;;  %v1614_v19 = vmul.f32 1.442695, %v2176_v15 }
 0xa67   : > { %2551 = vpow2.f32 %v1604_v13  ;;  %v1612_v20 = vmul.f32 1.442695, %v2175_v17  ;;  %v1616_v21 = vmul.f32 1.442695, %v2177_v18 }
 0xa68   : > { %2553 = vpow2.f32 %v1608_v14 }
 0xa69   : > { %2555 = vpow2.f32 %v1610_v16 }
 0xa6a   : > { %2557 = vpow2.f32 %v1614_v19 }
 0xa6b   : > { %2559 = vpow2.f32 %v1612_v20 }
 0xa6c   : > { %2561 = vpow2.f32 %v1616_v21 }
 0xa6f   : > { %v2548_v22 = vpop.eup %2547 }
 0xa70   : > { %v2550_v23 = vpop.eup %2549  ;;  %v1618_v24 = vadd.f32 1.0, %v2548_v22 }
 0xa71   : > { %v2552_v25 = vpop.eup %2551  ;;  %v1620_v27 = vadd.f32 1.0, %v2550_v23 }
 0xa72   : > { %v2554_v28 = vpop.eup %2553  ;;  %2563 = vrcp.f32 %v1618_v24  ;;  %v1619_v29 = vadd.f32 1.0, %v2552_v25 }
 0xa73   : > { %v2556_v30 = vpop.eup %2555  ;;  %2565 = vrcp.f32 %v1620_v27  ;;  %v1621_v32 = vadd.f32 1.0, %v2554_v28 }
 0xa74   : > { %v2558_v33 = vpop.eup %2557  ;;  %2567 = vrcp.f32 %v1619_v29  ;;  %v1622_v34 = vadd.f32 1.0, %v2556_v30 }
 0xa75   : > { %v2560_v35 = vpop.eup %2559  ;;  %2569 = vrcp.f32 %v1621_v32  ;;  %v1624_v26 = vadd.f32 1.0, %v2558_v33 }
 0xa76   : > { %v2562_v36 = vpop.eup %2561  ;;  %2571 = vrcp.f32 %v1622_v34  ;;  %v1623_v37 = vadd.f32 1.0, %v2560_v35 }
 0xa77   : > { %2573 = vrcp.f32 %v1624_v26  ;;  %v1625_v38 = vadd.f32 1.0, %v2562_v36 }
 0xa78   : > { %2575 = vrcp.f32 %v1623_v37 }
 0xa79   : > { %2577 = vrcp.f32 %v1625_v38 }
 0xa7c   : > { %v2564_v39 = vpop.eup %2563 }
 0xa7d   : > { %v2566_v40 = vpop.eup %2565  ;;  %v1642_v46 = vmul.f32 %v2564_v39, %v3111_v55  ;;  %v1718_v55 = vld [vmem:[%s3153_s12] sm:$0x1] }
 0xa7e   : > { %v2568_v41 = vpop.eup %2567  ;;  %v1644_v49 = vmul.f32 %v2566_v40, %v3113_v56  ;;  %v1719_v56 = vunpack.c.l.bf16 %v1718_v55 }
 0xa7f   : > { %v2570_v42 = vpop.eup %2569  ;;  %v1643_v52 = vmul.f32 %v2568_v41, %v3115_v58 }
 0xa80   : > { %v2572_v43 = vpop.eup %2571  ;;  %v1645_v57 = vmul.f32 %v2570_v42, %v3117_v44  ;;  %v1723_v58 = vrot.slane %v1719_v56, %v2863_v47 }
 0xa81   : > { %v2574_v45 = vpop.eup %2573  ;;  %v1646_v48 = vmul.f32 %v2572_v43, %v1539_v62 }
 0xa82   : > { %v2576_v5 = vpop.eup %2575  ;;  %v1648_v50 = vmul.f32 %v2574_v45, %v1582_v4 }
 0xa83   : > { %v2578_v51 = vpop.eup %2577  ;;  %v1650_v53 = vpack.c.bf16 %v1646_v48, %v1642_v46  ;;  %v1647_v54 = vmul.f32 %v2576_v5, %v1541_v9 }
 0xa84   : > { %v1652_v63 = vpack.c.bf16 %v1648_v50, %v1644_v49  ;;  %v1649_v0 = vmul.f32 %v2578_v51, %v1584_v2 }
 0xa85   : > { %v1651_v59 = vpack.c.bf16 %v1647_v54, %v1643_v52 }
 0xa86   : > { %v1653_v60 = vpack.c.bf16 %v1649_v0, %v1645_v57 }
 0xa87   : > { %1948 = vmatprep.mubr.bf16.mxu1 %v1651_v59 }
 0xa88   : > { %1989 = vmatprep.mubr.bf16.mxu0 %v1653_v60  ;;  %1949 = vmatmul.mubr.bf16.vlgmr.msra.gmra.mrb[24].mxu1 %v1650_v53 }
 0xa89   : > { %1990 = vmatmul.mubr.bf16.vlgmr.msra.gmra.mrb[16].mxu0 %v1652_v63 }
 0xb5b   : > { %v2270_v61 = vpop.f32.mrb[24].mxu1 }
 0xb5c   : > { %v2292_v62 = vpop.f32.mrb[16].mxu0  ;;  %v2271_v4 = vpop.f32.mrb[25].mxu1 }
 0xb5d   : > { %v2272_v44 = vadd.f32 %v2271_v4, %v2270_v61  ;;  %v2293_v6 = vpop.f32.mrb[17].mxu0  ;;  %v2273_v7 = vpop.f32.mrb[26].mxu1 }
 0xb5e   : > { %v2294_v8 = vadd.f32 %v2293_v6, %v2292_v62  ;;  %v2295_v1 = vpop.f32.mrb[18].mxu0  ;;  %v2274_v9 = vpop.f32.mrb[27].mxu1 }
 0xb5f   : > { %v1951_v2 = vadd.f32 %v2272_v44, %v1723_v58  ;;  %v2275_v10 = vadd.f32 %v2274_v9, %v2273_v7  ;;  %v2296_v11 = vpop.f32.mrb[19].mxu0 }
 0xb60   : > { %v2297_v12 = vadd.f32 %v2296_v11, %v2295_v1 }
 0xb61   : > { %v1992_v13 = vadd.f32 %v2294_v8, %v1951_v2  ;;  %v1954_v14 = vadd.f32 %v2275_v10, %v1723_v58 }
 0xb63   : > { %v1995_v15 = vadd.f32 %v2297_v12, %v1954_v14  ;;  %v1998_v16 = vadd.f32 %v1992_v13, %v2975_v3 }
 0xb65   : > { %v1999_v47 = vadd.f32 %v1995_v15, %v2979_v31 }
 0xb67   : > { %v2225_v17 = vpack.c.bf16 %v1999_v47, %v1998_v16 }
 0xb69   : > { %2226 = vst [vmem:[%s497_s28] sm:$0xff] %v2225_v17  }
 0xb6a PF: > { %s3167_s15 = sld [smem:[#allocation8_spill]] }
 0xb70   : > { %s26_s29 = sadd.s32 1, %s3167_s15  }
 0xb71   : > { %p23_p5 = scmp.ge.s32.totalorder %s26_s29, 6  }
 0xb73   :  { %25 = sbr.rel (!%p23_p5) target bundleno = 2 (0x2), region = 115 }
 0xb7a   :  { %2031 = vsyncpa [#allocation3], 1 }
 0xb7b   :  { %2033 = vsyncpa [#allocation3 + $0x1], 1 }
 0xb7c   :  { %2034 = vsyncpa [#allocation5], 1 }

// kernel: _lambda_.16
= control target key start
LH: loop header
LB: loop body
LE: loop exit
PB: predicated region body
PF: predicated region fallthrough
CT: control target
= control target key end

     0   :  { %v330_v0 = vmov 0   ;;  %vm145_vm0 = vcmask 523264   ;;  %v218_v17 = vlaneseq  ;;  %s432_s1 = inlined_call_operand.vmem [shape: bf16[192,128], index: 1, kind: input, shape index: {}]   ;;  %s433_s0 = inlined_call_operand.vmem [shape: bf16[32,192], index: 0, kind: input, shape index: {}]   ;;  %s434_s2 = inlined_call_operand.vmem [shape: bf16[1,128], index: 2, kind: input, shape index: {}]   ;;  %s435_s3 = inlined_call_operand.vmem [shape: bf16[32,128], index: 3, kind: output, shape index: {}]  }
   0x1   :  { %152 = vmatprep.subr.bf16.mxu0 %v330_v0  ;;  %287 = vmatprep.subr.bf16.mxu1 %v330_v0  ;;  %v312_v1 = vld [vmem:[%s432_s1] sm:$0xff]   ;;  %v313_v2 = vld [vmem:[%s432_s1 + $0x8] sm:$0xff]   ;;  %v314_v3 = vld [vmem:[%s432_s1 + $0x10] sm:$0xff]  }
   0x2   :  { %153 = vmatpush1.bf16.msra.mxu0 %v312_v1  ;;  %299 = vmatpush1.bf16.msra.mxu1 %v312_v1  ;;  %v315_v4 = vld [vmem:[%s432_s1 + $0x18] sm:$0xff]   ;;  %v326_v5 = vld [vmem:[%s433_s0 + $0x4] ss:$8 sps:$4 sm:$0xff]   ;;  %v318_v9 = vld [vmem:[%s432_s1 + $0x30] sm:$0xff]   ;;  %v219_v18 = vshrl.u32 %v218_v17, 7 }
   0x3   :  { %154 = vmatprep.subr.bf16.mxu0 %v330_v0  ;;  %288 = vmatprep.subr.bf16.mxu1 %v330_v0  ;;  %v316_v6 = vld [vmem:[%s432_s1 + $0x20] sm:$0xff]   ;;  %v329_v7 = vld [vmem:[%s433_s0 + $0x14] ss:$8 sps:$4 sm:$0xff]   ;;  %v317_v8 = vld [vmem:[%s432_s1 + $0x28] sm:$0xff]  }
   0x4   :  { %266 = vmatprep.mubr.msk.bf16.mxu0 %vm145_vm0, %v326_v5  ;;  %267 = vmatprep.mubr.msk.bf16.mxu1 %vm145_vm0, %v329_v7  ;;  %v319_v10 = vld [vmem:[%s432_s1 + $0x38] sm:$0xff]   ;;  %v320_v11 = vld [vmem:[%s432_s1 + $0x40] sm:$0xff]   ;;  %v321_v12 = vld [vmem:[%s432_s1 + $0x48] sm:$0xff]   ;;  %v220_v21 = vsub.s32 0, %v219_v18 }
   0x5   :  { %v322_v13 = vld [vmem:[%s432_s1 + $0x50] sm:$0xff]   ;;  %v323_v14 = vld [vmem:[%s432_s1 + $0x58] sm:$0xff]   ;;  %v324_v15 = vld [vmem:[%s433_s0] ss:$8 sps:$4 sm:$0xff]  }
   0x6   :  { %155 = vmatpush1.bf16.msra.mxu0 %v313_v2  ;;  %300 = vmatpush1.bf16.msra.mxu1 %v313_v2  ;;  %v327_v16 = vld [vmem:[%s433_s0 + $0x10] ss:$8 sps:$4 sm:$0xff]   ;;  %v216_v19 = vld [vmem:[%s434_s2] sm:$0x1] }
   0x7   :  { %156 = vmatprep.subr.bf16.mxu0 %v330_v0  ;;  %289 = vmatprep.subr.bf16.mxu1 %v330_v0  ;;  %v217_v20 = vunpack.c.l.bf16 %v216_v19 }
   0x9   :  { %v221_v22 = vrot.slane %v217_v20, %v220_v21 }
   0xa   :  { %157 = vmatpush1.bf16.msra.mxu0 %v314_v3  ;;  %301 = vmatpush1.bf16.msra.mxu1 %v314_v3 }
   0xb   :  { %158 = vmatprep.subr.bf16.mxu0 %v330_v0  ;;  %290 = vmatprep.subr.bf16.mxu1 %v330_v0 }
   0xe   :  { %159 = vmatpush1.bf16.msra.mxu0 %v315_v4  ;;  %302 = vmatpush1.bf16.msra.mxu1 %v315_v4 }
   0xf   :  { %160 = vmatprep.subr.bf16.mxu0 %v330_v0  ;;  %291 = vmatprep.subr.bf16.mxu1 %v330_v0 }
  0x12   :  { %161 = vmatpush1.bf16.msra.mxu0 %v316_v6  ;;  %303 = vmatpush1.bf16.msra.mxu1 %v316_v6 }
  0x13   :  { %162 = vmatprep.subr.bf16.mxu0 %v330_v0  ;;  %292 = vmatprep.subr.bf16.mxu1 %v330_v0 }
  0x16   :  { %163 = vmatpush1.bf16.msra.mxu0 %v317_v8  ;;  %304 = vmatpush1.bf16.msra.mxu1 %v317_v8 }
  0x17   :  { %164 = vmatprep.subr.bf16.mxu0 %v330_v0  ;;  %293 = vmatprep.subr.bf16.mxu1 %v330_v0 }
  0x1a   :  { %165 = vmatpush1.bf16.msra.mxu0 %v318_v9  ;;  %305 = vmatpush1.bf16.msra.mxu1 %v318_v9 }
  0x1b   :  { %166 = vmatprep.subr.bf16.mxu0 %v330_v0  ;;  %294 = vmatprep.subr.bf16.mxu1 %v330_v0 }
  0x1e   :  { %167 = vmatpush1.bf16.msra.mxu0 %v319_v10  ;;  %306 = vmatpush1.bf16.msra.mxu1 %v319_v10 }
  0x1f   :  { %168 = vmatprep.subr.bf16.mxu0 %v330_v0  ;;  %295 = vmatprep.subr.bf16.mxu1 %v330_v0 }
  0x22   :  { %169 = vmatpush1.bf16.msra.mxu0 %v320_v11  ;;  %307 = vmatpush1.bf16.msra.mxu1 %v320_v11 }
  0x23   :  { %170 = vmatprep.subr.bf16.mxu0 %v330_v0  ;;  %296 = vmatprep.subr.bf16.mxu1 %v330_v0 }
  0x26   :  { %171 = vmatpush1.bf16.msra.mxu0 %v321_v12  ;;  %308 = vmatpush1.bf16.msra.mxu1 %v321_v12 }
  0x27   :  { %172 = vmatprep.subr.bf16.mxu0 %v330_v0  ;;  %297 = vmatprep.subr.bf16.mxu1 %v330_v0 }
  0x2a   :  { %173 = vmatpush1.bf16.msra.mxu0 %v322_v13  ;;  %309 = vmatpush1.bf16.msra.mxu1 %v322_v13 }
  0x2b   :  { %174 = vmatprep.subr.bf16.mxu0 %v330_v0  ;;  %298 = vmatprep.subr.bf16.mxu1 %v330_v0 }
  0x2e   :  { %175 = vmatpush1.bf16.msra.mxu0 %v323_v14  ;;  %310 = vmatpush1.bf16.msra.mxu1 %v323_v14 }
  0x31   :  { %185 = vmatmul.mubr.bf16.vlgmr.msra.gmra.mrb[0].mxu0 %v324_v15  ;;  %193 = vmatmul.mubr.bf16.vlgmr.msra.gmra.mrb[0].mxu1 %v327_v16 }
 0x104   :  { %v186_v23 = vpop.f32.mrb[0].mxu0  ;;  %v194_v24 = vpop.f32.mrb[0].mxu1 }
 0x105   :  { %v188_v25 = vpop.f32.mrb[1].mxu0  ;;  %v196_v26 = vpop.f32.mrb[1].mxu1  ;;  %v222_v29 = vadd.f32 %v221_v22, %v186_v23  ;;  %v224_v30 = vadd.f32 %v221_v22, %v194_v24 }
 0x106   :  { %v189_v27 = vpop.f32.mrb[2].mxu0  ;;  %v197_v28 = vpop.f32.mrb[2].mxu1 }
 0x107   :  { %v223_v31 = vadd.f32 %v221_v22, %v189_v27  ;;  %v225_v32 = vadd.f32 %v221_v22, %v197_v28  ;;  %v191_v33 = vpop.f32.mrb[3].mxu0  ;;  %v199_v34 = vpop.f32.mrb[3].mxu1 }
 0x109   :  { %v279_v35 = vpack.c.bf16 %v223_v31, %v222_v29  ;;  %v284_v36 = vpack.c.bf16 %v225_v32, %v224_v30 }
 0x10b   :  { %280 = vst [vmem:[%s435_s3] sm:$0xff] %v279_v35   ;;  %286 = vst [vmem:[%s435_s3 + $0x8] sm:$0xff] %v284_v36  }

// kernel: _lambda_.11
= control target key start
LH: loop header
LB: loop body
LE: loop exit
PB: predicated region body
PF: predicated region fallthrough
CT: control target
= control target key end

     0   :  { %v192_v0 = vmov 0.0   ;;  %vm193_vm0 = vmmov 0   ;;  %v134_v10 = vlaneseq  ;;  %s247_s1 = inlined_call_operand.vmem [shape: bf16[128,128], index: 1, kind: input, shape index: {}]   ;;  %s248_s0 = inlined_call_operand.vmem [shape: bf16[2,128], index: 0, kind: input, shape index: {}]   ;;  %s249_s2 = inlined_call_operand.vmem [shape: bf16[1,128], index: 2, kind: input, shape index: {}]   ;;  %s250_s3 = inlined_call_operand.vmem [shape: bf16[2,128], index: 3, kind: output, shape index: {}]  }
   0x1   :  { %162 = vmatprep.subr.bf16.mxu0 %v192_v0  ;;  %19 = vst [vmem:[#allocation2] sm:$0x3] %v192_v0  ;;  %v184_v1 = vld [vmem:[%s247_s1] sm:$0xff]   ;;  %178 = vmatprep.mubr.msk.bf16.mxu0 %vm193_vm0, %v192_v0  ;;  %v185_v2 = vld [vmem:[%s247_s1 + $0x8] sm:$0xff]   ;;  %v186_v3 = vld [vmem:[%s247_s1 + $0x10] sm:$0xff]  }
   0x2   :  { %163 = vmatpush3.bf16.msra.mxu0 %v184_v1  ;;  %v187_v4 = vld [vmem:[%s247_s1 + $0x18] sm:$0xff]   ;;  %v188_v5 = vld [vmem:[%s247_s1 + $0x20] sm:$0xff]   ;;  %v189_v6 = vld [vmem:[%s247_s1 + $0x28] sm:$0xff]   ;;  %v135_v12 = vshrl.u32 %v134_v10, 7 }
   0x3   :  { %164 = vmatprep.subr.bf16.mxu0 %v192_v0  ;;  %v190_v7 = vld [vmem:[%s247_s1 + $0x30] sm:$0xff]   ;;  %v191_v8 = vld [vmem:[%s247_s1 + $0x38] sm:$0xff]   ;;  %v21_v9 = vld [vmem:[%s248_s0] sm:$0x1] }
   0x4   :  { %v132_v14 = vld [vmem:[%s249_s2] sm:$0x1]  ;;  %v136_v19 = vsub.s32 0, %v135_v12 }
   0x5   :  { %v133_v18 = vunpack.c.l.bf16 %v132_v14 }
   0x6   :  { %165 = vmatpush3.bf16.msra.mxu0 %v185_v2 }
   0x7   :  { %166 = vmatprep.subr.bf16.mxu0 %v192_v0  ;;  %v137_v21 = vrot.slane %v133_v18, %v136_v19 }
   0x8   :  { %v20_v11 = vld [vmem:[#allocation2] sm:$0x3] }
   0xa   :  { %167 = vmatpush3.bf16.msra.mxu0 %v186_v3 }
   0xb   :  { %168 = vmatprep.subr.bf16.mxu0 %v192_v0 }
   0xe   :  { %169 = vmatpush3.bf16.msra.mxu0 %v187_v4 }
   0xf   :  { %170 = vmatprep.subr.bf16.mxu0 %v192_v0 }
  0x12   :  { %171 = vmatpush3.bf16.msra.mxu0 %v188_v5 }
  0x13   :  { %172 = vmatprep.subr.bf16.mxu0 %v192_v0 }
  0x16   :  { %173 = vmatpush3.bf16.msra.mxu0 %v189_v6 }
  0x17   :  { %174 = vmatprep.subr.bf16.mxu0 %v192_v0 }
  0x1a   :  { %175 = vmatpush3.bf16.msra.mxu0 %v190_v7 }
  0x1b   :  { %176 = vmatprep.subr.bf16.mxu0 %v192_v0 }
  0x1e   :  { %177 = vmatpush3.bf16.msra.mxu0 %v191_v8 }
  0x21   :  { %179 = vmatmul.mubr.bf16.vlgmr.msra.gmra.mrb[0].mxu0 %v21_v9 }
  0xf4   :  { %v120_v13 = vpop.f32.mrb[0].mxu0 }
  0xf5   :  { %v126_v15 = vadd.f32 %v120_v13, %v20_v11  ;;  %v180_v16 = vpop.f32.mrb[1].mxu0 }
  0xf6   :  { %v123_v17 = vpop.f32.mrb[2].mxu0 }
  0xf7   :  { %127 = vst [vmem:[#allocation2] sm:$0x3] %v126_v15  ;;  %v181_v20 = vpop.f32.mrb[3].mxu0 }
  0xfe   :  { %v131_v22 = vld [vmem:[#allocation2] sm:$0x3] }
  0xff   :  { %v138_v23 = vadd.f32 %v137_v21, %v131_v22 }
 0x101   :  { %v139_v24 = vpack.c.bf16 %v138_v23, %v138_v23 }
 0x103   :  { %140 = vst [vmem:[%s250_s3] sm:$0x1] %v139_v24 }

// kernel: _lambda_.17
= control target key start
LH: loop header
LB: loop body
LE: loop exit
PB: predicated region body
PF: predicated region fallthrough
CT: control target
= control target key end

     0   :  { %vm32_vm0 = vcmask 1045504   ;;  %v85_v34 = vlaneseq  ;;  %s221_s0 = inlined_call_operand.vmem [shape: bf16[38,128], index: 0, kind: input, shape index: {}]   ;;  %s222_s1 = inlined_call_operand.vmem [shape: bf16[1,128], index: 1, kind: input, shape index: {}]   ;;  %s223_s2 = inlined_call_operand.vmem [shape: bf16[1,128], index: 2, kind: input, shape index: {}]   ;;  %s224_s3 = inlined_call_operand.vmem [shape: bf16[38,128], index: 3, kind: output, shape index: {}]  }
   0x1   :  { %v146_v0 = vld [vmem:[%s221_s0] sm:$0xff]   ;;  %v163_v1 = vld [vmem:[%s221_s0 + $0x8] sm:$0xff]   ;;  %v18_v2 = vld [vmem:[%s221_s0 + $0x10] sm:$0x7] }
   0x2   :  { %v148_v3 = vunpack.c.h.bf16 %v146_v0  ;;  %v147_v4 = vunpack.c.l.bf16 %v146_v0  ;;  %v23_v5 = vunpack.c.l.bf16 %v18_v2  ;;  %v151_v6 = vunpack.c.l.bf16 %v163_v1  ;;  %v83_v40 = vld [vmem:[%s222_s1] sm:$0x1] }
   0x3   :  { %v152_v8 = vunpack.c.h.bf16 %v163_v1  ;;  %v86_v39 = vshrl.u32 %v85_v34, 7  ;;  %v94_v44 = vld [vmem:[%s223_s2] sm:$0x1]  ;;  %v84_v47 = vunpack.c.l.bf16 %v83_v40 }
   0x4   :  { %26 = vadd.xlane.f32.xlu1 %v148_v3  ;;  %24 = vadd.xlane.f32.xlu0 %v147_v4  ;;  %v33_v7 = vsel %vm32_vm0, %v23_v5, 0.0  ;;  %v95_v51 = vunpack.c.l.bf16 %v94_v44 }
   0x5   :  { %v87_v48 = vsub.s32 0, %v86_v39 }
   0x7   :  { %v88_v52 = vrot.slane %v84_v47, %v87_v48  ;;  %v99_v55 = vrot.slane %v95_v51, %v87_v48 }
   0x8   :  { %28 = vadd.xlane.f32.xlu1 %v151_v6  ;;  %34 = vadd.xlane.f32.xlu0 %v33_v7 }
   0xc   :  { %30 = vadd.xlane.f32.xlu0 %v152_v8 }
  0x91   :  { %v27_v9 = vpop.xlane.xlu1 %26  ;;  %v25_v10 = vpop.xlane.xlu0 %24 }
  0x92   :  { %v38_v11 = vmul.f32 0.0078125, %v27_v9  ;;  %v37_v12 = vmul.f32 0.0078125, %v25_v10 }
  0x94   :  { %v43_v13 = vsub.f32 %v148_v3, %v38_v11  ;;  %v42_v14 = vsub.f32 %v147_v4, %v37_v12 }
  0x95   :  { %v29_v15 = vpop.xlane.xlu1 %28  ;;  %v35_v16 = vpop.xlane.xlu0 %34 }
  0x96   :  { %v39_v17 = vmul.f32 0.0078125, %v29_v15  ;;  %v41_v18 = vmul.f32 0.0078125, %v35_v16  ;;  %v48_v19 = vmul.f32 %v43_v13, %v43_v13  ;;  %v47_v20 = vmul.f32 %v42_v14, %v42_v14 }
  0x98   :  { %v44_v21 = vsub.f32 %v151_v6, %v39_v17  ;;  %v46_v22 = vsub.f32 %v23_v5, %v41_v18  ;;  %54 = vadd.xlane.f32.xlu0 %v48_v19  ;;  %52 = vadd.xlane.f32.xlu1 %v47_v20 }
  0x99   :  { %v31_v23 = vpop.xlane.xlu0 %30 }
  0x9a   :  { %v40_v24 = vmul.f32 0.0078125, %v31_v23  ;;  %v49_v25 = vmul.f32 %v44_v21, %v44_v21  ;;  %v51_v26 = vmul.f32 %v46_v22, %v46_v22 }
  0x9c   :  { %v45_v27 = vsub.f32 %v152_v8, %v40_v24  ;;  %56 = vadd.xlane.f32.xlu1 %v49_v25  ;;  %v60_v29 = vsel %vm32_vm0, %v51_v26, 0.0 }
  0x9e   :  { %v50_v28 = vmul.f32 %v45_v27, %v45_v27 }
  0xa0   :  { %61 = vadd.xlane.f32.xlu1 %v60_v29  ;;  %58 = vadd.xlane.f32.xlu0 %v50_v28 }
 0x125   :  { %v53_v30 = vpop.xlane.xlu1 %52  ;;  %v55_v31 = vpop.xlane.xlu0 %54 }
 0x126   :  { %v63_v32 = vmul.f32 0.0078125, %v53_v30  ;;  %v64_v33 = vmul.f32 0.0078125, %v55_v31 }
 0x128   :  { %v68_v35 = vadd.f32 1e-05, %v63_v32  ;;  %v69_v36 = vadd.f32 1e-05, %v64_v33 }
 0x129   :  { %v57_v37 = vpop.xlane.xlu1 %56 }
 0x12a   :  { %165 = vrsqrt.f32 %v68_v35  ;;  %v65_v38 = vmul.f32 0.0078125, %v57_v37 }
 0x12b   :  { %167 = vrsqrt.f32 %v69_v36 }
 0x12c   :  { %v70_v41 = vadd.f32 1e-05, %v65_v38 }
 0x12d   :  { %v62_v42 = vpop.xlane.xlu1 %61  ;;  %v59_v43 = vpop.xlane.xlu0 %58 }
 0x12e   :  { %169 = vrsqrt.f32 %v70_v41  ;;  %v67_v45 = vmul.f32 0.0078125, %v62_v42  ;;  %v66_v46 = vmul.f32 0.0078125, %v59_v43 }
 0x130   :  { %v72_v49 = vadd.f32 1e-05, %v67_v45  ;;  %v71_v50 = vadd.f32 1e-05, %v66_v46 }
 0x132   :  { %171 = vrsqrt.f32 %v72_v49 }
 0x133   :  { %173 = vrsqrt.f32 %v71_v50 }
 0x134   :  { %v166_v53 = vpop.eup %165 }
 0x135   :  { %v168_v54 = vpop.eup %167  ;;  %v78_v56 = vmul.f32 %v166_v53, %v42_v14 }
 0x136   :  { %v79_v57 = vmul.f32 %v168_v54, %v43_v13 }
 0x137   :  { %v89_v58 = vmul.f32 %v88_v52, %v78_v56 }
 0x138   :  { %v170_v59 = vpop.eup %169  ;;  %v90_v60 = vmul.f32 %v88_v52, %v79_v57 }
 0x139   :  { %v100_v61 = vadd.f32 %v99_v55, %v89_v58  ;;  %v80_v63 = vmul.f32 %v170_v59, %v44_v21 }
 0x13a   :  { %v101_v62 = vadd.f32 %v99_v55, %v90_v60 }
 0x13b   :  { %v91_v4 = vmul.f32 %v88_v52, %v80_v63 }
 0x13c   :  { %v172_v0 = vpop.eup %171  ;;  %v156_v1 = vpack.c.bf16 %v101_v62, %v100_v61 }
 0x13d   :  { %v174_v2 = vpop.eup %173  ;;  %v82_v3 = vmul.f32 %v172_v0, %v46_v22  ;;  %v102_v9 = vadd.f32 %v99_v55, %v91_v4 }
 0x13e   :  { %157 = vst [vmem:[%s224_s3] sm:$0xff] %v156_v1   ;;  %v81_v5 = vmul.f32 %v174_v2, %v45_v27 }
 0x13f   :  { %v93_v6 = vmul.f32 %v88_v52, %v82_v3 }
 0x140   :  { %v92_v7 = vmul.f32 %v88_v52, %v81_v5 }
 0x141   :  { %v104_v8 = vadd.f32 %v99_v55, %v93_v6 }
 0x142   :  { %v103_v10 = vadd.f32 %v99_v55, %v92_v7 }
 0x143   :  { %v144_v11 = vpack.c.bf16 %v104_v8, %v104_v8 }
 0x144   :  { %v161_v12 = vpack.c.bf16 %v103_v10, %v102_v9 }
 0x145   :  { %130 = vst [vmem:[%s224_s3 + $0x10] sm:$0x7] %v144_v11 }
 0x146   :  { %164 = vst [vmem:[%s224_s3 + $0x8] sm:$0xff] %v161_v12  }

// kernel: _lambda_.20
= control target key start
LH: loop header
LB: loop body
LE: loop exit
PB: predicated region body
PF: predicated region fallthrough
CT: control target
= control target key end

     0   :  { %vm20_vm0 = vcmask 1041408   ;;  %v208_v3 = vmov 0.0   ;;  %vm209_vm1 = vmmov 0   ;;  %v37_v19 = vlaneseq  ;;  %s273_s0 = inlined_call_operand.vmem [shape: bf16[2,128], index: 0, kind: input, shape index: {}]   ;;  %s274_s3 = inlined_call_operand.vmem [shape: bf16[128,128], index: 3, kind: input, shape index: {}]   ;;  %s275_s1 = inlined_call_operand.vmem [shape: bf16[1,128], index: 1, kind: input, shape index: {}]   ;;  %s276_s2 = inlined_call_operand.vmem [shape: bf16[1,128], index: 2, kind: input, shape index: {}]   ;;  %s277_s4 = inlined_call_operand.vmem [shape: f32[2,128], index: 4, kind: output, shape index: {}]  }
   0x1   :  { %v18_v0 = vld [vmem:[%s273_s0] sm:$0x1]  ;;  %176 = vmatprep.subr.bf16.mxu0 %v208_v3  ;;  %v199_v5 = vld [vmem:[%s274_s3 + $0x8] sm:$0xff]   ;;  %v200_v11 = vld [vmem:[%s274_s3 + $0x10] sm:$0xff]   ;;  %192 = vmatprep.mubr.msk.bf16.mxu0 %vm209_vm1, %v208_v3 }
   0x2   :  { %v19_v1 = vunpack.c.l.bf16 %v18_v0  ;;  %v198_v4 = vld [vmem:[%s274_s3] sm:$0xff]   ;;  %v201_v12 = vld [vmem:[%s274_s3 + $0x18] sm:$0xff]   ;;  %v203_v14 = vld [vmem:[%s274_s3 + $0x28] sm:$0xff]   ;;  %v38_v21 = vshrl.u32 %v37_v19, 7 }
   0x3   :  { %177 = vmatpush3.bf16.msra.mxu0 %v198_v4  ;;  %v202_v13 = vld [vmem:[%s274_s3 + $0x20] sm:$0xff]   ;;  %v204_v15 = vld [vmem:[%s274_s3 + $0x30] sm:$0xff]   ;;  %v205_v16 = vld [vmem:[%s274_s3 + $0x38] sm:$0xff]  }
   0x4   :  { %v21_v2 = vsel %vm20_vm0, %v19_v1, 0.0  ;;  %178 = vmatprep.subr.bf16.mxu0 %v208_v3  ;;  %v35_v22 = vld [vmem:[%s275_s1] sm:$0x1]  ;;  %v39_v25 = vsub.s32 0, %v38_v21 }
   0x5   :  { %22 = vadd.xlane.f32.xlu0 %v21_v2  ;;  %v42_v23 = vld [vmem:[%s276_s2] sm:$0x1]  ;;  %v36_v24 = vunpack.c.l.bf16 %v35_v22 }
   0x6   :  { %v43_v26 = vunpack.c.l.bf16 %v42_v23 }
   0x7   :  { %179 = vmatpush3.bf16.msra.mxu0 %v199_v5  ;;  %v40_v27 = vrot.slane %v36_v24, %v39_v25 }
   0x8   :  { %180 = vmatprep.subr.bf16.mxu0 %v208_v3  ;;  %v47_v30 = vrot.slane %v43_v26, %v39_v25 }
   0xb   :  { %181 = vmatpush3.bf16.msra.mxu0 %v200_v11 }
   0xc   :  { %182 = vmatprep.subr.bf16.mxu0 %v208_v3 }
   0xf   :  { %183 = vmatpush3.bf16.msra.mxu0 %v201_v12 }
  0x10   :  { %184 = vmatprep.subr.bf16.mxu0 %v208_v3 }
  0x13   :  { %185 = vmatpush3.bf16.msra.mxu0 %v202_v13 }
  0x14   :  { %186 = vmatprep.subr.bf16.mxu0 %v208_v3 }
  0x17   :  { %187 = vmatpush3.bf16.msra.mxu0 %v203_v14 }
  0x18   :  { %188 = vmatprep.subr.bf16.mxu0 %v208_v3 }
  0x1b   :  { %189 = vmatpush3.bf16.msra.mxu0 %v204_v15 }
  0x1c   :  { %190 = vmatprep.subr.bf16.mxu0 %v208_v3 }
  0x1f   :  { %191 = vmatpush3.bf16.msra.mxu0 %v205_v16 }
  0x92   :  { %v23_v6 = vpop.xlane.xlu0 %22 }
  0x93   :  { %v25_v7 = vmul.f32 0.0078125, %v23_v6 }
  0x95   :  { %v26_v8 = vsub.f32 %v19_v1, %v25_v7 }
  0x97   :  { %v27_v9 = vmul.f32 %v26_v8, %v26_v8 }
  0x99   :  { %v28_v10 = vsel %vm20_vm0, %v27_v9, 0.0 }
  0x9a   :  { %29 = vadd.xlane.f32.xlu0 %v28_v10 }
 0x127   :  { %v30_v17 = vpop.xlane.xlu0 %29 }
 0x128   :  { %v31_v18 = vmul.f32 0.0078125, %v30_v17 }
 0x12a   :  { %v32_v20 = vadd.f32 1e-05, %v31_v18 }
 0x12c   :  { %206 = vrsqrt.f32 %v32_v20 }
 0x136   :  { %v207_v28 = vpop.eup %206 }
 0x137   :  { %v34_v29 = vmul.f32 %v207_v28, %v26_v8 }
 0x139   :  { %v41_v31 = vmul.f32 %v40_v27, %v34_v29 }
 0x13b   :  { %v48_v32 = vadd.f32 %v47_v30, %v41_v31 }
 0x13d   :  { %v49_v33 = vpack.c.bf16 %v48_v32, %v48_v32 }
 0x13f   :  { %193 = vmatmul.mubr.bf16.vlgmr.msra.gmra.mrb[0].mxu0 %v49_v33 }
 0x212   :  { %v148_v34 = vpop.f32.mrb[0].mxu0 }
 0x213   :  { %154 = vst [vmem:[%s277_s4] sm:$0x3] %v148_v34  ;;  %v194_v35 = vpop.f32.mrb[1].mxu0 }
 0x214   :  { %v151_v36 = vpop.f32.mrb[2].mxu0 }
 0x215   :  { %v195_v37 = vpop.f32.mrb[3].mxu0 }

// kernel: _lambda_.21
= control target key start
LH: loop header
LB: loop body
LE: loop exit
PB: predicated region body
PF: predicated region fallthrough
CT: control target
= control target key end

     0   :  { %s215_s0 = inlined_call_operand.vmem [shape: f32[2,128], index: 0, kind: input, shape index: {}]   ;;  %s216_s1 = inlined_call_operand.vmem [shape: f32[4,128], index: 1, kind: input, shape index: {}]   ;;  %s217_s2 = inlined_call_operand.<no memory space> [shape: f32[1,1], index: 2, kind: input, shape index: {}]   ;;  %s218_s3 = inlined_call_operand.hbm [shape: f32[2,4], index: 3, kind: output, shape index: {}]  }
   0x1   :  { %v8_v0 = vstv %s217_s2 }
   0x2   :  { %9 = vst [vmem:[#allocation2] sm:$0x1] %v8_v0 }
   0x3   :  { %v18_v1 = vld [vmem:[%s216_s1] sm:$0xf]  ;;  %vm27_vm0 = vcmask 1043456  }
   0x4   :  { %v17_v2 = vld [vmem:[%s215_s0] sm:$0x3]  ;;  %v26_v3 = vmul.f32 %v18_v1, %v18_v1 }
   0x5   :  { %v19_v4 = vmul.f32 %v17_v2, %v17_v2 }
   0x6   :  { %10 = vsyncpa [#allocation4], 0  ;;  %vm20_vm1 = vcmask 1041408   ;;  %v28_v5 = vsel %vm27_vm0, %v26_v3, 0.0  ;;  %v171_v7 = vmov 0.0   ;;  %vm172_vm2 = vmmov 0  }
   0x7   :  { %29 = vadd.xlane.f32.xlu0 %v28_v5  ;;  %v21_v6 = vsel %vm20_vm1, %v19_v4, 0.0  ;;  %129 = vmatprep.subr.mxu0 %v171_v7  ;;  %s173_s2 = smov [#allocation3]   ;;  %vm111_vm3 = vcmask 25600  }
   0x8   :  { %131 = vmatprep.mubr.msk.f32.mxu0 %vm172_vm2, %v171_v7  ;;  %s119_s18 = sshll.u32 %s173_s2, 4  ;;  %s120_s18 = int_to_ptr.vmem [resolvable:$true] %s119_s18 }
   0x9   :  { %v33_v8 = vld [vmem:[#allocation2] sm:$0x1]  ;;  %s147_s19 = scalar_lea.vmem %s120_s18, 32  ;;  %p152_p1 = scmp.lt.s32.totalorder %s120_s18, %s120_s18 }
   0xa   :  { %134 = vpush %v33_v8  ;;  %p148_p0 = scmp.ne.s32.totalorder %s120_s18, %s147_s19  ;;  %p153_p2 = scmp.lt.s32.totalorder %s147_s19, %s147_s19 }
   0xb   :  { %22 = vadd.xlane.f32.xlu0 %v21_v6 }
   0xc   :  { %p154_p3 = por %p153_p2, %p152_p1 }
   0xe   :  { %p155_p4 = pnand %p154_p3, %p148_p0 }
  0x3b   :  { %s135_s1 = spop %134 }
  0x3c   :  { %v35_v9 = vstv %s135_s1 }
  0x3d   :  { %v36_v10 = vmul.f32 1.442695, %v35_v9 }
  0x3f   :  { %141 = vpow2.f32 %v36_v10 }
  0x49   :  { %v142_v11 = vpop.eup %141 }
  0x4a   :  { %136 = vpush %v142_v11 }
  0x7b   :  { %s137_s0 = spop %136 }
  0x7c   :  { %v109_v18 = vstv %s137_s0 }
  0x94   :  { %v30_v12 = vpop.xlane.xlu0 %29 }
  0x95   :  { %143 = vrsqrt.f32 %v30_v12 }
  0x98   :  { %v23_v13 = vpop.xlane.xlu0 %22 }
  0x99   :  { %145 = vrsqrt.f32 %v23_v13 }
  0x9f   :  { %v144_v14 = vpop.eup %143 }
  0xa0   :  { %v32_v15 = vmul.f32 %v144_v14, %v18_v1 }
  0xa2   :  { %130 = vmatpush3.xpose.msra.mxu0 %v32_v15 }
  0xa3   :  { %v146_v16 = vpop.eup %145 }
  0xa4   :  { %v25_v17 = vmul.f32 %v146_v16, %v17_v2 }
  0xa6   :  { %132 = vmatmul.mubr.f32.vlgmr.msra.gmra.mrb[0].mxu0 %v25_v17 }
 0x179   :  { %v105_v19 = vpop.f32.mrb[0].mxu0 }
 0x17a   :  { %v110_v20 = vmul.f32 %v109_v18, %v105_v19  ;;  %v133_v21 = vpop.f32.mrb[1].mxu0 }
 0x17c   :  { %112 = vst.msk [vmem:[#allocation3] sm:$0x3] %vm111_vm3, %v110_v20 }
 0x17d   :  { %158 = shalt.err (!%p155_p4)
}
 0x17e   :  { %s159_s22 = scalar_lea.hbm %s218_s3, 32 }
 0x17f   :  { %p160_p5 = scmp.ne.s32.totalorder %s218_s3, %s159_s22  ;;  %p163_p6 = scmp.lt.u32.totalorder %s159_s22, %s218_s3 }
 0x181   :  { %p165_p7 = pnand %p163_p6, %p160_p5 }
 0x183   :  { %168 = shalt.err (!%p165_p7)
}
 0x184   :  { %122 = dma.vmem_to_hbm [thread:$0]  %s120_s18, 32, %s218_s3, [#allocation4]  }
 0x185   :  { %169 = dma.done.wait [#allocation4], 32  }
 0x186   :  { %170 = vsyncadd [#allocation4], 4294967264 }
 0x187   :  { %126 = vsyncpa [#allocation4], 1 }

// kernel: _lambda_.18
= control target key start
LH: loop header
LB: loop body
LE: loop exit
PB: predicated region body
PF: predicated region fallthrough
CT: control target
= control target key end

     0   :  { %s2868_s25 = smov 0   ;;  %s3406_s0 = inlined_call_operand.vmem [shape: bf16[2,19,128], index: 0, kind: input, shape index: {}]   ;;  %s3407_s1 = inlined_call_operand.vmem [shape: bf16[1,128], index: 1, kind: input, shape index: {}]   ;;  %s3408_s2 = inlined_call_operand.vmem [shape: bf16[1,128], index: 2, kind: input, shape index: {}]   ;;  %s3409_s3 = inlined_call_operand.vmem [shape: bf16[128,384], index: 3, kind: input, shape index: {}]   ;;  %s3410_s4 = inlined_call_operand.vmem [shape: bf16[1,384], index: 4, kind: input, shape index: {}]   ;;  %s3411_s5 = inlined_call_operand.vmem [shape: bf16[128,128], index: 5, kind: input, shape index: {}]   ;;  %s3412_s6 = inlined_call_operand.vmem [shape: bf16[1,128], index: 6, kind: input, shape index: {}]   ;;  %s3413_s7 = inlined_call_operand.vmem [shape: bf16[1,128], index: 7, kind: input, shape index: {}]   ;;  %s3414_s8 = inlined_call_operand.vmem [shape: bf16[1,128], index: 8, kind: input, shape index: {}]   ;;  %s3415_s9 = inlined_call_operand.vmem [shape: bf16[128,512], index: 9, kind: input, shape index: {}]   ;;  %s3416_s10 = inlined_call_operand.vmem [shape: bf16[1,512], index: 10, kind: input, shape index: {}]   ;;  %s3417_s11 = inlined_call_operand.vmem [shape: bf16[512,128], index: 11, kind: input, shape index: {}]   ;;  %s3418_s12 = inlined_call_operand.vmem [shape: bf16[1,128], index: 12, kind: input, shape index: {}]   ;;  %s3419_s13 = inlined_call_operand.vmem [shape: bf16[2,19,128], index: 13, kind: output, shape index: {}]  }
   0x1 LB: > { %s2253_s26 = sadd.s32 4294967295, %s2793_s25   ;;  %p2257_p0 = scmp.ge.s32.totalorder %s2793_s25, 1  ;;  %s2793_s25 = sphi %s2868_s25, %s23_s25  }
   0x2   : > { %p387_p1 = scmp.lt.s32.totalorder %s2793_s25, 3 }
   0x4   : > { %p388_p2 = pnand %p2257_p0, %p387_p1 }
   0x5   : > { %p431_p3 = scmp.lt.s32.totalorder (!%p388_p2), %s2253_s26, 1  ;;  %vm452_vm0 = vcmask (!%p388_p2), 1042432   ;;  %v2583_v6 = vld [vmem:[%s3409_s3 + $0x4] ss:$12 sps:$4 sm:$0xff] (!%p388_p2)   ;;  %v2585_v7 = vld [vmem:[%s3409_s3] ss:$12 sps:$4 sm:$0xff] (!%p388_p2)   ;;  %v487_v51 = vlaneseq (!%p388_p2) }
   0x6   : > { %391 = sbr.rel (%p388_p2) target bundleno = 2569 (0xa09), region = 72  ;;  %v2586_v8 = vld [vmem:[%s3409_s3 + $0x8] ss:$12 sps:$4 sm:$0xff] (!%p388_p2)   ;;  %695 = vmatprep.subr.bf16.mxu0 (!%p388_p2), %v2583_v6  ;;  %v2589_v23 = vld [vmem:[%s3409_s3 + $0x18] ss:$12 sps:$4 sm:$0xff] (!%p388_p2)   ;;  %v2795_v39 = vmov (!%p388_p2), 0  }
   0x7   : > { %v2587_v9 = vld [vmem:[%s3409_s3 + $0x1c] ss:$12 sps:$4 sm:$0xff] (!%p388_p2)   ;;  %2491 = vmatprep.subr.bf16.mxu1 (!%p388_p2), %v2586_v8  ;;  %696 = vmatpush1.bf16.msra.mxu0 (!%p388_p2), %v2585_v7  ;;  %v2590_v24 = vld [vmem:[%s3409_s3 + $0x20] ss:$12 sps:$4 sm:$0xff] (!%p388_p2)   ;;  %v2594_v27 = vld [vmem:[%s3409_s3 + $0x38] ss:$12 sps:$4 sm:$0xff] (!%p388_p2)  }
   0x8   : > { %2492 = vmatpush3.bf16.msra.mxu1 (!%p388_p2), %v2586_v8  ;;  %697 = vmatprep.subr.bf16.mxu0 (!%p388_p2), %v2587_v9  ;;  %v2591_v25 = vld [vmem:[%s3409_s3 + $0x34] ss:$12 sps:$4 sm:$0xff] (!%p388_p2)   ;;  %v2593_v26 = vld [vmem:[%s3409_s3 + $0x30] ss:$12 sps:$4 sm:$0xff] (!%p388_p2)   ;;  %v2595_v28 = vld [vmem:[%s3409_s3 + $0x4c] ss:$12 sps:$4 sm:$0xff] (!%p388_p2)  }
   0x9   : > { %2493 = vmatprep.subr.bf16.mxu1 (!%p388_p2), %v2590_v24  ;;  %v2597_v29 = vld [vmem:[%s3409_s3 + $0x48] ss:$12 sps:$4 sm:$0xff] (!%p388_p2)   ;;  %v2598_v30 = vld [vmem:[%s3409_s3 + $0x50] ss:$12 sps:$4 sm:$0xff] (!%p388_p2)   ;;  %v2601_v32 = vld [vmem:[%s3409_s3 + $0x60] ss:$12 sps:$4 sm:$0xff] (!%p388_p2)   ;;  %727 = vmatprep.mubr.bf16.mxu0 (!%p388_p2), %v2795_v39 }
   0xa   : > { %v2599_v31 = vld [vmem:[%s3409_s3 + $0x64] ss:$12 sps:$4 sm:$0xff] (!%p388_p2)   ;;  %v2602_v33 = vld [vmem:[%s3409_s3 + $0x68] ss:$12 sps:$4 sm:$0xff] (!%p388_p2)   ;;  %v2606_v35 = vld [vmem:[%s3409_s3 + $0x80] ss:$12 sps:$4 sm:$0xff] (!%p388_p2)  }
   0xb   : > { %698 = vmatpush1.bf16.msra.mxu0 (!%p388_p2), %v2589_v23  ;;  %v2603_v34 = vld [vmem:[%s3409_s3 + $0x7c] ss:$12 sps:$4 sm:$0xff] (!%p388_p2)   ;;  %v2605_v36 = vld [vmem:[%s3409_s3 + $0x78] ss:$12 sps:$4 sm:$0xff] (!%p388_p2)   ;;  %v2607_v37 = vld [vmem:[%s3409_s3 + $0x94] ss:$12 sps:$4 sm:$0xff] (!%p388_p2)  }
   0xc   : > { %2494 = vmatpush3.bf16.msra.mxu1 (!%p388_p2), %v2590_v24  ;;  %699 = vmatprep.subr.bf16.mxu0 (!%p388_p2), %v2591_v25  ;;  %v2610_v38 = vld [vmem:[%s3409_s3 + $0x98] ss:$12 sps:$4 sm:$0xff] (!%p388_p2)   ;;  %v2609_v40 = vld [vmem:[%s3409_s3 + $0x90] ss:$12 sps:$4 sm:$0xff] (!%p388_p2)   ;;  %v2613_v43 = vld [vmem:[%s3409_s3 + $0xa8] ss:$12 sps:$4 sm:$0xff] (!%p388_p2)  }
   0xd   : > { %s3421_s26 = smov (!%p431_p3, %s2253_s26), 1  ;;  %2495 = vmatprep.subr.bf16.mxu1 %v2594_v27  ;;  %v2611_v41 = vld [vmem:[%s3409_s3 + $0xac] ss:$12 sps:$4 sm:$0xff]   ;;  %v2614_v42 = vld [vmem:[%s3409_s3 + $0xb0] ss:$12 sps:$4 sm:$0xff]   ;;  %v2983_v54 = vshrl.u32 %v487_v51, 7 }
   0xe   : > { %s2571_s27 = smul.u32 12, %s3421_s26  ;;  %v485_v55 = vld [vmem:[%s3407_s1] sm:$0x1]  ;;  %vm925_vm1 = vcmask 1040384   ;;  %vm926_vm2 = vcmask 1041408   ;;  %vm821_vm3 = vcmask 523264  }
   0xf   : > { %700 = vmatpush1.bf16.msra.mxu0 %v2593_v26  ;;  %v486_v56 = vunpack.c.l.bf16 %v485_v55  ;;  %v2989_v57 = vsub.s32 0, %v2983_v54  ;;  %v494_v58 = vld [vmem:[%s3408_s2] sm:$0x1]  ;;  %s2797_s29 = smov 64   ;;  %vm882_vm4 = vcmask 154624   ;;  %vm889_vm5 = vcmask 149504  }
  0x10   : > { %s435_s30 = scalar_lea.vmem %s3406_s0, %s2571_s27  ;;  %2496 = vmatpush3.bf16.msra.mxu1 %v2594_v27  ;;  %701 = vmatprep.subr.bf16.mxu0 %v2595_v28  ;;  %v495_v62 = vunpack.c.l.bf16 %v494_v58  ;;  %s440_s15 = scalar_lea.vmem %s3419_s13, %s2571_s27  ;;  %vm2193_vm6 = vsmask.f32 1280 }
  0x11   : > { %v2389_v0 = vld [vmem:[%s435_s30] sm:$0xff]   ;;  %v444_v1 = vld [vmem:[%s435_s30 + $0x8] sm:$0x3]  ;;  %2497 = vmatprep.subr.bf16.mxu1 %v2598_v30  ;;  %v490_v61 = vrot.slane %v486_v56, %v2989_v57  ;;  %vm2194_vm7 = vmand %vm926_vm2, %vm2193_vm6 }
  0x12   : > { %v2884_v2 = vunpack.c.l.bf16 %v2389_v0  ;;  %v2886_v3 = vunpack.c.l.bf16 %v444_v1  ;;  %v2891_v5 = vunpack.c.h.bf16 %v2389_v0  ;;  %v499_v7 = vrot.slane %v495_v62, %v2989_v57 }
  0x13   : > { %702 = vmatpush1.bf16.msra.mxu0 %v2597_v29 }
  0x14   : > { %448 = vadd.xlane.f32.xlu0 %v2884_v2  ;;  %v453_v4 = vsel %vm452_vm0, %v2886_v3, 0.0  ;;  %2498 = vmatpush3.bf16.msra.mxu1 %v2598_v30 }
  0x15   : > { %454 = vadd.xlane.f32.xlu1 %v453_v4  ;;  %703 = vmatprep.subr.bf16.mxu0 %v2599_v31 }
  0x16   : > { %2499 = vmatprep.subr.bf16.mxu1 %v2602_v33 }
  0x17   : > { %704 = vmatpush1.bf16.msra.mxu0 %v2601_v32 }
  0x18   : > { %450 = vadd.xlane.f32.xlu0 %v2891_v5  ;;  %2500 = vmatpush3.bf16.msra.mxu1 %v2602_v33 }
  0x19   : > { %705 = vmatprep.subr.bf16.mxu0 %v2603_v34  ;;  %2501 = vmatprep.subr.bf16.mxu1 %v2606_v35 }
  0x1b   : > { %706 = vmatpush1.bf16.msra.mxu0 %v2605_v36  ;;  %v2796_v36 = vmov 65535  }
  0x1c   : > { %2502 = vmatpush3.bf16.msra.mxu1 %v2606_v35  ;;  %707 = vmatprep.subr.bf16.mxu0 %v2607_v37  ;;  %v927_v37 = vsel %vm925_vm1, 4294967295, %v2796_v36 }
  0x1d   : > { %2503 = vmatprep.subr.bf16.mxu1 %v2610_v38 }
  0x1f   : > { %708 = vmatpush1.bf16.msra.mxu0 %v2609_v40 }
  0x20   : > { %2504 = vmatpush3.bf16.msra.mxu1 %v2610_v38  ;;  %709 = vmatprep.subr.bf16.mxu0 %v2611_v41 }
  0x21   : > { %2505 = vmatprep.subr.bf16.mxu1 %v2614_v42 }
  0x23   : > { %710 = vmatpush1.bf16.msra.mxu0 %v2613_v43 }
  0x24   : > { %2506 = vmatpush3.bf16.msra.mxu1 %v2614_v42 }
  0xa1   : > { %v449_v10 = vpop.xlane.xlu0 %448 }
  0xa2   : > { %v457_v11 = vmul.f32 0.0078125, %v449_v10  ;;  %v455_v12 = vpop.xlane.xlu1 %454 }
  0xa3   : > { %v459_v13 = vmul.f32 0.0078125, %v455_v12 }
  0xa4   : > { %v2907_v14 = vsub.f32 %v2884_v2, %v457_v11 }
  0xa5   : > { %v2910_v15 = vsub.f32 %v2886_v3, %v459_v13  ;;  %v451_v16 = vpop.xlane.xlu0 %450 }
  0xa6   : > { %v458_v17 = vmul.f32 0.0078125, %v451_v16  ;;  %v463_v18 = vmul.f32 %v2907_v14, %v2907_v14 }
  0xa7   : > { %v465_v19 = vmul.f32 %v2910_v15, %v2910_v15 }
  0xa8   : > { %v2917_v20 = vsub.f32 %v2891_v5, %v458_v17  ;;  %466 = vadd.xlane.f32.xlu1 %v463_v18  ;;  %v550_v17 = vsub.s32 4, %v2983_v54  ;;  %v546_v18 = vsub.s32 2, %v2983_v54 }
  0xa9   : > { %v470_v21 = vsel %vm452_vm0, %v465_v19, 0.0 }
  0xaa   : > { %v464_v22 = vmul.f32 %v2917_v20, %v2917_v20 }
  0xac   : > { %471 = vadd.xlane.f32.xlu1 %v470_v21  ;;  %468 = vadd.xlane.f32.xlu0 %v464_v22 }
 0x135   : > { %v467_v44 = vpop.xlane.xlu1 %466 }
 0x136   : > { %v473_v45 = vmul.f32 0.0078125, %v467_v44 }
 0x138   : > { %v476_v46 = vadd.f32 1e-05, %v473_v45 }
 0x139   : > { %v472_v47 = vpop.xlane.xlu1 %471  ;;  %v469_v48 = vpop.xlane.xlu0 %468 }
 0x13a   : > { %2703 = vrsqrt.f32 %v476_v46  ;;  %v475_v49 = vmul.f32 0.0078125, %v472_v47  ;;  %v474_v50 = vmul.f32 0.0078125, %v469_v48  ;;  %v3016_v47 = vsel %vm926_vm2, %v927_v37, 0 }
 0x13c   : > { %v478_v52 = vadd.f32 1e-05, %v475_v49  ;;  %v477_v53 = vadd.f32 1e-05, %v474_v50 }
 0x13e   : > { %2705 = vrsqrt.f32 %v478_v52 }
 0x13f   : > { %2707 = vrsqrt.f32 %v477_v53 }
 0x144   : > { %v2704_v59 = vpop.eup %2703 }
 0x145   : > { %v482_v60 = vmul.f32 %v2704_v59, %v2907_v14  ;;  %v537_v14 = vld [vmem:[%s3410_s4] sm:$0x7] }
 0x147   : > { %v491_v6 = vmul.f32 %v490_v61, %v482_v60 }
 0x148   : > { %v2706_v63 = vpop.eup %2705 }
 0x149   : > { %v2708_v0 = vpop.eup %2707  ;;  %v484_v1 = vmul.f32 %v2706_v63, %v2910_v15  ;;  %v500_v11 = vadd.f32 %v499_v7, %v491_v6  ;;  %v538_v15 = vunpack.c.l.bf16 %v537_v14 }
 0x14a   : > { %v483_v4 = vmul.f32 %v2708_v0, %v2917_v20 }
 0x14b   : > { %v493_v8 = vmul.f32 %v490_v61, %v484_v1  ;;  %v543_v19 = vrot.slane %v538_v15, %v2989_v57  ;;  %v551_v20 = vrot.slane %v538_v15, %v550_v17  ;;  %v547_v21 = vrot.slane %v538_v15, %v546_v18 }
 0x14c   : > { %v492_v9 = vmul.f32 %v490_v61, %v483_v4 }
 0x14d   : > { %v502_v10 = vadd.f32 %v499_v7, %v493_v8  ;;  %v558_v22 = vrot.slane %v543_v19, %v2989_v57  ;;  %v566_v23 = vrot.slane %v551_v20, %v2989_v57  ;;  %v562_v25 = vrot.slane %v547_v21, %v2989_v57 }
 0x14e   : > { %v501_v12 = vadd.f32 %v499_v7, %v492_v9 }
 0x14f   : > { %v504_v13 = vpack.c.bf16 %v502_v10, %v502_v10 }
 0x150   : > { %v503_v16 = vpack.c.bf16 %v501_v12, %v500_v11 }
 0x152   : > { %728 = vmatmul.mubr.bf16.vlgmr.msra.gmra.mrb[0].mxu0 %v503_v16  ;;  %2507 = vmatprep.mubr.bf16.mxu1 %v503_v16 }
 0x153   : > { %2508 = vmatmul.mubr.bf16.vlgmr.msra.gmra.mrb[0].mxu1 %v504_v13  ;;  %737 = vmatprep.mubr.bf16.mxu0 %v2795_v39 }
 0x15a   : > { %738 = vmatmul.mubr.bf16.gmra.mrb[4].mxu0 %v504_v13 }
 0x225   : > { %v729_v24 = vpop.f32.mrb[0].mxu0 }
 0x226   : > { %v730_v26 = vadd.f32 %v729_v24, %v558_v22  ;;  %v731_v27 = vpop.f32.mrb[1].mxu0  ;;  %v2509_v28 = vpop.f32.mrb[0].mxu1 }
 0x227   : > { %v789_v29 = vadd.f32 %v2509_v28, %v566_v23  ;;  %v733_v30 = vpop.f32.mrb[2].mxu0  ;;  %v780_v31 = vpop.f32.mrb[1].mxu1  ;;  %v732_v35 = vadd.f32 %v731_v27, %v562_v25 }
 0x228   : > { %v734_v32 = vadd.f32 %v733_v30, %v558_v22  ;;  %v735_v33 = vpop.f32.mrb[3].mxu0  ;;  %v2510_v34 = vpop.f32.mrb[2].mxu1  ;;  %v812_v41 = vmul.f32 0.125, %v730_v26  ;;  %v781_v43 = vadd.f32 %v780_v31, %v566_v23 }
 0x229   : > { %v736_v38 = vadd.f32 %v735_v33, %v562_v25  ;;  %v783_v40 = vpop.f32.mrb[3].mxu1  ;;  %v3013_v45 = vpack.c.bf16 %v789_v29, %v789_v29 }
 0x22a   : > { %v813_v42 = vmul.f32 0.125, %v734_v32  ;;  %v784_v44 = vadd.f32 %v783_v40, %v566_v23 }
 0x22b   : > { %v817_v46 = vpack.c.bf16 %v736_v38, %v732_v35  ;;  %v930_v53 = vand.u32 %v3016_v47, %v3013_v45 }
 0x22c   : > { %v815_v48 = vpack.c.bf16 %v813_v42, %v812_v41  ;;  %v3018_v49 = vpack.c.bf16 %v784_v44, %v781_v43  ;;  %v2615_v41 = vld [vmem:[%s3411_s5] sm:$0xff]  }
 0x22d   : > { %v739_v50 = vpop.f32.mrb[4].mxu0  ;;  %1075 = vrot.lane.b32.xlu0 %v817_v46, %s2797_s29  ;;  %2567 = vmatprep.subr.msk.bf16.mxu0 %vm821_vm3, %v817_v46  ;;  %v829_v51 = vsel %vm821_vm3, %v817_v46, 0 }
 0x22e   : > { %v741_v52 = vpop.f32.mrb[5].mxu0  ;;  %2512 = vmatpush3.bf16.xpose.msra.mxu0 %v829_v51  ;;  %2515 = vmatprep.mubr.msk.bf16.mxu0 %vm821_vm3, %v815_v48  ;;  %v740_v59 = vadd.f32 %v739_v50, %v558_v22 }
 0x22f   : > { %v742_v55 = vadd.f32 %v741_v52, %v562_v25  ;;  %2519 = vmatprep.subr.bf16.mxu1 %v3018_v49  ;;  %v743_v56 = vpop.f32.mrb[6].mxu0 }
 0x230   : > { %2520 = vmatpush3.bf16.msra.mxu1 %v3018_v49  ;;  %v744_v58 = vpop.f32.mrb[7].mxu0  ;;  %v814_v61 = vmul.f32 0.125, %v740_v59 }
 0x231   : > { %v818_v60 = vpack.c.bf16 %v742_v55, %v742_v55  ;;  %2521 = vmatprep.subr.bf16.mxu1 %v930_v53 }
 0x232   : > { %v816_v63 = vpack.c.bf16 %v814_v61, %v814_v61 }
 0x233   : > { %1077 = vrot.lane.b32.xlu1 %v818_v60, %s2797_s29  ;;  %2568 = vmatprep.subr.msk.bf16.mxu0 %vm821_vm3, %v818_v60  ;;  %v832_v62 = vsel %vm821_vm3, %v818_v60, 0 }
 0x234   : > { %2522 = vmatpush3.bf16.msra.mxu1 %v930_v53 }
 0x235   : > { %2527 = vmatprep.subr.bf16.mxu1 %v2615_v41 }
 0x236   : > { %2514 = vmatpush3.bf16.xpose.msra.mxu0 %v832_v62 }
 0x237   : > { %1069 = vrot.lane.b32.xlu1 %v815_v48, %s2797_s29 }
 0x23b   : > { %1071 = vrot.lane.b32.xlu1 %v816_v63, %s2797_s29 }
 0x23d   : > { %2516 = vmatmul.mubr.msk.bf16.vlgmr.msra.gmra.mrb[8].mxu0 %vm821_vm3, %v816_v63 }
 0x29f   : > { %v1076_v0 = vpop.permute.xlu0 %1075 }
 0x2a0   : > { %v1086_v1 = vsel %vm821_vm3, %v1076_v0, 0  ;;  %2569 = vmatprep.subr.msk.bf16.mxu0 %vm821_vm3, %v1076_v0 }
 0x2a1   : > { %2540 = vmatpush3.bf16.xpose.msra.mxu0 %v1086_v1 }
 0x2a5   : > { %v1078_v4 = vpop.permute.xlu1 %1077 }
 0x2a6   : > { %2570 = vmatprep.subr.msk.bf16.mxu0 %vm821_vm3, %v1078_v4  ;;  %v1089_v6 = vsel %vm821_vm3, %v1078_v4, 0 }
 0x2a9   : > { %v1070_v7 = vpop.permute.xlu1 %1069  ;;  %2542 = vmatpush3.bf16.xpose.msra.mxu0 %v1089_v6  ;;  %v2616_v6 = vld [vmem:[%s3411_s5 + $0x8] sm:$0xff]  }
 0x2aa   : > { %2543 = vmatprep.mubr.msk.bf16.mxu0 %vm821_vm3, %v1070_v7  ;;  %v2617_v7 = vld [vmem:[%s3411_s5 + $0x10] sm:$0xff]  }
 0x2ad   : > { %v1072_v8 = vpop.permute.xlu1 %1071 }
 0x2b0   : > { %2544 = vmatmul.mubr.msk.bf16.vlgmr.msra.gmra.mrb[12].mxu0 %vm821_vm3, %v1072_v8 }
 0x310   : > { %v2517_v9 = vpop.f32.mrb[8].mxu0 }
 0x311   : > { %v868_v10 = vpop.f32.mrb[9].mxu0  ;;  %v890_v14 = vsel %vm889_vm5, %v2517_v9, -inf }
 0x312   : > { %v2518_v11 = vpop.f32.mrb[10].mxu0  ;;  %v883_v12 = vsel %vm882_vm4, %v868_v10, -inf }
 0x313   : > { %884 = vmax.xlane.f32.xlu0 %v883_v12  ;;  %v871_v13 = vpop.f32.mrb[11].mxu0 }
 0x314   : > { %v886_v16 = vsel %vm882_vm4, %v871_v13, -inf }
 0x315   : > { %887 = vmax.xlane.f32.xlu1 %v886_v16  ;;  %v2618_v16 = vld [vmem:[%s3411_s5 + $0x18] sm:$0xff]  }
 0x317   : > { %891 = vmax.xlane.f32.xlu0 %v890_v14  ;;  %v2619_v14 = vld [vmem:[%s3411_s5 + $0x20] sm:$0xff]  }
 0x318   : > { %2555 = vmatprep.subr.bf16.mxu0 %v2619_v14 }
 0x319   : > { %2556 = vmatpush3.bf16.msra.mxu0 %v2619_v14 }
 0x383   : > { %v2545_v15 = vpop.f32.mrb[12].mxu0 }
 0x384   : > { %v1125_v19 = vpop.f32.mrb[13].mxu0  ;;  %v1145_v40 = vsel %vm889_vm5, %v2545_v15, -inf }
 0x385   : > { %v2546_v20 = vpop.f32.mrb[14].mxu0  ;;  %v1139_v38 = vsel %vm882_vm4, %v1125_v19, -inf }
 0x386   : > { %v1128_v21 = vpop.f32.mrb[15].mxu0 }
 0x387   : > { %v1142_v37 = vsel %vm882_vm4, %v1128_v21, -inf }
 0x3a0   : > { %v885_v22 = vpop.xlane.xlu0 %884 }
 0x3a1   : > { %v893_v23 = vsub.f32 %v868_v10, %v885_v22 }
 0x3a2   : > { %v888_v24 = vpop.xlane.xlu1 %887 }
 0x3a3   : > { %v896_v25 = vmul.f32 1.442695, %v893_v23  ;;  %v894_v26 = vsub.f32 %v871_v13, %v888_v24 }
 0x3a4   : > { %v892_v27 = vpop.xlane.xlu0 %891 }
 0x3a5   : > { %2709 = vpow2.f32 %v896_v25  ;;  %v898_v28 = vmul.f32 1.442695, %v894_v26  ;;  %v895_v29 = vsub.f32 %v2517_v9, %v892_v27 }
 0x3a7   : > { %2711 = vpow2.f32 %v898_v28  ;;  %v900_v30 = vmul.f32 1.442695, %v895_v29 }
 0x3a9   : > { %2713 = vpow2.f32 %v900_v30 }
 0x3af   : > { %v2710_v31 = vpop.eup %2709 }
 0x3b0   : > { %v902_v32 = vsel %vm882_vm4, %v2710_v31, 0.0 }
 0x3b1   : > { %v2712_v33 = vpop.eup %2711  ;;  %903 = vadd.xlane.f32.xlu0 %v902_v32 }
 0x3b2   : > { %v905_v36 = vsel %vm882_vm4, %v2712_v33, 0.0 }
 0x3b3   : > { %v2714_v34 = vpop.eup %2713 }
 0x3b4   : > { %v908_v35 = vsel %vm889_vm5, %v2714_v34, 0.0 }
 0x3b5   : > { %909 = vadd.xlane.f32.xlu1 %v908_v35  ;;  %906 = vadd.xlane.f32.xlu0 %v905_v36  ;;  %v2620_v36 = vld [vmem:[%s3411_s5 + $0x28] sm:$0xff]  }
 0x3b6   : > { %2557 = vmatprep.subr.bf16.mxu0 %v2620_v36 }
 0x3b7   : > { %2558 = vmatpush3.bf16.msra.mxu0 %v2620_v36  ;;  %v2649_v36 = vld [vmem:[%s3415_s9 + $0x84] ss:$16 sps:$4 sm:$0xff]  }
 0x3b9   : > { %1143 = vmax.xlane.f32.xlu1 %v1142_v37  ;;  %1140 = vmax.xlane.f32.xlu0 %v1139_v38  ;;  %v2622_v37 = vld [vmem:[%s3411_s5 + $0x38] sm:$0xff]  }
 0x3bd   : > { %1146 = vmax.xlane.f32.xlu0 %v1145_v40 }
 0x43e   : > { %v904_v42 = vpop.xlane.xlu0 %903 }
 0x43f   : > { %2715 = vrcp.f32 %v904_v42 }
 0x442   : > { %v907_v43 = vpop.xlane.xlu0 %906  ;;  %v910_v44 = vpop.xlane.xlu1 %909 }
 0x443   : > { %2717 = vrcp.f32 %v907_v43 }
 0x444   : > { %2719 = vrcp.f32 %v910_v44 }
 0x446   : > { %v1141_v46 = vpop.xlane.xlu0 %1140  ;;  %v1144_v48 = vpop.xlane.xlu1 %1143 }
 0x447   : > { %v1149_v50 = vsub.f32 %v1128_v21, %v1144_v48  ;;  %v1148_v51 = vsub.f32 %v1125_v19, %v1141_v46 }
 0x449   : > { %v1153_v52 = vmul.f32 1.442695, %v1149_v50  ;;  %v2716_v55 = vpop.eup %2715  ;;  %v1151_v59 = vmul.f32 1.442695, %v1148_v51 }
 0x44a   : > { %v1147_v53 = vpop.xlane.xlu0 %1146  ;;  %v914_v62 = vmul.f32 %v2716_v55, %v2710_v31 }
 0x44b   : > { %v1150_v56 = vsub.f32 %v2545_v15, %v1147_v53  ;;  %2721 = vpow2.f32 %v1153_v52  ;;  %v810_v52 = vld [vmem:[%s3412_s6] sm:$0x1] }
 0x44c   : > { %v811_v53 = vunpack.c.l.bf16 %v810_v52  ;;  %v2670_v52 = vld [vmem:[%s3415_s9 + $0xec] ss:$16 sps:$4 sm:$0xff]  }
 0x44d   : > { %v2718_v58 = vpop.eup %2717  ;;  %v1155_v60 = vmul.f32 1.442695, %v1150_v56 }
 0x44e   : > { %v2720_v61 = vpop.eup %2719  ;;  %v915_v63 = vmul.f32 %v2718_v58, %v2712_v33  ;;  %v1063_v55 = vrot.slane %v811_v53, %v2989_v57  ;;  %v2665_v53 = vld [vmem:[%s3415_s9 + $0xe0] ss:$16 sps:$4 sm:$0xff]  }
 0x44f   : > { %v916_v0 = vmul.f32 %v2720_v61, %v2714_v34  ;;  %2723 = vpow2.f32 %v1155_v60 }
 0x450   : > { %v917_v1 = vpack.c.bf16 %v915_v63, %v914_v62  ;;  %2725 = vpow2.f32 %v1151_v59 }
 0x451   : > { %v918_v4 = vpack.c.bf16 %v916_v0, %v916_v0 }
 0x452   : > { %2523 = vmatprep.mubr.msk.bf16.mxu1 %vm882_vm4, %v917_v1 }
 0x453   : > { %2524 = vmatmul.mubr.msk.bf16.vlgmr.msra.gmra.mrb[4].mxu1 %vm882_vm4, %v918_v4 }
 0x454   : > { %2528 = vmatpush3.bf16.msra.mxu1 %v2615_v41 }
 0x455   : > { %2529 = vmatprep.subr.bf16.mxu1 %v2616_v6  ;;  %v2722_v8 = vpop.eup %2721 }
 0x456   : > { %v1160_v9 = vsel %vm882_vm4, %v2722_v8, 0.0 }
 0x457   : > { %1161 = vadd.xlane.f32.xlu0 %v1160_v9 }
 0x458   : > { %2530 = vmatpush3.bf16.msra.mxu1 %v2616_v6 }
 0x459   : > { %v2724_v10 = vpop.eup %2723  ;;  %2531 = vmatprep.subr.bf16.mxu1 %v2617_v7 }
 0x45a   : > { %v1163_v11 = vsel %vm889_vm5, %v2724_v10, 0.0  ;;  %v2726_v12 = vpop.eup %2725 }
 0x45b   : > { %1164 = vadd.xlane.f32.xlu1 %v1163_v11  ;;  %v1157_v13 = vsel %vm882_vm4, %v2726_v12, 0.0  ;;  %v2631_v11 = vld [vmem:[%s3415_s9 + $0x24] ss:$16 sps:$4 sm:$0xff]  }
 0x45c   : > { %2532 = vmatpush3.bf16.msra.mxu1 %v2617_v7 }
 0x45d   : > { %2533 = vmatprep.subr.bf16.mxu1 %v2618_v16 }
 0x45f   : > { %1158 = vadd.xlane.f32.xlu1 %v1157_v13  ;;  %v2629_v13 = vld [vmem:[%s3415_s9 + $0x20] ss:$16 sps:$4 sm:$0xff]  }
 0x460   : > { %2534 = vmatpush3.bf16.msra.mxu1 %v2618_v16  ;;  %v2632_v16 = vld [vmem:[%s3415_s9 + $0x28] ss:$16 sps:$4 sm:$0xff]  }
 0x46d   : > { %1176 = vrot.lane.b32.xlu0 %v3018_v49, %s2797_s29 }
 0x470   : > { %1178 = vrot.lane.b32.xlu1 %v3013_v45, %s2797_s29 }
 0x4e4   : > { %v1162_v15 = vpop.xlane.xlu0 %1161 }
 0x4e8   : > { %v1177_v19 = vpop.permute.xlu0 %1176  ;;  %v1165_v20 = vpop.xlane.xlu1 %1164 }
 0x4e9   : > { %2547 = vmatprep.subr.bf16.mxu1 %v1177_v19 }
 0x4ec   : > { %v1159_v21 = vpop.xlane.xlu1 %1158 }
 0x4ed   : > { %2727 = vrcp.f32 %v1159_v21 }
 0x4ee   : > { %2729 = vrcp.f32 %v1162_v15 }
 0x4ef   : > { %2731 = vrcp.f32 %v1165_v20 }
 0x4f0   : > { %v1179_v27 = vpop.permute.xlu1 %1178 }
 0x4f1   : > { %v1188_v33 = vand.u32 %v1179_v27, %v3016_v47  ;;  %v2621_v47 = vld [vmem:[%s3411_s5 + $0x30] sm:$0xff]  }
 0x4f2   : > { %2559 = vmatprep.subr.bf16.mxu0 %v2621_v47 }
 0x4f3   : > { %2560 = vmatpush3.bf16.msra.mxu0 %v2621_v47  ;;  %v2652_v47 = vld [vmem:[%s3415_s9 + $0x8c] ss:$16 sps:$4 sm:$0xff]  }
 0x4f4   : > { %2561 = vmatprep.subr.bf16.mxu0 %v2622_v37 }
 0x4f7   : > { %v2728_v22 = vpop.eup %2727  ;;  %2562 = vmatpush3.bf16.msra.mxu0 %v2622_v37  ;;  %v2647_v37 = vld [vmem:[%s3415_s9 + $0x80] ss:$16 sps:$4 sm:$0xff]  }
 0x4f8   : > { %v2730_v49 = vpop.eup %2729  ;;  %v1169_v45 = vmul.f32 %v2728_v22, %v2726_v12  ;;  %v2634_v12 = vld [vmem:[%s3415_s9 + $0x2c] ss:$16 sps:$4 sm:$0xff]  }
 0x4f9   : > { %v1170_v29 = vmul.f32 %v2730_v49, %v2722_v8  ;;  %v2732_v31 = vpop.eup %2731 }
 0x4fa   : > { %v1171_v34 = vmul.f32 %v2732_v31, %v2724_v10  ;;  %v2626_v10 = vld [vmem:[%s3415_s9 + $0x8] ss:$16 sps:$4 sm:$0xff]  }
 0x4fb   : > { %v1172_v32 = vpack.c.bf16 %v1170_v29, %v1169_v45  ;;  %v2640_v29 = vld [vmem:[%s3415_s9 + $0x4c] ss:$16 sps:$4 sm:$0xff]   ;;  %v2638_v31 = vld [vmem:[%s3415_s9 + $0x48] ss:$16 sps:$4 sm:$0xff]  }
 0x4fc   : > { %v1173_v35 = vpack.c.bf16 %v1171_v34, %v1171_v34  ;;  %v2641_v34 = vld [vmem:[%s3415_s9 + $0x60] ss:$16 sps:$4 sm:$0xff]  }
 0x526   : > { %v2525_v23 = vpop.f32.mrb[4].mxu1 }
 0x527   : > { %v966_v24 = vpop.f32.mrb[5].mxu1  ;;  %v981_v30 = vpack.c.bf16 %v2525_v23, %v2525_v23 }
 0x528   : > { %v2526_v25 = vpop.f32.mrb[6].mxu1 }
 0x529   : > { %v969_v26 = vpop.f32.mrb[7].mxu1 }
 0x52a   : > { %v980_v28 = vpack.c.bf16 %v969_v26, %v966_v24 }
 0x52c   : > { %2535 = vmatprep.mubr.msk.bf16.mxu1 %vm821_vm3, %v980_v28  ;;  %v2637_v28 = vld [vmem:[%s3415_s9 + $0x44] ss:$16 sps:$4 sm:$0xff]  }
 0x52d   : > { %2536 = vmatmul.mubr.msk.bf16.vlgmr.msra.gmra.mrb[8].mxu1 %vm821_vm3, %v981_v30  ;;  %v2635_v30 = vld [vmem:[%s3415_s9 + $0x40] ss:$16 sps:$4 sm:$0xff]  }
 0x52e   : > { %2548 = vmatpush3.bf16.msra.mxu1 %v1177_v19  ;;  %2551 = vmatprep.mubr.msk.bf16.mxu1 %vm882_vm4, %v1172_v32  ;;  %v2643_v32 = vld [vmem:[%s3415_s9 + $0x64] ss:$16 sps:$4 sm:$0xff]  }
 0x52f   : > { %2549 = vmatprep.subr.bf16.mxu1 %v1188_v33 }
 0x532   : > { %2550 = vmatpush3.bf16.msra.mxu1 %v1188_v33  ;;  %v2646_v33 = vld [vmem:[%s3415_s9 + $0x6c] ss:$16 sps:$4 sm:$0xff]  }
 0x535   : > { %2552 = vmatmul.mubr.msk.bf16.vlgmr.msra.gmra.mrb[12].mxu1 %vm882_vm4, %v1173_v35  ;;  %v2644_v35 = vld [vmem:[%s3415_s9 + $0x68] ss:$16 sps:$4 sm:$0xff]  }
 0x536   : > { %1642 = vmatprep.mubr.bf16.mxu1 %v2795_v39 }
 0x600   : > { %v2537_v38 = vpop.f32.mrb[8].mxu1 }
 0x601   : > { %v1046_v40 = vpop.f32.mrb[9].mxu1  ;;  %v1066_v56 = vadd.f32 %v2537_v38, %v1063_v55  ;;  %v2650_v38 = vld [vmem:[%s3415_s9 + $0x88] ss:$16 sps:$4 sm:$0xff]  }
 0x602   : > { %v2538_v41 = vpop.f32.mrb[10].mxu1  ;;  %v1064_v58 = vadd.f32 %v1063_v55, %v1046_v40  ;;  %v2655_v40 = vld [vmem:[%s3415_s9 + $0xa4] ss:$16 sps:$4 sm:$0xff]  }
 0x603   : > { %v1049_v42 = vpop.f32.mrb[11].mxu1  ;;  %v2658_v41 = vld [vmem:[%s3415_s9 + $0xac] ss:$16 sps:$4 sm:$0xff]  }
 0x604   : > { %v1065_v62 = vadd.f32 %v1063_v55, %v1049_v42  ;;  %v2653_v42 = vld [vmem:[%s3415_s9 + $0xa0] ss:$16 sps:$4 sm:$0xff]   ;;  %v2668_v55 = vld [vmem:[%s3415_s9 + $0xe8] ss:$16 sps:$4 sm:$0xff]  }
 0x608   : > { %v2553_v43 = vpop.f32.mrb[12].mxu1 }
 0x609   : > { %v1224_v44 = vpop.f32.mrb[13].mxu1  ;;  %v1239_v51 = vpack.c.bf16 %v2553_v43, %v2553_v43  ;;  %v2656_v43 = vld [vmem:[%s3415_s9 + $0xa8] ss:$16 sps:$4 sm:$0xff]  }
 0x60a   : > { %v2554_v46 = vpop.f32.mrb[14].mxu1 }
 0x60b   : > { %v1227_v48 = vpop.f32.mrb[15].mxu1  ;;  %v2664_v46 = vld [vmem:[%s3415_s9 + $0xcc] ss:$16 sps:$4 sm:$0xff]  }
 0x60c   : > { %v1238_v50 = vpack.c.bf16 %v1227_v48, %v1224_v44  ;;  %v2661_v44 = vld [vmem:[%s3415_s9 + $0xc4] ss:$16 sps:$4 sm:$0xff]   ;;  %v2659_v48 = vld [vmem:[%s3415_s9 + $0xc0] ss:$16 sps:$4 sm:$0xff]  }
 0x60e   : > { %2563 = vmatprep.mubr.msk.bf16.mxu0 %vm821_vm3, %v1238_v50  ;;  %v2662_v50 = vld [vmem:[%s3415_s9 + $0xc8] ss:$16 sps:$4 sm:$0xff]  }
 0x60f   : > { %2564 = vmatmul.mubr.msk.bf16.vlgmr.msra.gmra.mrb[16].mxu0 %vm821_vm3, %v1239_v51  ;;  %v2667_v51 = vld [vmem:[%s3415_s9 + $0xe4] ss:$16 sps:$4 sm:$0xff]  }
 0x610   : > { %1693 = vmatprep.mubr.bf16.mxu0 %v2795_v39 }
 0x6e2   : > { %v2565_v59 = vpop.f32.mrb[16].mxu0 }
 0x6e3   : > { %v1320_v60 = vadd.f32 %v2565_v59, %v1066_v56  ;;  %v1304_v61 = vpop.f32.mrb[17].mxu0 }
 0x6e4   : > { %v1318_v63 = vadd.f32 %v1304_v61, %v1064_v58  ;;  %v2566_v0 = vpop.f32.mrb[18].mxu0 }
 0x6e5   : > { %v1307_v1 = vpop.f32.mrb[19].mxu0  ;;  %v3103_v8 = vadd.f32 %v1320_v60, %v2886_v3  ;;  %v2628_v3 = vld [vmem:[%s3415_s9 + $0xc] ss:$16 sps:$4 sm:$0xff]   ;;  %v1359_v0 = vld [vmem:[%s3413_s7] sm:$0x1] }
 0x6e6   : > { %v3096_v4 = vadd.f32 %v2884_v2, %v1318_v63  ;;  %v1319_v6 = vadd.f32 %v1307_v1, %v1065_v62  ;;  %v2623_v2 = vld [vmem:[%s3415_s9] ss:$16 sps:$4 sm:$0xff]   ;;  %1661 = vmatprep.subr.bf16.mxu0 %v2628_v3 }
 0x6e7   : > { %v1328_v9 = vsel %vm452_vm0, %v3103_v8, 0.0  ;;  %1662 = vmatpush1.bf16.msra.mxu0 %v2626_v10 }
 0x6e8   : > { %v3099_v7 = vadd.f32 %v2891_v5, %v1319_v6  ;;  %1324 = vadd.xlane.f32.xlu1 %v3096_v4  ;;  %v2625_v5 = vld [vmem:[%s3415_s9 + $0x4] ss:$16 sps:$4 sm:$0xff]   ;;  %1663 = vmatprep.subr.bf16.mxu0 %v2634_v12 }
 0x6e9   : > { %1610 = vmatprep.subr.bf16.mxu1 %v2625_v5 }
 0x6ea   : > { %1326 = vadd.xlane.f32.xlu0 %v3099_v7  ;;  %1611 = vmatpush1.bf16.msra.mxu1 %v2623_v2  ;;  %v1368_v2 = vld [vmem:[%s3414_s8] sm:$0x1] }
 0x6eb   : > { %1612 = vmatprep.subr.bf16.mxu1 %v2631_v11  ;;  %1664 = vmatpush1.bf16.msra.mxu0 %v2632_v16  ;;  %v1369_v10 = vunpack.c.l.bf16 %v1368_v2 }
 0x6ec   : > { %1665 = vmatprep.subr.bf16.mxu0 %v2640_v29  ;;  %v2676_v29 = vld [vmem:[%s3417_s11 + $0xc8] sm:$0xff]  }
 0x6ee   : > { %1329 = vadd.xlane.f32.xlu0 %v1328_v9  ;;  %1613 = vmatpush1.bf16.msra.mxu1 %v2629_v13  ;;  %v1360_v9 = vunpack.c.l.bf16 %v1359_v0 }
 0x6ef   : > { %1614 = vmatprep.subr.bf16.mxu1 %v2637_v28  ;;  %1666 = vmatpush1.bf16.msra.mxu0 %v2638_v31  ;;  %v2675_v28 = vld [vmem:[%s3417_s11 + $0x48] sm:$0xff]  }
 0x6f0   : > { %1667 = vmatprep.subr.bf16.mxu0 %v2646_v33  ;;  %v1364_v5 = vrot.slane %v1360_v9, %v2989_v57  ;;  %v2678_v31 = vld [vmem:[%s3417_s11 + $0x88] sm:$0xff]   ;;  %v2680_v33 = vld [vmem:[%s3417_s11 + $0xd0] sm:$0xff]  }
 0x6f2   : > { %1615 = vmatpush1.bf16.msra.mxu1 %v2635_v30  ;;  %v2677_v30 = vld [vmem:[%s3417_s11 + $0x8] sm:$0xff]  }
 0x6f3   : > { %1616 = vmatprep.subr.bf16.mxu1 %v2643_v32  ;;  %1668 = vmatpush1.bf16.msra.mxu0 %v2644_v35  ;;  %v2679_v32 = vld [vmem:[%s3417_s11 + $0x50] sm:$0xff]  }
 0x6f4   : > { %1669 = vmatprep.subr.bf16.mxu0 %v2652_v47  ;;  %v2682_v35 = vld [vmem:[%s3417_s11 + $0x90] sm:$0xff]   ;;  %v2684_v47 = vld [vmem:[%s3417_s11 + $0xd8] sm:$0xff]  }
 0x6f6   : > { %1617 = vmatpush1.bf16.msra.mxu1 %v2641_v34  ;;  %v2681_v34 = vld [vmem:[%s3417_s11 + $0x10] sm:$0xff]  }
 0x6f7   : > { %1618 = vmatprep.subr.bf16.mxu1 %v2649_v36  ;;  %1670 = vmatpush1.bf16.msra.mxu0 %v2650_v38  ;;  %v2683_v36 = vld [vmem:[%s3417_s11 + $0x58] sm:$0xff]  }
 0x6f8   : > { %1671 = vmatprep.subr.bf16.mxu0 %v2658_v41  ;;  %v2686_v38 = vld [vmem:[%s3417_s11 + $0x98] sm:$0xff]   ;;  %v2688_v41 = vld [vmem:[%s3417_s11 + $0xe0] sm:$0xff]  }
 0x6fa   : > { %1619 = vmatpush1.bf16.msra.mxu1 %v2647_v37  ;;  %v2685_v37 = vld [vmem:[%s3417_s11 + $0x18] sm:$0xff]  }
 0x6fb   : > { %1620 = vmatprep.subr.bf16.mxu1 %v2655_v40  ;;  %1672 = vmatpush1.bf16.msra.mxu0 %v2656_v43  ;;  %v2687_v40 = vld [vmem:[%s3417_s11 + $0x60] sm:$0xff]  }
 0x6fc   : > { %1673 = vmatprep.subr.bf16.mxu0 %v2664_v46  ;;  %v2690_v43 = vld [vmem:[%s3417_s11 + $0xa0] sm:$0xff]   ;;  %v2692_v46 = vld [vmem:[%s3417_s11 + $0xe8] sm:$0xff]  }
 0x6fe   : > { %1621 = vmatpush1.bf16.msra.mxu1 %v2653_v42  ;;  %v2689_v42 = vld [vmem:[%s3417_s11 + $0x20] sm:$0xff]  }
 0x6ff   : > { %1622 = vmatprep.subr.bf16.mxu1 %v2661_v44  ;;  %1674 = vmatpush1.bf16.msra.mxu0 %v2662_v50  ;;  %v2691_v44 = vld [vmem:[%s3417_s11 + $0x68] sm:$0xff]  }
 0x700   : > { %1675 = vmatprep.subr.bf16.mxu0 %v2670_v52  ;;  %v2694_v50 = vld [vmem:[%s3417_s11 + $0xa8] sm:$0xff]   ;;  %v2696_v52 = vld [vmem:[%s3417_s11 + $0xf0] sm:$0xff]  }
 0x702   : > { %1623 = vmatpush1.bf16.msra.mxu1 %v2659_v48  ;;  %v2693_v48 = vld [vmem:[%s3417_s11 + $0x28] sm:$0xff]  }
 0x703   : > { %1624 = vmatprep.subr.bf16.mxu1 %v2667_v51  ;;  %1676 = vmatpush1.bf16.msra.mxu0 %v2668_v55  ;;  %v2695_v51 = vld [vmem:[%s3417_s11 + $0x70] sm:$0xff]  }
 0x704   : > { %v2698_v55 = vld [vmem:[%s3417_s11 + $0xb0] sm:$0xff]  }
 0x706   : > { %1625 = vmatpush1.bf16.msra.mxu1 %v2665_v53  ;;  %v2697_v53 = vld [vmem:[%s3417_s11 + $0x30] sm:$0xff]  }
 0x775   : > { %v1325_v14 = vpop.xlane.xlu1 %1324 }
 0x776   : > { %v1331_v15 = vmul.f32 0.0078125, %v1325_v14  ;;  %v1373_v14 = vrot.slane %v1369_v10, %v2989_v57 }
 0x777   : > { %v1327_v19 = vpop.xlane.xlu0 %1326 }
 0x778   : > { %v3133_v20 = vsub.f32 %v3096_v4, %v1331_v15  ;;  %v1332_v21 = vmul.f32 0.0078125, %v1327_v19 }
 0x77a   : > { %v3136_v22 = vsub.f32 %v3099_v7, %v1332_v21  ;;  %v1337_v23 = vmul.f32 %v3133_v20, %v3133_v20 }
 0x77b   : > { %v1330_v49 = vpop.xlane.xlu0 %1329 }
 0x77c   : > { %v1333_v24 = vmul.f32 0.0078125, %v1330_v49  ;;  %1340 = vadd.xlane.f32.xlu1 %v1337_v23  ;;  %v1338_v25 = vmul.f32 %v3136_v22, %v3136_v22 }
 0x77e   : > { %v3143_v45 = vsub.f32 %v3103_v8, %v1333_v24  ;;  %1342 = vadd.xlane.f32.xlu0 %v1338_v25 }
 0x780   : > { %v1339_v26 = vmul.f32 %v3143_v45, %v3143_v45 }
 0x782   : > { %v1344_v27 = vsel %vm452_vm0, %v1339_v26, 0.0 }
 0x783   : > { %1345 = vadd.xlane.f32.xlu1 %v1344_v27  ;;  %v2673_v27 = vld [vmem:[%s3417_s11] sm:$0xff]  }
 0x809   : > { %v1341_v56 = vpop.xlane.xlu1 %1340 }
 0x80a   : > { %v1347_v58 = vmul.f32 0.0078125, %v1341_v56  ;;  %v2699_v56 = vld [vmem:[%s3417_s11 + $0x78] sm:$0xff]  }
 0x80b   : > { %v1343_v59 = vpop.xlane.xlu0 %1342 }
 0x80c   : > { %v1350_v60 = vadd.f32 1e-05, %v1347_v58  ;;  %v1348_v61 = vmul.f32 0.0078125, %v1343_v59  ;;  %v2700_v58 = vld [vmem:[%s3417_s11 + $0xf8] sm:$0xff]  }
 0x80d   : > { %v2701_v59 = vld [vmem:[%s3417_s11 + $0x38] sm:$0xff]  }
 0x80e   : > { %2733 = vrsqrt.f32 %v1350_v60  ;;  %v1351_v62 = vadd.f32 1e-05, %v1348_v61  ;;  %v2702_v60 = vld [vmem:[%s3417_s11 + $0xb8] sm:$0xff]   ;;  %v1411_v61 = vld [vmem:[%s3416_s10] sm:$0xf] }
 0x810   : > { %2735 = vrsqrt.f32 %v1351_v62  ;;  %v1346_v63 = vpop.xlane.xlu1 %1345  ;;  %v1412_v62 = vunpack.c.l.bf16 %v1411_v61 }
 0x811   : > { %v1349_v1 = vmul.f32 0.0078125, %v1346_v63  ;;  %v1428_v63 = vsub.s32 6, %v2983_v54 }
 0x812   : > { %v1417_v0 = vrot.slane %v1412_v62, %v2989_v57 }
 0x813   : > { %v1352_v6 = vadd.f32 1e-05, %v1349_v1  ;;  %v1425_v1 = vrot.slane %v1412_v62, %v550_v17  ;;  %v1429_v9 = vrot.slane %v1412_v62, %v1428_v63 }
 0x814   : > { %v1437_v2 = vrot.slane %v1417_v0, %v2989_v57 }
 0x815   : > { %2737 = vrsqrt.f32 %v1352_v6  ;;  %v1421_v6 = vrot.slane %v1412_v62, %v546_v18 }
 0x817   : > { %v1441_v10 = vrot.slane %v1421_v6, %v2989_v57 }
 0x818   : > { %v2734_v3 = vpop.eup %2733 }
 0x819   : > { %v1356_v11 = vmul.f32 %v2734_v3, %v3133_v20  ;;  %v1449_v3 = vrot.slane %v1429_v9, %v2989_v57 }
 0x81a   : > { %v2736_v12 = vpop.eup %2735 }
 0x81b   : > { %v1357_v13 = vmul.f32 %v2736_v12, %v3136_v22  ;;  %v1365_v16 = vmul.f32 %v1364_v5, %v1356_v11  ;;  %v2671_v22 = vld [vmem:[%s3417_s11 + $0x40] sm:$0xff]  }
 0x81c   : > { %2435 = vmatprep.subr.bf16.mxu1 %v2671_v22 }
 0x81d   : > { %v1366_v15 = vmul.f32 %v1364_v5, %v1357_v13  ;;  %v1374_v21 = vadd.f32 %v1373_v14, %v1365_v16 }
 0x81f   : > { %v2738_v19 = vpop.eup %2737  ;;  %v1375_v23 = vadd.f32 %v1373_v14, %v1366_v15 }
 0x820   : > { %v1358_v49 = vmul.f32 %v2738_v19, %v3143_v45  ;;  %v2672_v45 = vld [vmem:[%s3417_s11 + $0xc0] sm:$0xff]  }
 0x821   : > { %v1377_v24 = vpack.c.bf16 %v1375_v23, %v1374_v21  ;;  %2463 = vmatprep.subr.bf16.mxu0 %v2672_v45 }
 0x822   : > { %v1367_v25 = vmul.f32 %v1364_v5, %v1358_v49  ;;  %v1445_v5 = vrot.slane %v1425_v1, %v2989_v57 }
 0x823   : > { %1643 = vmatmul.mubr.bf16.vlgmr.msra.gmra.mrb[16].mxu1 %v1377_v24  ;;  %1694 = vmatmul.mubr.bf16.vlgmr.msra.gmra.mrb[20].mxu0 %v1377_v24 }
 0x824   : > { %1652 = vmatprep.mubr.bf16.mxu1 %v2795_v39  ;;  %1703 = vmatprep.mubr.bf16.mxu0 %v2795_v39  ;;  %v1376_v20 = vadd.f32 %v1373_v14, %v1367_v25  ;;  %v2674_v39 = vld [vmem:[%s3417_s11 + $0x80] sm:$0xff]  }
 0x825   : > { %2436 = vmatpush3.bf16.msra.mxu1 %v2673_v27  ;;  %2464 = vmatpush3.bf16.msra.mxu0 %v2674_v39 }
 0x826   : > { %v1378_v26 = vpack.c.bf16 %v1376_v20, %v1376_v20  ;;  %2437 = vmatprep.subr.bf16.mxu1 %v2675_v28  ;;  %2465 = vmatprep.subr.bf16.mxu0 %v2676_v29 }
 0x829   : > { %2438 = vmatpush3.bf16.msra.mxu1 %v2677_v30  ;;  %2466 = vmatpush3.bf16.msra.mxu0 %v2678_v31 }
 0x82a   : > { %2439 = vmatprep.subr.bf16.mxu1 %v2679_v32  ;;  %2467 = vmatprep.subr.bf16.mxu0 %v2680_v33 }
 0x82b   : > { %1653 = vmatmul.mubr.bf16.gmra.mrb[20].mxu1 %v1378_v26  ;;  %1704 = vmatmul.mubr.bf16.gmra.mrb[24].mxu0 %v1378_v26 }
 0x82d   : > { %2440 = vmatpush3.bf16.msra.mxu1 %v2681_v34  ;;  %2468 = vmatpush3.bf16.msra.mxu0 %v2682_v35 }
 0x82e   : > { %2441 = vmatprep.subr.bf16.mxu1 %v2683_v36  ;;  %2469 = vmatprep.subr.bf16.mxu0 %v2684_v47 }
 0x831   : > { %2442 = vmatpush3.bf16.msra.mxu1 %v2685_v37  ;;  %2470 = vmatpush3.bf16.msra.mxu0 %v2686_v38 }
 0x832   : > { %2443 = vmatprep.subr.bf16.mxu1 %v2687_v40  ;;  %2471 = vmatprep.subr.bf16.mxu0 %v2688_v41 }
 0x835   : > { %2444 = vmatpush3.bf16.msra.mxu1 %v2689_v42  ;;  %2472 = vmatpush3.bf16.msra.mxu0 %v2690_v43 }
 0x836   : > { %2445 = vmatprep.subr.bf16.mxu1 %v2691_v44  ;;  %2473 = vmatprep.subr.bf16.mxu0 %v2692_v46 }
 0x839   : > { %2446 = vmatpush3.bf16.msra.mxu1 %v2693_v48  ;;  %2474 = vmatpush3.bf16.msra.mxu0 %v2694_v50 }
 0x83a   : > { %2447 = vmatprep.subr.bf16.mxu1 %v2695_v51  ;;  %2475 = vmatprep.subr.bf16.mxu0 %v2696_v52 }
 0x83d   : > { %2448 = vmatpush3.bf16.msra.mxu1 %v2697_v53  ;;  %2476 = vmatpush3.bf16.msra.mxu0 %v2698_v55 }
 0x83e   : > { %2449 = vmatprep.subr.bf16.mxu1 %v2699_v56  ;;  %2477 = vmatprep.subr.bf16.mxu0 %v2700_v58 }
 0x841   : > { %2450 = vmatpush3.bf16.msra.mxu1 %v2701_v59  ;;  %2478 = vmatpush3.bf16.msra.mxu0 %v2702_v60 }
 0x8f6   : > { %v1644_v11 = vpop.f32.mrb[16].mxu1  ;;  %v1695_v12 = vpop.f32.mrb[20].mxu0 }
 0x8f7   : > { %v3342_v13 = vadd.f32 %v1644_v11, %v1437_v2  ;;  %v3344_v16 = vadd.f32 %v1695_v12, %v1445_v5  ;;  %v1646_v14 = vpop.f32.mrb[17].mxu1  ;;  %v1697_v17 = vpop.f32.mrb[21].mxu0 }
 0x8f8   : > { %v3346_v15 = vadd.f32 %v1646_v14, %v1441_v10  ;;  %v3348_v54 = vadd.f32 %v1697_v17, %v1449_v3  ;;  %v1648_v18 = vpop.f32.mrb[18].mxu1  ;;  %v1699_v19 = vpop.f32.mrb[22].mxu0 }
 0x8f9   : > { %v2336_v21 = vmul.f32 -1.702, %v3342_v13  ;;  %v2338_v23 = vmul.f32 -1.702, %v3344_v16  ;;  %v3352_v49 = vadd.f32 %v1648_v18, %v1437_v2  ;;  %v3354_v24 = vadd.f32 %v1699_v19, %v1445_v5  ;;  %v1650_v25 = vpop.f32.mrb[19].mxu1  ;;  %v1701_v20 = vpop.f32.mrb[23].mxu0 }
 0x8fa   : > { %v2337_v26 = vmul.f32 -1.702, %v3346_v15  ;;  %v2339_v22 = vmul.f32 -1.702, %v3348_v54  ;;  %v3358_v45 = vadd.f32 %v1650_v25, %v1441_v10  ;;  %v3360_v27 = vadd.f32 %v1701_v20, %v1449_v3 }
 0x8fb   : > { %v1736_v39 = vmul.f32 1.442695, %v2336_v21  ;;  %v1740_v28 = vmul.f32 1.442695, %v2338_v23  ;;  %v2340_v29 = vmul.f32 -1.702, %v3352_v49 }
 0x8fc   : > { %v1738_v30 = vmul.f32 1.442695, %v2337_v26  ;;  %v1742_v31 = vmul.f32 1.442695, %v2339_v22  ;;  %v2342_v32 = vmul.f32 -1.702, %v3354_v24 }
 0x8fd   : > { %2739 = vpow2.f32 %v1736_v39  ;;  %v1744_v33 = vmul.f32 1.442695, %v2340_v29  ;;  %v2341_v34 = vmul.f32 -1.702, %v3358_v45  ;;  %v2343_v35 = vmul.f32 -1.702, %v3360_v27 }
 0x8fe   : > { %2741 = vpow2.f32 %v1740_v28  ;;  %v1748_v36 = vmul.f32 1.442695, %v2342_v32  ;;  %v1654_v47 = vpop.f32.mrb[20].mxu1  ;;  %v1705_v37 = vpop.f32.mrb[24].mxu0 }
 0x8ff   : > { %2743 = vpow2.f32 %v1738_v30  ;;  %v1746_v38 = vmul.f32 1.442695, %v2341_v34  ;;  %v1750_v40 = vmul.f32 1.442695, %v2343_v35  ;;  %v3366_v41 = vadd.f32 %v1654_v47, %v1437_v2  ;;  %v1656_v42 = vpop.f32.mrb[21].mxu1  ;;  %v1707_v43 = vpop.f32.mrb[25].mxu0 }
 0x900   : > { %2745 = vpow2.f32 %v1742_v31  ;;  %v3368_v44 = vadd.f32 %v1705_v37, %v1445_v5  ;;  %v3370_v46 = vadd.f32 %v1656_v42, %v1441_v10  ;;  %v3372_v48 = vadd.f32 %v1707_v43, %v1449_v3  ;;  %v1658_v50 = vpop.f32.mrb[22].mxu1  ;;  %v1709_v51 = vpop.f32.mrb[26].mxu0 }
 0x901   : > { %2747 = vpow2.f32 %v1744_v33  ;;  %v2344_v52 = vmul.f32 -1.702, %v3366_v41  ;;  %v1659_v53 = vpop.f32.mrb[23].mxu1  ;;  %v1710_v55 = vpop.f32.mrb[27].mxu0 }
 0x902   : > { %2749 = vpow2.f32 %v1748_v36  ;;  %v2346_v56 = vmul.f32 -1.702, %v3368_v44  ;;  %v2345_v58 = vmul.f32 -1.702, %v3370_v46  ;;  %v2347_v59 = vmul.f32 -1.702, %v3372_v48 }
 0x903   : > { %2751 = vpow2.f32 %v1746_v38  ;;  %v1752_v60 = vmul.f32 1.442695, %v2344_v52 }
 0x904   : > { %2753 = vpow2.f32 %v1750_v40  ;;  %v1756_v61 = vmul.f32 1.442695, %v2346_v56  ;;  %v1754_v62 = vmul.f32 1.442695, %v2345_v58  ;;  %v1758_v63 = vmul.f32 1.442695, %v2347_v59 }
 0x905   : > { %2755 = vpow2.f32 %v1752_v60 }
 0x906   : > { %2757 = vpow2.f32 %v1756_v61 }
 0x907   : > { %v2740_v0 = vpop.eup %2739  ;;  %2759 = vpow2.f32 %v1754_v62 }
 0x908   : > { %v2742_v1 = vpop.eup %2741  ;;  %v1760_v6 = vadd.f32 1.0, %v2740_v0  ;;  %2761 = vpow2.f32 %v1758_v63 }
 0x909   : > { %v2744_v9 = vpop.eup %2743  ;;  %v1762_v2 = vadd.f32 1.0, %v2742_v1 }
 0x90a   : > { %v2746_v5 = vpop.eup %2745  ;;  %2763 = vrcp.f32 %v1760_v6  ;;  %v1761_v10 = vadd.f32 1.0, %v2744_v9 }
 0x90b   : > { %v2748_v3 = vpop.eup %2747  ;;  %2765 = vrcp.f32 %v1762_v2  ;;  %v1763_v11 = vadd.f32 1.0, %v2746_v5 }
 0x90c   : > { %v2750_v12 = vpop.eup %2749  ;;  %2767 = vrcp.f32 %v1761_v10  ;;  %v1764_v14 = vadd.f32 1.0, %v2748_v3 }
 0x90d   : > { %v2752_v17 = vpop.eup %2751  ;;  %2769 = vrcp.f32 %v1763_v11  ;;  %v1766_v18 = vadd.f32 1.0, %v2750_v12 }
 0x90e   : > { %v2754_v19 = vpop.eup %2753  ;;  %2771 = vrcp.f32 %v1764_v14  ;;  %v1765_v21 = vadd.f32 1.0, %v2752_v17 }
 0x90f   : > { %v2756_v23 = vpop.eup %2755  ;;  %2773 = vrcp.f32 %v1766_v18  ;;  %v1767_v25 = vadd.f32 1.0, %v2754_v19 }
 0x910   : > { %v2758_v20 = vpop.eup %2757  ;;  %2775 = vrcp.f32 %v1765_v21  ;;  %v1768_v26 = vadd.f32 1.0, %v2756_v23 }
 0x911   : > { %v2760_v22 = vpop.eup %2759  ;;  %2777 = vrcp.f32 %v1767_v25  ;;  %v1770_v28 = vadd.f32 1.0, %v2758_v20 }
 0x912   : > { %v2762_v39 = vpop.eup %2761  ;;  %v1769_v29 = vadd.f32 1.0, %v2760_v22  ;;  %2779 = vrcp.f32 %v1768_v26 }
 0x913   : > { %v1771_v30 = vadd.f32 1.0, %v2762_v39 }
 0x914   : > { %v2764_v31 = vpop.eup %2763  ;;  %2781 = vrcp.f32 %v1769_v29 }
 0x915   : > { %v2766_v32 = vpop.eup %2765  ;;  %2783 = vrcp.f32 %v1771_v30  ;;  %v1796_v47 = vmul.f32 %v2764_v31, %v3342_v13 }
 0x916   : > { %v2768_v33 = vpop.eup %2767  ;;  %2785 = vrcp.f32 %v1770_v28  ;;  %v1798_v40 = vmul.f32 %v2766_v32, %v3344_v16 }
 0x917   : > { %v2770_v34 = vpop.eup %2769  ;;  %v1797_v50 = vmul.f32 %v2768_v33, %v3346_v15 }
 0x918   : > { %v2772_v35 = vpop.eup %2771  ;;  %v1799_v53 = vmul.f32 %v2770_v34, %v3348_v54 }
 0x919   : > { %v2774_v36 = vpop.eup %2773  ;;  %v1800_v37 = vmul.f32 %v2772_v35, %v3352_v49 }
 0x91a   : > { %v2776_v38 = vpop.eup %2775  ;;  %v1802_v42 = vmul.f32 %v2774_v36, %v3354_v24 }
 0x91b   : > { %v2778_v43 = vpop.eup %2777  ;;  %v1808_v51 = vpack.c.bf16 %v1800_v37, %v1796_v47  ;;  %v1801_v52 = vmul.f32 %v2776_v38, %v3358_v45 }
 0x91c   : > { %v1810_v55 = vpack.c.bf16 %v1802_v42, %v1798_v40  ;;  %v1803_v56 = vmul.f32 %v2778_v43, %v3360_v27  ;;  %v2780_v58 = vpop.eup %2779 }
 0x91d   : > { %v1809_v13 = vpack.c.bf16 %v1801_v52, %v1797_v50  ;;  %v1804_v54 = vmul.f32 %v2780_v58, %v3366_v41 }
 0x91e   : > { %v2782_v59 = vpop.eup %2781  ;;  %v1811_v49 = vpack.c.bf16 %v1803_v56, %v1799_v53 }
 0x91f   : > { %v2784_v60 = vpop.eup %2783  ;;  %v1805_v16 = vmul.f32 %v2782_v59, %v3370_v46  ;;  %2110 = vmatprep.mubr.bf16.mxu1 %v1809_v13  ;;  %v1812_v62 = vpack.c.bf16 %v1804_v54, %v1804_v54  ;;  %v1880_v46 = vld [vmem:[%s3418_s12] sm:$0x1] }
 0x920   : > { %v2786_v24 = vpop.eup %2785  ;;  %v1807_v61 = vmul.f32 %v2784_v60, %v3372_v48  ;;  %2158 = vmatprep.mubr.bf16.mxu0 %v1811_v49  ;;  %2111 = vmatmul.mubr.bf16.vlgmr.msra.gmra.mrb[24].mxu1 %v1808_v51  ;;  %v1881_v48 = vunpack.c.l.bf16 %v1880_v46 }
 0x921   : > { %v1813_v15 = vpack.c.bf16 %v1805_v16, %v1805_v16  ;;  %2159 = vmatmul.mubr.bf16.vlgmr.msra.gmra.mrb[28].mxu0 %v1810_v55  ;;  %v1806_v27 = vmul.f32 %v2786_v24, %v3368_v44 }
 0x922   : > { %v1815_v45 = vpack.c.bf16 %v1807_v61, %v1807_v61  ;;  %v1885_v1 = vrot.slane %v1881_v48, %v2989_v57 }
 0x923   : > { %2118 = vmatprep.mubr.bf16.mxu1 %v1813_v15  ;;  %v1814_v63 = vpack.c.bf16 %v1806_v27, %v1806_v27 }
 0x924   : > { %2166 = vmatprep.mubr.bf16.mxu0 %v1815_v45 }
 0x928   : > { %2119 = vmatmul.mubr.bf16.gmra.mrb[28].mxu1 %v1812_v62 }
 0x929   : > { %2167 = vmatmul.mubr.bf16.gmra.mrb[32].mxu0 %v1814_v63 }
 0x9f3   : > { %v2451_v0 = vpop.f32.mrb[24].mxu1 }
 0x9f4   : > { %v2479_v6 = vpop.f32.mrb[28].mxu0  ;;  %v2452_v9 = vpop.f32.mrb[25].mxu1 }
 0x9f5   : > { %v2453_v41 = vadd.f32 %v2452_v9, %v2451_v0  ;;  %v2480_v2 = vpop.f32.mrb[29].mxu0  ;;  %v2454_v5 = vpop.f32.mrb[26].mxu1 }
 0x9f6   : > { %v2481_v44 = vadd.f32 %v2480_v2, %v2479_v6  ;;  %v2482_v10 = vpop.f32.mrb[30].mxu0  ;;  %v2455_v3 = vpop.f32.mrb[27].mxu1 }
 0x9f7   : > { %v2113_v11 = vadd.f32 %v2453_v41, %v1885_v1  ;;  %v2456_v12 = vadd.f32 %v2455_v3, %v2454_v5  ;;  %v2483_v14 = vpop.f32.mrb[31].mxu0 }
 0x9f8   : > { %v2484_v17 = vadd.f32 %v2483_v14, %v2482_v10 }
 0x9f9   : > { %v2161_v18 = vadd.f32 %v2481_v44, %v2113_v11  ;;  %v2116_v19 = vadd.f32 %v2456_v12, %v1885_v1 }
 0x9fb   : > { %v2164_v21 = vadd.f32 %v2484_v17, %v2116_v19  ;;  %v2457_v23 = vpop.f32.mrb[28].mxu1  ;;  %v2174_v57 = vadd.f32 %v2161_v18, %v3096_v4 }
 0x9fc   : > { %v2485_v25 = vpop.f32.mrb[32].mxu0  ;;  %v2458_v20 = vpop.f32.mrb[29].mxu1 }
 0x9fd   : > { %v2175_v26 = vadd.f32 %v2164_v21, %v3099_v7  ;;  %v2459_v22 = vadd.f32 %v2458_v20, %v2457_v23  ;;  %v2486_v39 = vpop.f32.mrb[33].mxu0  ;;  %v2460_v28 = vpop.f32.mrb[30].mxu1  ;;  %v2195_v7 = vld [vmem:[%s440_s15 + $0x8] sm:$0x3] }
 0x9fe   : > { %v2487_v29 = vadd.f32 %v2486_v39, %v2485_v25  ;;  %v2488_v30 = vpop.f32.mrb[34].mxu0  ;;  %v2461_v31 = vpop.f32.mrb[31].mxu1 }
 0x9ff   : > { %v2395_v32 = vpack.c.bf16 %v2175_v26, %v2174_v57  ;;  %v2121_v33 = vadd.f32 %v2459_v22, %v1885_v1  ;;  %v2489_v34 = vpop.f32.mrb[35].mxu0 }
 0xa01   : > { %2396 = vst [vmem:[%s440_s15] sm:$0xff] %v2395_v32   ;;  %v2169_v35 = vadd.f32 %v2487_v29, %v2121_v33 }
 0xa03   : > { %v2176_v4 = vadd.f32 %v2169_v35, %v3103_v8 }
 0xa05   : > { %v2387_v36 = vpack.c.bf16 %v2176_v4, %v2176_v4 }
 0xa07   : > { %v2196_v47 = vsel %vm2194_vm7, %v2387_v36, %v2195_v7 }
 0xa08   : > { %2197 = vst [vmem:[%s440_s15 + $0x8] sm:$0x3] %v2196_v47 }
 0xa09 PF: > { %s23_s25 = sadd.s32 1, %s2793_s25  }
 0xa0a   : > { %p20_p4 = scmp.ge.s32.totalorder %s23_s25, 4  }
 0xa0c   :  { %22 = sbr.rel (!%p20_p4) target bundleno = 1 (0x1), region = 102 }

</bundles_post_ra>
